<compile_context>
chip_gen: v7x
topology: tpu7x:2x2x1
jax: 0.10.0
libtpu: 0.0.40
codegen_flags: <defaults>
</compile_context>

<pallas_src>
import functools

import numpy as np
import jax
import jax.numpy as jnp
from jax.experimental import pallas as pl
from jax.experimental.pallas import tpu as pltpu


# ----------------------------------------------------------------------------
# Single fused kernel: conv1+pool, conv2+pool, fc1, fc2, fc3 for B images/step
# ----------------------------------------------------------------------------
def _fused_cnn_kernel(x_ref, w1_ref, b1_ref, w2_ref, b2_ref,
                      fw1_ref, fb1_ref, fw2_ref, fb2_ref, fw3_ref, fb3_ref,
                      o_ref, *, bsz):
    B = bsz
    # ---------------- stage 1: conv1(5x5) + bias + ReLU + 2x2/2 max-pool ----------------
    x = x_ref[...].astype(jnp.bfloat16)                               # (B, 28, 28)
    # row-window im2col: K = 5 kernel rows x 28 input cols = 140 (one matmul, no taps)
    r1 = jnp.concatenate(
        [x[:, ki:ki + 24, :].reshape(B * 24, 28) for ki in range(5)], axis=1)   # (B*24, 140)
    y1 = jnp.dot(r1, w1_ref[...], preferred_element_type=jnp.float32)           # (B*24, 768)
    # width pool: w1 output columns are parity-grouped (even j | odd j) -> aligned slices
    y1 = jnp.maximum(y1[:, :384], y1[:, 384:])                        # (B*24, 384)
    # height pool: adjacent conv output rows (24 rows/image, pairs never straddle images)
    y1 = jnp.max(y1.reshape(B * 12, 2, 384), axis=1)                  # (B*12, 384)
    p1 = jnp.maximum(y1 + b1_ref[...], 0.0)                           # bias+ReLU (exact after pool)
    p1 = p1.astype(jnp.bfloat16).reshape(B, 12, 384)                  # rows=(b, ip), lanes=(w, c)

    # ---------------- stage 2: conv2(5x5) + bias + ReLU + 2x2/2 max-pool ----------------
    r2 = jnp.concatenate(
        [p1[:, ki:ki + 8, :].reshape(B * 8, 384) for ki in range(5)], axis=1)   # (B*8, 1920)
    y2 = jnp.dot(r2, w2_ref[...], preferred_element_type=jnp.float32)           # (B*8, 256)
    y2 = jnp.maximum(y2[:, :128], y2[:, 128:])                        # width pool  -> (B*8, 128)
    y2 = jnp.max(y2.reshape(B * 4, 2, 128), axis=1)                   # height pool -> (B*4, 128)
    p2 = jnp.maximum(y2 + b2_ref[...], 0.0)                           # (B*4, 128)
    p2 = p2.reshape(B, 4, 128)

    # flatten in (h, w, c) order -> lane-dense (B, 512) via 128-aligned concats
    feats = jnp.concatenate([p2[:, i, :] for i in range(4)], axis=1).astype(jnp.bfloat16)

    # ---------------- fc1 -> fc2 -> fc3 (padded to 128 lanes, weights resident) --------
    h = jnp.dot(feats, fw1_ref[...], preferred_element_type=jnp.float32) + fb1_ref[...]
    h = jnp.maximum(h, 0.0).astype(jnp.bfloat16)
    h = jnp.dot(h, fw2_ref[...], preferred_element_type=jnp.float32) + fb2_ref[...]
    h = jnp.maximum(h, 0.0).astype(jnp.bfloat16)
    h = jnp.dot(h, fw3_ref[...], preferred_element_type=jnp.float32) + fb3_ref[...]
    o_ref[...] = h


def _pick_block(n):
    # Prefer a multiple-of-8 batch tile with >=2 grid steps (megacore on v7x);
    # otherwise take the whole batch in one step.
    for b in (32, 16, 8):
        if n % b == 0 and n // b >= 2:
            return b
    return n


def cnn_forward(x_nchw, p):
    n = x_nchw.shape[0]
    x3 = x_nchw.reshape(n, 28, 28).astype(jnp.float32)     # NCHW with C=1 -> free reshape
    bsz = _pick_block(n)
    kernel = functools.partial(_fused_cnn_kernel, bsz=bsz)
    out = pl.pallas_call(
        kernel,
        out_shape=jax.ShapeDtypeStruct((n, 128), jnp.float32),
        grid=(n // bsz,),
        in_specs=[
            pl.BlockSpec((bsz, 28, 28), lambda i: (i, 0, 0)),
            pl.BlockSpec((140, 768), lambda i: (0, 0)),
            pl.BlockSpec((1, 384), lambda i: (0, 0)),
            pl.BlockSpec((1920, 256), lambda i: (0, 0)),
            pl.BlockSpec((1, 128), lambda i: (0, 0)),
            pl.BlockSpec((512, 256), lambda i: (0, 0)),
            pl.BlockSpec((1, 256), lambda i: (0, 0)),
            pl.BlockSpec((256, 128), lambda i: (0, 0)),
            pl.BlockSpec((1, 128), lambda i: (0, 0)),
            pl.BlockSpec((128, 128), lambda i: (0, 0)),
            pl.BlockSpec((1, 128), lambda i: (0, 0)),
        ],
        out_specs=pl.BlockSpec((bsz, 128), lambda i: (i, 0)),
        compiler_params=pltpu.CompilerParams(dimension_semantics=("parallel",)),
    )(x3, p["w1"], p["b1"], p["w2"], p["b2"],
      p["fw1"], p["fb1"], p["fw2"], p["fb2"], p["fw3"], p["fb3"])
    return out[:, :10]


# ----------------------------------------------------------------------------
# One-time parameter preparation (hoisted out of the jitted forward)
# ----------------------------------------------------------------------------
def prepare_params(params):
    c1 = np.asarray(params["conv1_w"], np.float32)           # (32, 1, 5, 5)  (O, I, kh, kw)
    c2 = np.asarray(params["conv2_w"], np.float32)           # (32, 32, 5, 5)

    # conv1 as a banded row-window matmul: K = 5*28 = 140, N = 768.
    # Output column = p*384 + jp*32 + o  <->  conv column j = 2*jp + p (parity-grouped).
    w1 = np.zeros((140, 768), np.float32)
    for ki in range(5):
        for par in range(2):
            for jp in range(12):
                j = 2 * jp + par
                for kj in range(5):
                    w1[ki * 28 + j + kj,
                       par * 384 + jp * 32: par * 384 + jp * 32 + 32] = c1[:, 0, ki, kj]
    b1 = np.tile(np.asarray(params["conv1_b"], np.float32), 12).reshape(1, 384)

    # conv2 as a banded row-window matmul: K = 5*12*32 = 1920, N = 256 (parity-grouped).
    w2 = np.zeros((1920, 256), np.float32)
    for ki in range(5):
        for par in range(2):
            for jp in range(4):
                j = 2 * jp + par
                for kj in range(5):
                    w = j + kj
                    w2[ki * 384 + w * 32: ki * 384 + w * 32 + 32,
                       par * 128 + jp * 32: par * 128 + jp * 32 + 32] = c2[:, :, ki, kj].T
    b2 = np.tile(np.asarray(params["conv2_b"], np.float32), 4).reshape(1, 128)

    # fc1 rows permuted from torch's (c, h, w) flatten order to our (h, w, c) order.
    f1 = np.asarray(params["fc1_w"], np.float32)              # (256, 512)
    f1 = f1.reshape(256, 32, 4, 4).transpose(0, 2, 3, 1).reshape(256, 512).T   # (512, 256)
    fb1 = np.asarray(params["fc1_b"], np.float32).reshape(1, 256)

    # fc2 / fc3 padded to 128 lanes (zero columns/rows) for unmasked layouts.
    f2 = np.zeros((256, 128), np.float32)
    f2[:, :64] = np.asarray(params["fc2_w"], np.float32).T
    fb2 = np.zeros((1, 128), np.float32)
    fb2[0, :64] = np.asarray(params["fc2_b"], np.float32)

    f3 = np.zeros((128, 128), np.float32)
    f3[:64, :10] = np.asarray(params["fc3_w"], np.float32).T
    fb3 = np.zeros((1, 128), np.float32)
    fb3[0, :10] = np.asarray(params["fc3_b"], np.float32)

    return {
        "w1": jnp.asarray(w1, jnp.bfloat16), "b1": jnp.asarray(b1),
        "w2": jnp.asarray(w2, jnp.bfloat16), "b2": jnp.asarray(b2),
        "fw1": jnp.asarray(f1, jnp.bfloat16), "fb1": jnp.asarray(fb1),
        "fw2": jnp.asarray(f2, jnp.bfloat16), "fb2": jnp.asarray(fb2),
        "fw3": jnp.asarray(f3, jnp.bfloat16), "fb3": jnp.asarray(fb3),
    }


# ----------------------------------------------------------------------------
# Deterministic parameter initialization (shapes from CNNModel.__init__)
# ----------------------------------------------------------------------------
def init_params(key):
    ks = jax.random.split(key, 10)

    def nrm(k, shape, fan_in):
        return (jax.random.normal(k, shape, jnp.float32) / jnp.sqrt(fan_in)).astype(jnp.float32)

    return {
        "conv1_w": nrm(ks[0], (32, 1, 5, 5), 1 * 5 * 5),
        "conv1_b": nrm(ks[1], (32,), 1 * 5 * 5),
        "conv2_w": nrm(ks[2], (32, 32, 5, 5), 32 * 5 * 5),
        "conv2_b": nrm(ks[3], (32,), 32 * 5 * 5),
        "fc1_w": nrm(ks[4], (256, 32 * 4 * 4), 32 * 4 * 4),
        "fc1_b": nrm(ks[5], (256,), 32 * 4 * 4),
        "fc2_w": nrm(ks[6], (64, 256), 256),
        "fc2_b": nrm(ks[7], (64,), 256),
        "fc3_w": nrm(ks[8], (10, 64), 64),
        "fc3_b": nrm(ks[9], (10,), 64),
    }


# Pure-JAX reference of CNNModel.forward (f32), used only as a sanity check.
def _reference_forward(x_nchw, params):
    dn = ("NCHW", "OIHW", "NCHW")
    y = jax.lax.conv_general_dilated(x_nchw.astype(jnp.float32), params["conv1_w"],
                                     (1, 1), "VALID", dimension_numbers=dn)
    y = jax.nn.relu(y + params["conv1_b"].reshape(1, 32, 1, 1))
    y = jax.lax.reduce_window(y, -jnp.inf, jax.lax.max, (1, 1, 2, 2), (1, 1, 2, 2), "VALID")
    y = jax.lax.conv_general_dilated(y, params["conv2_w"], (1, 1), "VALID",
                                     dimension_numbers=dn)
    y = jax.nn.relu(y + params["conv2_b"].reshape(1, 32, 1, 1))
    y = jax.lax.reduce_window(y, -jnp.inf, jax.lax.max, (1, 1, 2, 2), (1, 1, 2, 2), "VALID")
    y = y.reshape(x_nchw.shape[0], -1)                       # torch (c, h, w) flatten order
    y = jax.nn.relu(y @ params["fc1_w"].T + params["fc1_b"])
    y = jax.nn.relu(y @ params["fc2_w"].T + params["fc2_b"])
    return y @ params["fc3_w"].T + params["fc3_b"]


if __name__ == "__main__":
    key = jax.random.PRNGKey(0)
    k_x, k_p = jax.random.split(key)
    # fc1 expects 32*4*4 features => input spatial size must be 28x28, 1 channel.
    x = jax.random.normal(k_x, (2, 1, 28, 28), jnp.float32)
    params = init_params(k_p)
    prepped = prepare_params(params)          # one-time weight/layout prep, outside jit

    out = jax.jit(cnn_forward)(x, prepped)
    out = jax.block_until_ready(out)
    assert out.shape == (2, 10) and out.dtype == jnp.float32

    ref = _reference_forward(x, params)       # bf16 operands => loose tolerance
    err = float(jnp.max(jnp.abs(out - ref)))
    assert err < 0.2, f"max abs error vs f32 reference: {err}"
    print("KERNEL_OK")
</pallas_src>

<mosaic_0001>
module attributes {stable_mosaic.version = 11 : i64} {
  func.func @_fused_cnn_kernel(%arg0: i32, %arg1: memref<2x28x28xf32, #tpu.memory_space<vmem>>, %arg2: memref<140x768xbf16, #tpu.memory_space<vmem>>, %arg3: memref<1x384xf32, #tpu.memory_space<vmem>>, %arg4: memref<1920x256xbf16, #tpu.memory_space<vmem>>, %arg5: memref<1x128xf32, #tpu.memory_space<vmem>>, %arg6: memref<512x256xbf16, #tpu.memory_space<vmem>>, %arg7: memref<1x256xf32, #tpu.memory_space<vmem>>, %arg8: memref<256x128xbf16, #tpu.memory_space<vmem>>, %arg9: memref<1x128xf32, #tpu.memory_space<vmem>>, %arg10: memref<128x128xbf16, #tpu.memory_space<vmem>>, %arg11: memref<1x128xf32, #tpu.memory_space<vmem>>, %arg12: memref<2x128xf32, #tpu.memory_space<vmem>>) attributes {dimension_semantics = [#tpu.dimension_semantics<parallel>], iteration_bounds = array<i64: 1>, scalar_prefetch = 0 : i64, scratch_operands = 0 : i64, tpu.core_type = #tpu.core_type<tc>, window_params = [{transform_indices = @transform_0, window_bounds = array<i64: 2, 28, 28>}, {pipeline_mode = #tpu.pipeline_mode<synchronous>, transform_indices = @transform_1, window_bounds = array<i64: 140, 768>}, {pipeline_mode = #tpu.pipeline_mode<synchronous>, transform_indices = @transform_2, window_bounds = array<i64: 1, 384>}, {pipeline_mode = #tpu.pipeline_mode<synchronous>, transform_indices = @transform_3, window_bounds = array<i64: 1920, 256>}, {pipeline_mode = #tpu.pipeline_mode<synchronous>, transform_indices = @transform_4, window_bounds = array<i64: 1, 128>}, {pipeline_mode = #tpu.pipeline_mode<synchronous>, transform_indices = @transform_5, window_bounds = array<i64: 512, 256>}, {pipeline_mode = #tpu.pipeline_mode<synchronous>, transform_indices = @transform_6, window_bounds = array<i64: 1, 256>}, {pipeline_mode = #tpu.pipeline_mode<synchronous>, transform_indices = @transform_7, window_bounds = array<i64: 256, 128>}, {pipeline_mode = #tpu.pipeline_mode<synchronous>, transform_indices = @transform_8, window_bounds = array<i64: 1, 128>}, {pipeline_mode = #tpu.pipeline_mode<synchronous>, transform_indices = @transform_9, window_bounds = array<i64: 128, 128>}, {pipeline_mode = #tpu.pipeline_mode<synchronous>, transform_indices = @transform_10, window_bounds = array<i64: 1, 128>}, {transform_indices = @transform_11, window_bounds = array<i64: 2, 128>}]} {
    %c0 = arith.constant 0 : index
    %c0_0 = arith.constant 0 : index
    %c0_1 = arith.constant 0 : index
    %0 = vector.load %arg1[%c0, %c0_0, %c0_1] : memref<2x28x28xf32, #tpu.memory_space<vmem>>, vector<2x28x28xf32>
    %1 = arith.truncf %0 : vector<2x28x28xf32> to vector<2x28x28xbf16>
    %2 = vector.extract_strided_slice %1 {offsets = [0, 0, 0], sizes = [2, 24, 28], strides = [1, 1, 1]} : vector<2x28x28xbf16> to vector<2x24x28xbf16>
    %3 = vector.shape_cast %2 : vector<2x24x28xbf16> to vector<48x28xbf16>
    %4 = vector.extract_strided_slice %1 {offsets = [0, 1, 0], sizes = [2, 24, 28], strides = [1, 1, 1]} : vector<2x28x28xbf16> to vector<2x24x28xbf16>
    %5 = vector.shape_cast %4 : vector<2x24x28xbf16> to vector<48x28xbf16>
    %6 = vector.extract_strided_slice %1 {offsets = [0, 2, 0], sizes = [2, 24, 28], strides = [1, 1, 1]} : vector<2x28x28xbf16> to vector<2x24x28xbf16>
    %7 = vector.shape_cast %6 : vector<2x24x28xbf16> to vector<48x28xbf16>
    %8 = vector.extract_strided_slice %1 {offsets = [0, 3, 0], sizes = [2, 24, 28], strides = [1, 1, 1]} : vector<2x28x28xbf16> to vector<2x24x28xbf16>
    %9 = vector.shape_cast %8 : vector<2x24x28xbf16> to vector<48x28xbf16>
    %10 = vector.extract_strided_slice %1 {offsets = [0, 4, 0], sizes = [2, 24, 28], strides = [1, 1, 1]} : vector<2x28x28xbf16> to vector<2x24x28xbf16>
    %11 = vector.shape_cast %10 : vector<2x24x28xbf16> to vector<48x28xbf16>
    %12 = tpu.concatenate %3, %5, %7, %9, %11 in 1 : vector<48x28xbf16>, vector<48x28xbf16>, vector<48x28xbf16>, vector<48x28xbf16>, vector<48x28xbf16> -> vector<48x140xbf16>
    %c0_2 = arith.constant 0 : index
    %c0_3 = arith.constant 0 : index
    %13 = vector.load %arg2[%c0_2, %c0_3] : memref<140x768xbf16, #tpu.memory_space<vmem>>, vector<140x768xbf16>
    %cst = arith.constant dense<0.000000e+00> : vector<48x768xf32>
    %14 = tpu.matmul %12, %13, %cst {dimension_numbers = #tpu.dot_dimension_numbers<[1], [0], [0], [1], [0, 0, 1, 1], [], []>} : vector<48x140xbf16>, vector<140x768xbf16>, vector<48x768xf32> -> vector<48x768xf32>
    %15 = vector.extract_strided_slice %14 {offsets = [0, 0], sizes = [48, 384], strides = [1, 1]} : vector<48x768xf32> to vector<48x384xf32>
    %16 = vector.extract_strided_slice %14 {offsets = [0, 384], sizes = [48, 384], strides = [1, 1]} : vector<48x768xf32> to vector<48x384xf32>
    %17 = arith.maximumf %15, %16 : vector<48x384xf32>
    %18 = vector.shape_cast %17 : vector<48x384xf32> to vector<24x2x384xf32>
    %cst_4 = arith.constant dense<0xFF800000> : vector<24x384xf32>
    %19 = vector.multi_reduction <maximumf>, %18, %cst_4 [1] : vector<24x2x384xf32> to vector<24x384xf32>
    %c0_5 = arith.constant 0 : index
    %c0_6 = arith.constant 0 : index
    %20 = vector.load %arg3[%c0_5, %c0_6] : memref<1x384xf32, #tpu.memory_space<vmem>>, vector<1x384xf32>
    %21 = vector.broadcast %20 : vector<1x384xf32> to vector<24x384xf32>
    %22 = arith.addf %19, %21 : vector<24x384xf32>
    %cst_7 = arith.constant 0.000000e+00 : f32
    %23 = vector.broadcast %cst_7 : f32 to vector<24x384xf32>
    %24 = arith.maximumf %22, %23 : vector<24x384xf32>
    %25 = arith.truncf %24 : vector<24x384xf32> to vector<24x384xbf16>
    %26 = vector.shape_cast %25 : vector<24x384xbf16> to vector<2x12x384xbf16>
    %27 = vector.extract_strided_slice %26 {offsets = [0, 0, 0], sizes = [2, 8, 384], strides = [1, 1, 1]} : vector<2x12x384xbf16> to vector<2x8x384xbf16>
    %28 = vector.shape_cast %27 : vector<2x8x384xbf16> to vector<16x384xbf16>
    %29 = vector.extract_strided_slice %26 {offsets = [0, 1, 0], sizes = [2, 8, 384], strides = [1, 1, 1]} : vector<2x12x384xbf16> to vector<2x8x384xbf16>
    %30 = vector.shape_cast %29 : vector<2x8x384xbf16> to vector<16x384xbf16>
    %31 = vector.extract_strided_slice %26 {offsets = [0, 2, 0], sizes = [2, 8, 384], strides = [1, 1, 1]} : vector<2x12x384xbf16> to vector<2x8x384xbf16>
    %32 = vector.shape_cast %31 : vector<2x8x384xbf16> to vector<16x384xbf16>
    %33 = vector.extract_strided_slice %26 {offsets = [0, 3, 0], sizes = [2, 8, 384], strides = [1, 1, 1]} : vector<2x12x384xbf16> to vector<2x8x384xbf16>
    %34 = vector.shape_cast %33 : vector<2x8x384xbf16> to vector<16x384xbf16>
    %35 = vector.extract_strided_slice %26 {offsets = [0, 4, 0], sizes = [2, 8, 384], strides = [1, 1, 1]} : vector<2x12x384xbf16> to vector<2x8x384xbf16>
    %36 = vector.shape_cast %35 : vector<2x8x384xbf16> to vector<16x384xbf16>
    %37 = tpu.concatenate %28, %30, %32, %34, %36 in 1 : vector<16x384xbf16>, vector<16x384xbf16>, vector<16x384xbf16>, vector<16x384xbf16>, vector<16x384xbf16> -> vector<16x1920xbf16>
    %c0_8 = arith.constant 0 : index
    %c0_9 = arith.constant 0 : index
    %38 = vector.load %arg4[%c0_8, %c0_9] : memref<1920x256xbf16, #tpu.memory_space<vmem>>, vector<1920x256xbf16>
    %cst_10 = arith.constant dense<0.000000e+00> : vector<16x256xf32>
    %39 = tpu.matmul %37, %38, %cst_10 {dimension_numbers = #tpu.dot_dimension_numbers<[1], [0], [0], [1], [0, 0, 1, 1], [], []>} : vector<16x1920xbf16>, vector<1920x256xbf16>, vector<16x256xf32> -> vector<16x256xf32>
    %40 = vector.extract_strided_slice %39 {offsets = [0, 0], sizes = [16, 128], strides = [1, 1]} : vector<16x256xf32> to vector<16x128xf32>
    %41 = vector.extract_strided_slice %39 {offsets = [0, 128], sizes = [16, 128], strides = [1, 1]} : vector<16x256xf32> to vector<16x128xf32>
    %42 = arith.maximumf %40, %41 : vector<16x128xf32>
    %43 = vector.shape_cast %42 : vector<16x128xf32> to vector<8x2x128xf32>
    %cst_11 = arith.constant dense<0xFF800000> : vector<8x128xf32>
    %44 = vector.multi_reduction <maximumf>, %43, %cst_11 [1] : vector<8x2x128xf32> to vector<8x128xf32>
    %c0_12 = arith.constant 0 : index
    %c0_13 = arith.constant 0 : index
    %45 = vector.load %arg5[%c0_12, %c0_13] : memref<1x128xf32, #tpu.memory_space<vmem>>, vector<1x128xf32>
    %46 = vector.broadcast %45 : vector<1x128xf32> to vector<8x128xf32>
    %47 = arith.addf %44, %46 : vector<8x128xf32>
    %cst_14 = arith.constant 0.000000e+00 : f32
    %48 = vector.broadcast %cst_14 : f32 to vector<8x128xf32>
    %49 = arith.maximumf %47, %48 : vector<8x128xf32>
    %50 = vector.shape_cast %49 : vector<8x128xf32> to vector<2x4x128xf32>
    %51 = vector.extract_strided_slice %50 {offsets = [0, 0, 0], sizes = [2, 1, 128], strides = [1, 1, 1]} : vector<2x4x128xf32> to vector<2x1x128xf32>
    %52 = vector.shape_cast %51 : vector<2x1x128xf32> to vector<2x128xf32>
    %53 = vector.extract_strided_slice %50 {offsets = [0, 1, 0], sizes = [2, 1, 128], strides = [1, 1, 1]} : vector<2x4x128xf32> to vector<2x1x128xf32>
    %54 = vector.shape_cast %53 : vector<2x1x128xf32> to vector<2x128xf32>
    %55 = vector.extract_strided_slice %50 {offsets = [0, 2, 0], sizes = [2, 1, 128], strides = [1, 1, 1]} : vector<2x4x128xf32> to vector<2x1x128xf32>
    %56 = vector.shape_cast %55 : vector<2x1x128xf32> to vector<2x128xf32>
    %57 = vector.extract_strided_slice %50 {offsets = [0, 3, 0], sizes = [2, 1, 128], strides = [1, 1, 1]} : vector<2x4x128xf32> to vector<2x1x128xf32>
    %58 = vector.shape_cast %57 : vector<2x1x128xf32> to vector<2x128xf32>
    %59 = tpu.concatenate %52, %54, %56, %58 in 1 : vector<2x128xf32>, vector<2x128xf32>, vector<2x128xf32>, vector<2x128xf32> -> vector<2x512xf32>
    %60 = arith.truncf %59 : vector<2x512xf32> to vector<2x512xbf16>
    %c0_15 = arith.constant 0 : index
    %c0_16 = arith.constant 0 : index
    %61 = vector.load %arg6[%c0_15, %c0_16] : memref<512x256xbf16, #tpu.memory_space<vmem>>, vector<512x256xbf16>
    %cst_17 = arith.constant dense<0.000000e+00> : vector<2x256xf32>
    %62 = tpu.matmul %60, %61, %cst_17 {dimension_numbers = #tpu.dot_dimension_numbers<[1], [0], [0], [1], [0, 0, 1, 1], [], []>} : vector<2x512xbf16>, vector<512x256xbf16>, vector<2x256xf32> -> vector<2x256xf32>
    %c0_18 = arith.constant 0 : index
    %c0_19 = arith.constant 0 : index
    %63 = vector.load %arg7[%c0_18, %c0_19] : memref<1x256xf32, #tpu.memory_space<vmem>>, vector<1x256xf32>
    %64 = vector.broadcast %63 : vector<1x256xf32> to vector<2x256xf32>
    %65 = arith.addf %62, %64 : vector<2x256xf32>
    %cst_20 = arith.constant 0.000000e+00 : f32
    %66 = vector.broadcast %cst_20 : f32 to vector<2x256xf32>
    %67 = arith.maximumf %65, %66 : vector<2x256xf32>
    %68 = arith.truncf %67 : vector<2x256xf32> to vector<2x256xbf16>
    %c0_21 = arith.constant 0 : index
    %c0_22 = arith.constant 0 : index
    %69 = vector.load %arg8[%c0_21, %c0_22] : memref<256x128xbf16, #tpu.memory_space<vmem>>, vector<256x128xbf16>
    %cst_23 = arith.constant dense<0.000000e+00> : vector<2x128xf32>
    %70 = tpu.matmul %68, %69, %cst_23 {dimension_numbers = #tpu.dot_dimension_numbers<[1], [0], [0], [1], [0, 0, 1, 1], [], []>} : vector<2x256xbf16>, vector<256x128xbf16>, vector<2x128xf32> -> vector<2x128xf32>
    %c0_24 = arith.constant 0 : index
    %c0_25 = arith.constant 0 : index
    %71 = vector.load %arg9[%c0_24, %c0_25] : memref<1x128xf32, #tpu.memory_space<vmem>>, vector<1x128xf32>
    %72 = vector.broadcast %71 : vector<1x128xf32> to vector<2x128xf32>
    %73 = arith.addf %70, %72 : vector<2x128xf32>
    %cst_26 = arith.constant 0.000000e+00 : f32
    %74 = vector.broadcast %cst_26 : f32 to vector<2x128xf32>
    %75 = arith.maximumf %73, %74 : vector<2x128xf32>
    %76 = arith.truncf %75 : vector<2x128xf32> to vector<2x128xbf16>
    %c0_27 = arith.constant 0 : index
    %c0_28 = arith.constant 0 : index
    %77 = vector.load %arg10[%c0_27, %c0_28] : memref<128x128xbf16, #tpu.memory_space<vmem>>, vector<128x128xbf16>
    %cst_29 = arith.constant dense<0.000000e+00> : vector<2x128xf32>
    %78 = tpu.matmul %76, %77, %cst_29 {dimension_numbers = #tpu.dot_dimension_numbers<[1], [0], [0], [1], [0, 0, 1, 1], [], []>} : vector<2x128xbf16>, vector<128x128xbf16>, vector<2x128xf32> -> vector<2x128xf32>
    %c0_30 = arith.constant 0 : index
    %c0_31 = arith.constant 0 : index
    %79 = vector.load %arg11[%c0_30, %c0_31] : memref<1x128xf32, #tpu.memory_space<vmem>>, vector<1x128xf32>
    %80 = vector.broadcast %79 : vector<1x128xf32> to vector<2x128xf32>
    %81 = arith.addf %78, %80 : vector<2x128xf32>
    %c0_32 = arith.constant 0 : index
    %c0_33 = arith.constant 0 : index
    %82 = vector.load %arg12[%c0_32, %c0_33] : memref<2x128xf32, #tpu.memory_space<vmem>>, vector<2x128xf32>
    tpu.vector_store %arg12[%c0_32, %c0_33], %81 {strides = array<i32>} : memref<2x128xf32, #tpu.memory_space<vmem>>, vector<2x128xf32>,
    return
  }
  func.func @transform_0(%arg0: i32) -> (i32, i32, i32) {
    %c0_i32 = arith.constant 0 : i32
    %c0_i32_0 = arith.constant 0 : i32
    %c0_i32_1 = arith.constant 0 : i32
    return %arg0, %c0_i32, %c0_i32_0 : i32, i32, i32
  }
  func.func @transform_1(%arg0: i32) -> (i32, i32) {
    %c0_i32 = arith.constant 0 : i32
    %c0_i32_0 = arith.constant 0 : i32
    %c0_i32_1 = arith.constant 0 : i32
    return %c0_i32, %c0_i32_0 : i32, i32
  }
  func.func @transform_2(%arg0: i32) -> (i32, i32) {
    %c0_i32 = arith.constant 0 : i32
    %c0_i32_0 = arith.constant 0 : i32
    %c0_i32_1 = arith.constant 0 : i32
    return %c0_i32, %c0_i32_0 : i32, i32
  }
  func.func @transform_3(%arg0: i32) -> (i32, i32) {
    %c0_i32 = arith.constant 0 : i32
    %c0_i32_0 = arith.constant 0 : i32
    %c0_i32_1 = arith.constant 0 : i32
    return %c0_i32, %c0_i32_0 : i32, i32
  }
  func.func @transform_4(%arg0: i32) -> (i32, i32) {
    %c0_i32 = arith.constant 0 : i32
    %c0_i32_0 = arith.constant 0 : i32
    %c0_i32_1 = arith.constant 0 : i32
    return %c0_i32, %c0_i32_0 : i32, i32
  }
  func.func @transform_5(%arg0: i32) -> (i32, i32) {
    %c0_i32 = arith.constant 0 : i32
    %c0_i32_0 = arith.constant 0 : i32
    %c0_i32_1 = arith.constant 0 : i32
    return %c0_i32, %c0_i32_0 : i32, i32
  }
  func.func @transform_6(%arg0: i32) -> (i32, i32) {
    %c0_i32 = arith.constant 0 : i32
    %c0_i32_0 = arith.constant 0 : i32
    %c0_i32_1 = arith.constant 0 : i32
    return %c0_i32, %c0_i32_0 : i32, i32
  }
  func.func @transform_7(%arg0: i32) -> (i32, i32) {
    %c0_i32 = arith.constant 0 : i32
    %c0_i32_0 = arith.constant 0 : i32
    %c0_i32_1 = arith.constant 0 : i32
    return %c0_i32, %c0_i32_0 : i32, i32
  }
  func.func @transform_8(%arg0: i32) -> (i32, i32) {
    %c0_i32 = arith.constant 0 : i32
    %c0_i32_0 = arith.constant 0 : i32
    %c0_i32_1 = arith.constant 0 : i32
    return %c0_i32, %c0_i32_0 : i32, i32
  }
  func.func @transform_9(%arg0: i32) -> (i32, i32) {
    %c0_i32 = arith.constant 0 : i32
    %c0_i32_0 = arith.constant 0 : i32
    %c0_i32_1 = arith.constant 0 : i32
    return %c0_i32, %c0_i32_0 : i32, i32
  }
  func.func @transform_10(%arg0: i32) -> (i32, i32) {
    %c0_i32 = arith.constant 0 : i32
    %c0_i32_0 = arith.constant 0 : i32
    %c0_i32_1 = arith.constant 0 : i32
    return %c0_i32, %c0_i32_0 : i32, i32
  }
  func.func @transform_11(%arg0: i32) -> (i32, i32) {
    %c0_i32 = arith.constant 0 : i32
    %c0_i32_0 = arith.constant 0 : i32
    return %arg0, %c0_i32 : i32, i32
  }
}

</mosaic_0001>

<bundles_post_ra>
// kernel: cnn_forward.1
= control target key start
LH: loop header
LB: loop body
LE: loop exit
PB: predicated region body
PF: predicated region fallthrough
CT: control target
= control target key end

     0   :  { %16 = vsyncpa [#allocation3], 0  ;;  %s8618_s0 = inlined_call_operand.vmem [shape: f32[2,28,28], index: 0, kind: input, shape index: {}]   ;;  %s8619_s1 = inlined_call_operand.hbm [shape: bf16[140,768], index: 1, kind: input, shape index: {}]   ;;  %s8620_s2 = inlined_call_operand.vmem [shape: f32[1,384], index: 2, kind: input, shape index: {}]   ;;  %s8621_s3 = inlined_call_operand.hbm [shape: bf16[1920,256], index: 3, kind: input, shape index: {}]   ;;  %s8622_s4 = inlined_call_operand.vmem [shape: f32[1,128], index: 4, kind: input, shape index: {}]   ;;  %s8623_s5 = inlined_call_operand.hbm [shape: bf16[512,256], index: 5, kind: input, shape index: {}]   ;;  %s8624_s6 = inlined_call_operand.vmem [shape: f32[1,256], index: 6, kind: input, shape index: {}]   ;;  %s8625_s7 = inlined_call_operand.vmem [shape: bf16[256,128], index: 7, kind: input, shape index: {}]   ;;  %s8626_s8 = inlined_call_operand.vmem [shape: f32[1,128], index: 8, kind: input, shape index: {}]   ;;  %s8627_s9 = inlined_call_operand.vmem [shape: bf16[128,128], index: 9, kind: input, shape index: {}]   ;;  %s8628_s10 = inlined_call_operand.vmem [shape: f32[1,128], index: 10, kind: input, shape index: {}]   ;;  %s8629_s11 = inlined_call_operand.hbm [shape: f32[2,128], index: 11, kind: output, shape index: {}]  }
   0x1   :  { %17 = vsyncpa [#allocation6], 0 }
   0x2   :  { %18 = vsyncpa [#allocation4], 0  ;;  %s6875_s17 = smov [#allocation5]   ;;  %s6781_s21 = scalar_lea.hbm %s8621_s3, 30720 }
   0x3   :  { %s40_s18 = sshll.u32 %s6875_s17, 4  ;;  %p6782_p0 = scmp.ne.s32.totalorder %s8621_s3, %s6781_s21  ;;  %s41_s18 = int_to_ptr.vmem [resolvable:$true] %s40_s18 }
   0x4   :  { %p6785_p1 = scmp.lt.u32.totalorder %s6781_s21, %s8621_s3 }
   0x6   :  { %p6787_p2 = pnand %p6785_p1, %p6782_p0 }
   0x8   :  { %6790 = shalt.err (!%p6787_p2)
}
   0x9   :  { %s6791_s26 = scalar_lea.vmem %s41_s18, 30720  ;;  %p6796_p4 = scmp.lt.s32.totalorder %s41_s18, %s41_s18 }
   0xa   :  { %p6792_p3 = scmp.ne.s32.totalorder %s41_s18, %s6791_s26  ;;  %p6797_p5 = scmp.lt.s32.totalorder %s6791_s26, %s6791_s26 }
   0xc   :  { %p6798_p6 = por %p6797_p5, %p6796_p4 }
   0xe   :  { %p6799_p7 = pnand %p6798_p6, %p6792_p3 }
  0x10   :  { %6802 = shalt.err (!%p6799_p7)
}
  0x11   :  { %s6876_s27 = smov 128   ;;  %s6877_s28 = smov 8  }
  0x12   :  { %46 = dma.hbm_to_vmem [thread:$0]  %s8621_s3, 30720, %s41_s18, [#allocation6], %s6876_s27, %s6876_s27, %s6877_s28  }
  0x13   :  { %s6878_s12 = smov [#allocation2]   ;;  %s6803_s16 = scalar_lea.hbm %s8619_s1, 6912 }
  0x14   :  { %s26_s13 = sshll.u32 %s6878_s12, 4  ;;  %p6804_p8 = scmp.ne.s32.totalorder %s8619_s1, %s6803_s16  ;;  %s27_s13 = int_to_ptr.vmem [resolvable:$true] %s26_s13 }
  0x15   :  { %p6807_p9 = scmp.lt.u32.totalorder %s6803_s16, %s8619_s1 }
  0x17   :  { %p6809_p10 = pnand %p6807_p9, %p6804_p8 }
  0x19   :  { %6812 = shalt.err (!%p6809_p10)
}
  0x1a   :  { %s6813_s22 = scalar_lea.vmem %s27_s13, 6912  ;;  %p6818_p12 = scmp.lt.s32.totalorder %s27_s13, %s27_s13 }
  0x1b   :  { %p6814_p11 = scmp.ne.s32.totalorder %s27_s13, %s6813_s22  ;;  %p6819_p13 = scmp.lt.s32.totalorder %s6813_s22, %s6813_s22 }
  0x1d   :  { %p6820_p0 = por %p6819_p13, %p6818_p12 }
  0x1f   :  { %p6821_p1 = pnand %p6820_p0, %p6814_p11 }
  0x21   :  { %6824 = shalt.err (!%p6821_p1)
}
  0x22   :  { %s6879_s3 = smov 384   ;;  %s6880_s18 = smov 24  }
  0x23   :  { %32 = dma.hbm_to_vmem [thread:$0]  %s8619_s1, 6912, %s27_s13, [#allocation3], %s6879_s3, %s6879_s3, %s6880_s18  }
  0x24   :  { %s6881_s25 = smov [#allocation7]   ;;  %s6825_s12 = scalar_lea.hbm %s8623_s5, 8192 }
  0x25   :  { %s54_s26 = sshll.u32 %s6881_s25, 4  ;;  %p6826_p2 = scmp.ne.s32.totalorder %s8623_s5, %s6825_s12  ;;  %s55_s26 = int_to_ptr.vmem [resolvable:$true] %s54_s26 }
  0x26   :  { %p6829_p3 = scmp.lt.u32.totalorder %s6825_s12, %s8623_s5 }
  0x28   :  { %p6831_p4 = pnand %p6829_p3, %p6826_p2 }
  0x2a   :  { %6834 = shalt.err (!%p6831_p4)
}
  0x2b   :  { %s6835_s19 = scalar_lea.vmem %s55_s26, 8192  ;;  %p6840_p6 = scmp.lt.s32.totalorder %s55_s26, %s55_s26 }
  0x2c   :  { %p6836_p5 = scmp.ne.s32.totalorder %s55_s26, %s6835_s19  ;;  %p6841_p7 = scmp.lt.s32.totalorder %s6835_s19, %s6835_s19 }
  0x2e   :  { %p6842_p8 = por %p6841_p7, %p6840_p6 }
  0x30   :  { %p6843_p9 = pnand %p6842_p8, %p6836_p5 }
  0x32   :  { %6846 = shalt.err (!%p6843_p9)
}
  0x33   :  { %60 = dma.hbm_to_vmem [thread:$0]  %s8623_s5, 8192, %s55_s26, [#allocation6], %s6876_s27, %s6876_s27, %s6877_s28  }
  0x34   :  { %6869 = dma.done.wait [#allocation3], 6912  }
  0x35   :  { %6870 = vsyncadd [#allocation3], 4294960384 }
  0x36   :  { %6871 = dma.done.wait [#allocation6], 38912  }
  0x37   :  { %6872 = vsyncadd [#allocation6], 4294928384  ;;  %vm113_vm0 = vsmask.f32 3328  ;;  %vm114_vm1 = vsmask.f32 7440 }
  0x38   :  { %vm207_vm2 = vsmask.f32 2304  ;;  %vm208_vm3 = vsmask.f32 6416  ;;  %v6996_v0 = vld [vmem:[%s8618_s0] sm:$0xff]  ;;  %v7001_v1 = vld [vmem:[%s8618_s0 + $0x8] sm:$0xff]  ;;  %vm7055_vm8 = vmor %vm113_vm0, %vm114_vm1 }
  0x39   :  { %v7006_v2 = vld [vmem:[%s8618_s0 + $0x10] sm:$0xff]  ;;  %vm184_vm4 = vcmask 1042432   ;;  %vm185_vm5 = vcmask 1046532   ;;  %vm250_vm6 = vcmask 1041408   ;;  %v7010_v3 = vpack.c.bf16 %v6996_v0, %v6996_v0  ;;  %v84_v6 = vld [vmem:[%s8618_s0 + $0x18] sm:$0xf]  ;;  %vm7067_vm10 = vmor %vm207_vm2, %vm208_vm3 }
  0x3a   :  { %v7014_v4 = vpack.c.bf16 %v7001_v1, %v7001_v1  ;;  %v7018_v5 = vpack.c.bf16 %v7006_v2, %v7006_v2  ;;  %v7026_v7 = vld [vmem:[%s8618_s0 + $0x20] sm:$0xff]  ;;  %v7031_v8 = vld [vmem:[%s8618_s0 + $0x28] sm:$0xff]  ;;  %v89_v9 = vpack.c.bf16 %v7001_v1, %v6996_v0  ;;  %vm251_vm7 = vcmask 1045508   ;;  %vm7061_vm9 = vmor %vm184_vm4, %vm185_vm5  ;;  %s6882_s29 = smov 28   ;;  %s6883_s30 = smov 84  }
  0x3b   :  { %v7035_v10 = vpack.c.bf16 %v84_v6, %v84_v6  ;;  %v7039_v11 = vpack.c.bf16 %v7026_v7, %v7026_v7  ;;  %v7043_v12 = vpack.c.bf16 %v7031_v8, %v7031_v8  ;;  %v117_v13 = vshrl.u32 %v7010_v3, 16  ;;  %v6220_v21 = vld [vmem:[#allocation2 + $0x4] ss:$24 sps:$4 sm:$0xff]   ;;  %v6222_v27 = vld [vmem:[#allocation2] ss:$24 sps:$4 sm:$0xff]   ;;  %vm7082_vm11 = vmor %vm250_vm6, %vm251_vm7  ;;  %s6884_s12 = smov 56  }
  0x3c   :  { %v120_v14 = vshll.u32 %v7010_v3, 16  ;;  %v126_v15 = vshll.u32 %v7014_v4, 16  ;;  %v130_v16 = vshrl.u32 %v7014_v4, 16  ;;  %v136_v17 = vshll.u32 %v7018_v5, 16  ;;  %714 = vmatprep.subr.bf16.mxu0 %v6220_v21  ;;  %v6223_v38 = vld [vmem:[#allocation2 + $0xc] ss:$24 sps:$4 sm:$0xff]  }
  0x3d   :  { %v140_v18 = vshrl.u32 %v7018_v5, 16  ;;  %v5672_v19 = vrot.slane %v7010_v3, 9  ;;  %v189_v20 = vrot.slane %v7014_v4, 5  ;;  %v119_v23 = vrot.slane %v117_v13, 4  ;;  %715 = vmatpush1.bf16.msra.mxu0 %v6222_v27  ;;  %v6225_v39 = vld [vmem:[#allocation2 + $0x8] ss:$24 sps:$4 sm:$0xff]   ;;  %777 = vmatprep.subr.bf16.mxu1 %v6223_v38 }
  0x3e   :  { %v122_v24 = vrot.slane %v120_v14, 5  ;;  %v128_v25 = vrot.slane %v126_v15, 5  ;;  %v132_v26 = vrot.slane %v130_v16, 4  ;;  %v138_v28 = vrot.slane %v136_v17, 5  ;;  %v6226_v44 = vld [vmem:[#allocation2 + $0x34] ss:$24 sps:$4 sm:$0xff]   ;;  %778 = vmatpush1.bf16.msra.mxu1 %v6225_v39 }
  0x3f   :  { %v142_v29 = vrot.slane %v140_v18, 4  ;;  %v210_v30 = vrot.slane %v117_v13, 5  ;;  %v211_v31 = vrot.slane %v120_v14, 6  ;;  %v214_v36 = vrot.slane %v130_v16, 5  ;;  %v6228_v49 = vld [vmem:[#allocation2 + $0x30] ss:$24 sps:$4 sm:$0xff]   ;;  %716 = vmatprep.subr.bf16.mxu0 %v6226_v44 }
  0x40   :  { %v123_v33 = vor.u32 %v122_v24, %v119_v23  ;;  %v133_v34 = vor.u32 %v132_v26, %v128_v25  ;;  %v215_v37 = vrot.slane %v126_v15, 6  ;;  %v219_v42 = vrot.slane %v140_v18, 5  ;;  %v6229_v54 = vld [vmem:[#allocation2 + $0x3c] ss:$24 sps:$4 sm:$0xff]   ;;  %v6231_v60 = vld [vmem:[#allocation2 + $0x38] ss:$24 sps:$4 sm:$0xff]  }
  0x41   :  { %v143_v40 = vor.u32 %v142_v29, %v138_v28  ;;  %v212_v41 = vor.u32 %v211_v31, %v210_v30  ;;  %v220_v43 = vrot.slane %v136_v17, 6  ;;  %v190_v48 = vsel %vm7061_vm9, %v5672_v19, %v189_v20  ;;  %717 = vmatpush1.bf16.msra.mxu0 %v6228_v49  ;;  %v6232_v61 = vld [vmem:[#allocation2 + $0x64] ss:$24 sps:$4 sm:$0xff]   ;;  %779 = vmatprep.subr.bf16.mxu1 %v6229_v54  ;;  %v6234_v14 = vld [vmem:[#allocation2 + $0x60] ss:$24 sps:$4 sm:$0xff]   ;;  %s6885_s16 = smov 112  }
  0x42   :  { %v124_v45 = vrot.slane %v123_v33, 4  ;;  %v134_v46 = vrot.slane %v133_v34, 4  ;;  %v216_v47 = vor.u32 %v215_v37, %v214_v36  ;;  %v191_v52 = vrot.slane %v189_v20, 4  ;;  %718 = vmatprep.subr.bf16.mxu0 %v6232_v61  ;;  %v6235_v18 = vld [vmem:[#allocation2 + $0x6c] ss:$24 sps:$4 sm:$0xff]   ;;  %780 = vmatpush1.bf16.msra.mxu1 %v6231_v60 }
  0x43   :  { %v213_v50 = vrot.slane %v212_v41, 4  ;;  %v7073_v51 = vor.u32 %v220_v43, %v219_v42  ;;  %v192_v53 = vrot.slane %v7018_v5, 5  ;;  %v5674_v59 = vrot.slane %v7010_v3, 10  ;;  %v6237_v19 = vld [vmem:[#allocation2 + $0x68] ss:$24 sps:$4 sm:$0xff]   ;;  %781 = vmatprep.subr.bf16.mxu1 %v6235_v18 }
  0x44   :  { %v129_v55 = vsel %vm7055_vm8, %v124_v45, %v128_v25  ;;  %v139_v56 = vsel %vm7055_vm8, %v134_v46, %v138_v28  ;;  %v218_v57 = vrot.slane %v216_v47, 4  ;;  %v255_v3 = vrot.slane %v7014_v4, 6  ;;  %v6238_v28 = vld [vmem:[#allocation2 + $0x94] ss:$24 sps:$4 sm:$0xff]   ;;  %v6240_v34 = vld [vmem:[#allocation2 + $0x90] ss:$24 sps:$4 sm:$0xff]  }
  0x45   :  { %v5677_v62 = vcombine.low %v129_v55, %v139_v56  ;;  %v217_v63 = vsel %vm7067_vm10, %v213_v50, %v216_v47  ;;  %v223_v6 = vrot.slane %v7073_v51, 4  ;;  %v193_v13 = vsel %vm7061_vm9, %v191_v52, %v192_v53  ;;  %719 = vmatpush1.bf16.msra.mxu0 %v6234_v14  ;;  %v6243_v45 = vld [vmem:[#allocation2 + $0x98] ss:$24 sps:$4 sm:$0xff]   ;;  %v6244_v46 = vld [vmem:[#allocation2 + $0xc4] ss:$24 sps:$4 sm:$0xff]  }
  0x46   :  { %v222_v15 = vsel %vm7067_vm10, %v218_v57, %v7073_v51  ;;  %v5680_v16 = vcombine.low %v190_v48, %v193_v13  ;;  %v258_v17 = vrot.slane %v7018_v5, 6  ;;  %v7098_v21 = vrot.slane %v143_v40, 4  ;;  %720 = vmatprep.subr.bf16.mxu0 %v6238_v28  ;;  %v6241_v40 = vld [vmem:[#allocation2 + $0x9c] ss:$24 sps:$4 sm:$0xff]   ;;  %782 = vmatpush1.bf16.msra.mxu1 %v6237_v19  ;;  %v6247_v60 = vld [vmem:[#allocation2 + $0xcc] ss:$24 sps:$4 sm:$0xff]  }
  0x47   :  { %285 = vrot.lane.b32.xlu0 %v5677_v62, %s6882_s29  ;;  %v5683_v20 = vcombine.low %v217_v63, %v222_v15  ;;  %v146_v23 = vshll.u32 %v7035_v10, 16  ;;  %v151_v24 = vshrl.u32 %v7039_v11, 16  ;;  %v256_v25 = vsel %vm7082_vm11, %v5674_v59, %v255_v3  ;;  %v7127_v52 = vld [vmem:[%s8618_s0 + $0x30] sm:$0xff]  ;;  %783 = vmatprep.subr.bf16.mxu1 %v6241_v40  ;;  %v7135_v59 = vld [vmem:[%s8618_s0 + $0x38] sm:$0xf] }
  0x48   :  { %v257_v4 = vrot.slane %v255_v3, 4  ;;  %v154_v26 = vshll.u32 %v7039_v11, 16  ;;  %v160_v27 = vshll.u32 %v7043_v12, 16  ;;  %v194_v31 = vrot.slane %v192_v53, 4  ;;  %v6246_v53 = vld [vmem:[#allocation2 + $0xc0] ss:$24 sps:$4 sm:$0xff]  }
  0x49   :  { %315 = vrot.lane.b32.xlu1 %v5683_v20, %s6883_s30  ;;  %v148_v29 = vrot.slane %v146_v23, 5  ;;  %v153_v30 = vrot.slane %v151_v24, 4  ;;  %v195_v33 = vrot.slane %v7035_v10, 5  ;;  %v5673_v39 = vrot.slane %v7039_v11, 9  ;;  %721 = vmatpush1.bf16.msra.mxu0 %v6240_v34  ;;  %v6249_v14 = vld [vmem:[#allocation2 + $0xc8] ss:$24 sps:$4 sm:$0xff]  }
  0x4a   :  { %v259_v36 = vsel %vm7082_vm11, %v257_v4, %v258_v17  ;;  %v156_v37 = vrot.slane %v154_v26, 5  ;;  %v7112_v38 = vrot.slane %v160_v27, 5  ;;  %v199_v44 = vrot.slane %v7043_v12, 5  ;;  %722 = vmatprep.subr.bf16.mxu0 %v6244_v46  ;;  %784 = vmatpush1.bf16.msra.mxu1 %v6243_v45  ;;  %v6250_v19 = vld [vmem:[#allocation2 + $0xf4] ss:$24 sps:$4 sm:$0xff]  }
  0x4b   :  { %300 = vrot.lane.b32.xlu0 %v5680_v16, %s6884_s12  ;;  %v5686_v41 = vcombine.low %v256_v25, %v259_v36  ;;  %v149_v42 = vsel %vm7055_vm8, %v7098_v21, %v148_v29  ;;  %v196_v43 = vsel %vm7061_vm9, %v194_v31, %v195_v33  ;;  %v164_v48 = vshrl.u32 %v7043_v12, 16  ;;  %785 = vmatprep.subr.bf16.mxu1 %v6247_v60  ;;  %v6252_v25 = vld [vmem:[#allocation2 + $0xf0] ss:$24 sps:$4 sm:$0xff]   ;;  %v6253_v4 = vld [vmem:[#allocation2 + $0xfc] ss:$24 sps:$4 sm:$0xff]  }
  0x4c   :  { %v157_v47 = vor.u32 %v156_v37, %v153_v30  ;;  %v224_v49 = vshrl.u32 %v7035_v10, 16  ;;  %v227_v50 = vrot.slane %v146_v23, 6  ;;  %v200_v54 = vsel %vm7061_vm9, %v5673_v39, %v199_v44  ;;  %v6255_v29 = vld [vmem:[#allocation2 + $0xf8] ss:$24 sps:$4 sm:$0xff]   ;;  %v6256_v30 = vld [vmem:[#allocation2 + $0x124] ss:$24 sps:$4 sm:$0xff]  }
  0x4d   :  { %330 = vrot.lane.b32.xlu1 %v5686_v41, %s6885_s16  ;;  %v230_v55 = vrot.slane %v151_v24, 5  ;;  %v231_v56 = vrot.slane %v154_v26, 6  ;;  %v235_v57 = vrot.slane %v160_v27, 6  ;;  %v5681_v62 = vcombine.low %v196_v43, %v200_v54  ;;  %723 = vmatpush1.bf16.msra.mxu0 %v6246_v53  ;;  %v6258_v34 = vld [vmem:[#allocation2 + $0x120] ss:$24 sps:$4 sm:$0xff]  }
  0x4e   :  { %v158_v61 = vrot.slane %v157_v47, 4  ;;  %v226_v63 = vrot.slane %v224_v49, 5  ;;  %v234_v13 = vrot.slane %v164_v48, 5  ;;  %v260_v16 = vrot.slane %v258_v17, 4  ;;  %724 = vmatprep.subr.bf16.mxu0 %v6250_v19  ;;  %786 = vmatpush1.bf16.msra.mxu1 %v6249_v14  ;;  %v6259_v41 = vld [vmem:[#allocation2 + $0x12c] ss:$24 sps:$4 sm:$0xff]  }
  0x4f   :  { %v232_v15 = vor.u32 %v231_v56, %v230_v55  ;;  %v261_v3 = vrot.slane %v7035_v10, 6  ;;  %v5675_v18 = vrot.slane %v7039_v11, 10  ;;  %v265_v24 = vrot.slane %v7043_v12, 6  ;;  %787 = vmatprep.subr.bf16.mxu1 %v6253_v4  ;;  %v6262_v47 = vld [vmem:[#allocation2 + $0x154] ss:$24 sps:$4 sm:$0xff]  }
  0x50   :  { %v163_v20 = vsel %vm7055_vm8, %v158_v61, %v7112_v38  ;;  %v228_v21 = vor.u32 %v227_v50, %v226_v63  ;;  %v7144_v23 = vor.u32 %v235_v57, %v234_v13  ;;  %v7152_v17 = vpack.c.bf16 %v7127_v52, %v7127_v52  ;;  %v6261_v53 = vld [vmem:[#allocation2 + $0x128] ss:$24 sps:$4 sm:$0xff]   ;;  %v6265_v13 = vld [vmem:[#allocation2 + $0x15c] ss:$24 sps:$4 sm:$0xff]  }
  0x51   :  { %v5678_v5 = vcombine.low %v149_v42, %v163_v20  ;;  %302 = vrot.lane.b32.xlu1 %v5681_v62, %s6884_s12  ;;  %v233_v10 = vrot.slane %v232_v15, 4  ;;  %v262_v11 = vsel %vm7082_vm11, %v260_v16, %v261_v3  ;;  %v266_v26 = vsel %vm7082_vm11, %v5675_v18, %v265_v24  ;;  %725 = vmatpush1.bf16.msra.mxu0 %v6252_v25  ;;  %v6264_v57 = vld [vmem:[#allocation2 + $0x150] ss:$24 sps:$4 sm:$0xff]   ;;  %v6270_v32 = vld [vmem:[#allocation2 + $0x180] ss:$24 sps:$4 sm:$0x3f]  }
  0x52   :  { %v229_v12 = vsel %vm7067_vm10, %v223_v6, %v228_v21  ;;  %v7162_v27 = vpack.c.bf16 %v7135_v59, %v7135_v59  ;;  %v166_v28 = vrot.slane %v164_v48, 4  ;;  %v5687_v51 = vcombine.low %v262_v11, %v266_v26  ;;  %726 = vmatprep.subr.bf16.mxu0 %v6256_v30  ;;  %788 = vmatpush1.bf16.msra.mxu1 %v6255_v29  ;;  %v6267_v18 = vld [vmem:[#allocation2 + $0x158] ss:$24 sps:$4 sm:$0xff]   ;;  %v6273_v26 = vld [vmem:[#allocation2 + $0x188] ss:$24 sps:$4 sm:$0x3f]  }
  0x53   :  { %287 = vrot.lane.b32.xlu0 %v5678_v5, %s6882_s29  ;;  %v237_v31 = vsel %vm7067_vm10, %v233_v10, %v7144_v23  ;;  %v170_v33 = vshll.u32 %v7152_v17, 16  ;;  %v174_v6 = vshrl.u32 %v7152_v17, 16  ;;  %v201_v40 = vrot.slane %v199_v44, 4  ;;  %789 = vmatprep.subr.bf16.mxu1 %v6259_v41  ;;  %v6282_v0 = vld [vmem:[#allocation2 + $0x74] ss:$24 sps:$4 sm:$0xff]  }
  0x54   :  { %v5684_v36 = vcombine.low %v229_v12, %v237_v31  ;;  %v167_v37 = vor.u32 %v166_v28, %v7112_v38  ;;  %v180_v39 = vshll.u32 %v7162_v27, 16  ;;  %v202_v45 = vrot.slane %v7152_v17, 5  ;;  %v6271_v12 = vld [vmem:[#allocation2 + $0x18c] ss:$24 sps:$4 sm:$0x3f]  }
  0x55   :  { %332 = vrot.lane.b32.xlu1 %v5687_v51, %s6885_s16  ;;  %v172_v42 = vrot.slane %v170_v33, 5  ;;  %v176_v43 = vrot.slane %v174_v6, 4  ;;  %v205_v46 = vrot.slane %v7162_v27, 5  ;;  %v238_v38 = vrot.slane %v7144_v23, 4  ;;  %727 = vmatpush1.bf16.msra.mxu0 %v6258_v34  ;;  %v6276_v51 = vld [vmem:[#allocation2 + $0x14] ss:$24 sps:$4 sm:$0xff]  }
  0x56   :  { %v168_v48 = vrot.slane %v167_v37, 4  ;;  %v182_v49 = vrot.slane %v180_v39, 5  ;;  %v239_v50 = vrot.slane %v174_v6, 5  ;;  %v203_v54 = vsel %vm7061_vm9, %v201_v40, %v202_v45  ;;  %728 = vmatprep.subr.bf16.mxu0 %v6262_v47  ;;  %v6268_v23 = vld [vmem:[#allocation2 + $0x184] ss:$24 sps:$4 sm:$0x3f]   ;;  %790 = vmatpush1.bf16.msra.mxu1 %v6261_v53 }
  0x57   :  { %317 = vrot.lane.b32.xlu0 %v5684_v36, %s6883_s30  ;;  %v177_v44 = vor.u32 %v176_v43, %v172_v42  ;;  %v204_v55 = vrot.slane %v202_v45, 4  ;;  %v240_v56 = vrot.slane %v170_v33, 6  ;;  %v244_v61 = vshrl.u32 %v7162_v27, 16  ;;  %791 = vmatprep.subr.bf16.mxu1 %v6265_v13  ;;  %v6279_v37 = vld [vmem:[#allocation2 + $0x44] ss:$24 sps:$4 sm:$0xff]  }
  0x58   :  { %v173_v60 = vsel %vm7055_vm8, %v168_v48, %v172_v42  ;;  %v247_v62 = vrot.slane %v180_v39, 6  ;;  %v267_v63 = vrot.slane %v265_v24, 4  ;;  %v268_v3 = vrot.slane %v7152_v17, 6  ;;  %v6277_v43 = vld [vmem:[#allocation2 + $0x40] ss:$24 sps:$4 sm:$0xff]  }
  0x59   :  { %v178_v14 = vrot.slane %v177_v44, 4  ;;  %v206_v15 = vsel %vm7061_vm9, %v204_v55, %v205_v46  ;;  %v241_v16 = vor.u32 %v240_v56, %v239_v50  ;;  %v246_v20 = vrot.slane %v244_v61, 5  ;;  %729 = vmatpush1.bf16.msra.mxu0 %v6264_v57  ;;  %v6285_v46 = vld [vmem:[#allocation2 + $0xa4] ss:$24 sps:$4 sm:$0xff]   ;;  %v6288_v53 = vld [vmem:[#allocation2 + $0xd4] ss:$24 sps:$4 sm:$0xff]  }
  0x5a   :  { %v5682_v19 = vcombine.low %v203_v54, %v206_v15  ;;  %v271_v21 = vrot.slane %v7162_v27, 6  ;;  %vm695_vm12 = vcmask 1045504   ;;  %v269_v17 = vsel %vm7082_vm11, %v267_v63, %v268_v3  ;;  %792 = vmatpush1.bf16.msra.mxu1 %v6267_v18  ;;  %v6286_v55 = vld [vmem:[#allocation2 + $0xd0] ss:$24 sps:$4 sm:$0xff]   ;;  %v6291_v56 = vld [vmem:[#allocation2 + $0x104] ss:$24 sps:$4 sm:$0xff]  }
  0x5b   :  { %v183_v24 = vsel %vm7055_vm8, %v178_v14, %v182_v49  ;;  %v242_v25 = vsel %vm7067_vm10, %v238_v38, %v241_v16  ;;  %v243_v5 = vrot.slane %v241_v16, 4  ;;  %v248_v11 = vor.u32 %v247_v62, %v246_v20  ;;  %5743 = vmatprep.subr.msk.bf16.mxu0 %vm695_vm12, %v6268_v23  ;;  %5747 = vmatprep.subr.msk.bf16.mxu1 %vm695_vm12, %v6271_v12  ;;  %v6283_v38 = vld [vmem:[#allocation2 + $0xa0] ss:$24 sps:$4 sm:$0xff]   ;;  %v6294_v13 = vld [vmem:[#allocation2 + $0x134] ss:$24 sps:$4 sm:$0xff]  }
  0x5c   :  { %v5679_v10 = vcombine.low %v173_v60, %v183_v24  ;;  %304 = vrot.lane.b32.xlu1 %v5682_v19, %s6884_s12  ;;  %v270_v4 = vrot.slane %v268_v3, 4  ;;  %v697_v22 = vsel %vm695_vm12, %v6270_v32, 0  ;;  %v6118_v27 = vpack.c.bf16 %v7026_v7, %v7006_v2  ;;  %v6289_v61 = vld [vmem:[#allocation2 + $0x100] ss:$24 sps:$4 sm:$0xff]   ;;  %v6292_v16 = vld [vmem:[#allocation2 + $0x130] ss:$24 sps:$4 sm:$0xff]  }
  0x5d   :  { %v91_v28 = vpack.c.bf16 %v7031_v8, %v7026_v7  ;;  %v92_v29 = vpack.c.bf16 %v7135_v59, %v7127_v52  ;;  %v249_v30 = vsel %vm7067_vm10, %v243_v5, %v248_v11  ;;  %731 = vmatpush1.bf16.msra.mxu0 %v697_v22  ;;  %v703_v2 = vsel %vm695_vm12, %v6273_v26, 0  ;;  %v6274_v52 = vld [vmem:[#allocation2 + $0x10] ss:$24 sps:$4 sm:$0xff]   ;;  %v6297_v18 = vld [vmem:[#allocation2 + $0x164] ss:$24 sps:$4 sm:$0xff]  }
  0x5e   :  { %289 = vrot.lane.b32.xlu0 %v5679_v10, %s6882_s29  ;;  %v272_v31 = vsel %vm7082_vm11, %v270_v4, %v271_v21  ;;  %v5685_v33 = vcombine.low %v242_v25, %v249_v30  ;;  %840 = vmatprep.subr.bf16.mxu0 %v6276_v51  ;;  %vm336_vm13 = vcmask 228352   ;;  %vm346_vm14 = vcmask 457728   ;;  %v6295_v20 = vld [vmem:[#allocation2 + $0x160] ss:$24 sps:$4 sm:$0xff]   ;;  %v6303_v5 = vld [vmem:[#allocation5 + $0x4] ss:$8 sps:$4 sm:$0xff]  }
  0x5f   :  { %v5688_v6 = vcombine.low %v269_v17, %v272_v31  ;;  %v101_v34 = vunpack.c.h.b16 %v91_v28  ;;  %v102_v7 = vunpack.c.l.b16 %v92_v29  ;;  %794 = vmatpush1.bf16.msra.mxu1 %v703_v2  ;;  %vm353_vm15 = vcmask 687104   ;;  %v6298_v21 = vld [vmem:[#allocation2 + $0x194] ss:$24 sps:$4 sm:$0x3f]   ;;  %v6301_v25 = vld [vmem:[#allocation5] ss:$8 sps:$4 sm:$0xff]  }
  0x60   :  { %vm688_vm0 = vcmask 97280   ;;  %vm360_vm1 = vcmask 916480   ;;  %v6300_v23 = vld [vmem:[#allocation2 + $0x190] ss:$24 sps:$4 sm:$0x3f]   ;;  %vm2440_vm2 = vcmask 1041409  }
  0x61   :  { %334 = vrot.lane.b32.xlu1 %v5688_v6, %s6885_s16  ;;  %v275_v8 = vpack.c.b16 %v102_v7, %v101_v34  ;;  %v709_v24 = vsel %vm695_vm12, %v6300_v23, 0  ;;  %v6304_v32 = vld [vmem:[#allocation5 + $0x200] ss:$8 sps:$4 sm:$0xff]   ;;  %v6306_v10 = vld [vmem:[#allocation5 + $0x204] ss:$8 sps:$4 sm:$0xff]   ;;  %vm2443_vm3 = vcmask 1042434  }
  0x62   :  { %319 = vrot.lane.b32.xlu0 %v5685_v33, %s6883_s30  ;;  %v6309_v11 = vld [vmem:[#allocation5 + $0x14] ss:$8 sps:$4 sm:$0xff]   ;;  %4470 = vmatprep.subr.bf16.mxu1 %v6306_v10  ;;  %v6307_v4 = vld [vmem:[#allocation5 + $0x10] ss:$8 sps:$4 sm:$0xff]   ;;  %v6315_v22 = vld [vmem:[#allocation5 + $0x24] ss:$8 sps:$4 sm:$0xff]  }
  0x63   :  { %v6312_v17 = vld [vmem:[#allocation5 + $0x214] ss:$8 sps:$4 sm:$0xff]   ;;  %v6310_v12 = vld [vmem:[#allocation5 + $0x210] ss:$8 sps:$4 sm:$0xff]   ;;  %v6318_v26 = vld [vmem:[#allocation5 + $0x224] ss:$8 sps:$4 sm:$0xff]  }
  0x64   :  { %v6316_v28 = vld [vmem:[#allocation5 + $0x220] ss:$8 sps:$4 sm:$0xff]   ;;  %v6321_v29 = vld [vmem:[#allocation5 + $0x34] ss:$8 sps:$4 sm:$0xff]   ;;  %v6319_v31 = vld [vmem:[#allocation5 + $0x30] ss:$8 sps:$4 sm:$0xff]  }
  0x65   :  { %v6324_v30 = vld [vmem:[#allocation5 + $0x234] ss:$8 sps:$4 sm:$0xff]   ;;  %v6322_v51 = vld [vmem:[#allocation5 + $0x230] ss:$8 sps:$4 sm:$0xff]   ;;  %vm2446_vm4 = vcmask 1043459   ;;  %vm2449_vm5 = vcmask 1044484  }
  0x66   :  { %vm2452_vm7 = vcmask 1045509   ;;  %vm2455_vm8 = vcmask 1046534   ;;  %vm2458_vm9 = vcmask 1047559  }
  0xb9   :  { %v286_v35 = vpop.permute.xlu0 %285 }
  0xba   :  { %v339_v59 = vsel %vm336_vm13, %v89_v9, %v286_v35  ;;  %v6280_v9 = vld [vmem:[#allocation2 + $0x70] ss:$24 sps:$4 sm:$0xff]  }
  0xbb   :  { %v316_v58 = vpop.permute.xlu1 %315 }
  0xbd   :  { %v301_v36 = vpop.permute.xlu0 %300 }
  0xbe   :  { %v348_v39 = vsel %vm346_vm14, %v339_v59, %v301_v36  ;;  %v6327_v59 = vld [vmem:[#allocation5 + $0x44] ss:$8 sps:$4 sm:$0xff]  }
  0xbf   :  { %v331_v40 = vpop.permute.xlu1 %330  ;;  %v355_v41 = vsel %vm353_vm15, %v348_v39, %v316_v58  ;;  %v6330_v36 = vld [vmem:[#allocation5 + $0x244] ss:$8 sps:$4 sm:$0xff]   ;;  %v6325_v39 = vld [vmem:[#allocation5 + $0x40] ss:$8 sps:$4 sm:$0xff]  }
  0xc0   :  { %5744 = vmatprep.mubr.msk.bf16.mxu0 %vm688_vm0, %v331_v40  ;;  %5748 = vmatprep.mubr.msk.bf16.mxu1 %vm688_vm0, %v331_v40  ;;  %v362_v42 = vsel %vm360_vm1, %v355_v41, %v331_v40 }
  0xc1   :  { %747 = vmatmul.mubr.bf16.vlgmr.msra.gmra.mrb[0].mxu0 %v362_v42  ;;  %810 = vmatmul.mubr.bf16.vlgmr.msra.gmra.mrb[0].mxu1 %v362_v42 }
  0xc2   :  { %841 = vmatpush1.bf16.msra.mxu0 %v6274_v52  ;;  %4471 = vmatpush1.bf16.msra.mxu1 %v6304_v32 }
  0xc3   :  { %v303_v1 = vpop.permute.xlu1 %302  ;;  %842 = vmatprep.subr.bf16.mxu0 %v6279_v37  ;;  %4472 = vmatprep.subr.bf16.mxu1 %v6312_v17 }
  0xc5   :  { %v288_v45 = vpop.permute.xlu0 %287 }
  0xc6   :  { %v342_v47 = vsel %vm336_vm13, %v6118_v27, %v288_v45  ;;  %843 = vmatpush1.bf16.msra.mxu0 %v6277_v43  ;;  %4473 = vmatpush1.bf16.msra.mxu1 %v6310_v12  ;;  %v6313_v27 = vld [vmem:[#allocation5 + $0x20] ss:$8 sps:$4 sm:$0xff]  }
  0xc7   :  { %v350_v48 = vsel %vm346_vm14, %v342_v47, %v303_v1  ;;  %v333_v49 = vpop.permute.xlu1 %332  ;;  %844 = vmatprep.subr.bf16.mxu0 %v6282_v0  ;;  %4474 = vmatprep.subr.bf16.mxu1 %v6318_v26 }
  0xc8   :  { %5745 = vmatprep.mubr.msk.bf16.mxu0 %vm688_vm0, %v333_v49  ;;  %5749 = vmatprep.mubr.msk.bf16.mxu1 %vm688_vm0, %v333_v49 }
  0xc9   :  { %v318_v50 = vpop.permute.xlu0 %317 }
  0xca   :  { %v357_v44 = vsel %vm353_vm15, %v350_v48, %v318_v50  ;;  %845 = vmatpush1.bf16.msra.mxu0 %v6280_v9  ;;  %4475 = vmatpush1.bf16.msra.mxu1 %v6316_v28  ;;  %v6333_v50 = vld [vmem:[#allocation5 + $0x54] ss:$8 sps:$4 sm:$0xff]  }
  0xcb   :  { %v365_v54 = vsel %vm360_vm1, %v357_v44, %v333_v49  ;;  %846 = vmatprep.subr.bf16.mxu0 %v6285_v46  ;;  %4476 = vmatprep.subr.bf16.mxu1 %v6324_v30 }
  0xcc   :  { %757 = vmatmul.mubr.bf16.gmra.mrb[4].mxu0 %v365_v54  ;;  %820 = vmatmul.mubr.bf16.gmra.mrb[4].mxu1 %v365_v54 }
  0xce   :  { %v305_v57 = vpop.permute.xlu1 %304  ;;  %847 = vmatpush1.bf16.msra.mxu0 %v6283_v38  ;;  %4477 = vmatpush1.bf16.msra.mxu1 %v6322_v51 }
  0xcf   :  { %848 = vmatprep.subr.bf16.mxu0 %v6288_v53  ;;  %4478 = vmatprep.subr.bf16.mxu1 %v6330_v36  ;;  %v6336_v53 = vld [vmem:[#allocation5 + $0x254] ss:$8 sps:$4 sm:$0xff]  }
  0xd0   :  { %v290_v60 = vpop.permute.xlu0 %289 }
  0xd1   :  { %v345_v62 = vsel %vm336_vm13, %v275_v8, %v290_v60 }
  0xd2   :  { %v352_v63 = vsel %vm346_vm14, %v345_v62, %v305_v57  ;;  %849 = vmatpush1.bf16.msra.mxu0 %v6286_v55  ;;  %v6331_v55 = vld [vmem:[#allocation5 + $0x50] ss:$8 sps:$4 sm:$0xff]  }
  0xd3   :  { %v335_v14 = vpop.permute.xlu1 %334  ;;  %850 = vmatprep.subr.bf16.mxu0 %v6291_v56  ;;  %v6334_v56 = vld [vmem:[#allocation5 + $0x250] ss:$8 sps:$4 sm:$0xff]  }
  0xd4   :  { %v320_v15 = vpop.permute.xlu0 %319  ;;  %5746 = vmatprep.mubr.msk.bf16.mxu0 %vm688_vm0, %v335_v14  ;;  %5750 = vmatprep.mubr.msk.bf16.mxu1 %vm688_vm0, %v335_v14 }
  0xd5   :  { %v359_v3 = vsel %vm353_vm15, %v352_v63, %v320_v15 }
  0xd6   :  { %v368_v19 = vsel %vm360_vm1, %v359_v3, %v335_v14  ;;  %851 = vmatpush1.bf16.msra.mxu0 %v6289_v61 }
  0xd7   :  { %767 = vmatmul.mubr.bf16.gmra.mrb[8].mxu0 %v368_v19  ;;  %830 = vmatmul.mubr.bf16.gmra.mrb[8].mxu1 %v368_v19 }
  0xd8   :  { %5752 = vmatprep.mubr.msk.bf16.mxu0 %vm688_vm0, %v331_v40  ;;  %852 = vmatprep.subr.bf16.mxu0 %v6294_v13  ;;  %v6328_v40 = vld [vmem:[#allocation5 + $0x240] ss:$8 sps:$4 sm:$0xff]  }
  0xd9   :  { %4479 = vmatpush1.bf16.msra.mxu1 %v6328_v40 }
  0xda   :  { %853 = vmatpush1.bf16.msra.mxu0 %v6292_v16  ;;  %4480 = vmatprep.subr.bf16.mxu1 %v6336_v53  ;;  %v945_v16 = vlaneseq }
  0xdb   :  { %854 = vmatprep.subr.bf16.mxu0 %v6297_v18 }
  0xdc   :  { %v7264_v18 = vshrl.u32 %v945_v16, 7 }
  0xdd   :  { %4481 = vmatpush1.bf16.msra.mxu1 %v6334_v56 }
  0xde   :  { %855 = vmatpush1.bf16.msra.mxu0 %v6295_v20  ;;  %8724 = vst [vmem:[#allocation12_spill] sm:$0xff] %v7264_v18  ;;  %v8631_v32 = vsub.s32 0, %v7264_v18 }
  0xdf   :  { %5751 = vmatprep.subr.msk.bf16.mxu0 %vm695_vm12, %v6298_v21  ;;  %v2122_v21 = vsub.s32 2, %v7264_v18 }
  0xe2   :  { %857 = vmatpush1.bf16.msra.mxu0 %v709_v24 }
  0xe3   :  { %4384 = vmatprep.subr.bf16.mxu0 %v6303_v5 }
  0xe5   :  { %873 = vmatmul.mubr.bf16.vlgmr.msra.gmra.mrb[12].mxu0 %v362_v42 }
  0xe6   :  { %5753 = vmatprep.mubr.msk.bf16.mxu0 %vm688_vm0, %v333_v49  ;;  %4385 = vmatpush1.bf16.msra.mxu0 %v6301_v25  ;;  %v2110_v25 = vld [vmem:[%s8620_s2] sm:$0x7] }
  0xe7   :  { %4386 = vmatprep.subr.bf16.mxu0 %v6309_v11  ;;  %v7278_v28 = vrot.slane %v2110_v25, %v2122_v21 }
  0xe9   :  { %8726 = vst [vmem:[#allocation14_spill] sm:$0xff] %v7278_v28 }
  0xea   :  { %4387 = vmatpush1.bf16.msra.mxu0 %v6307_v4  ;;  %v8630_v4 = vsub.s32 1, %v7264_v18 }
  0xeb   :  { %4388 = vmatprep.subr.bf16.mxu0 %v6315_v22 }
  0xed   :  { %883 = vmatmul.mubr.bf16.gmra.mrb[16].mxu0 %v365_v54 }
  0xee   :  { %5754 = vmatprep.mubr.msk.bf16.mxu0 %vm688_vm0, %v335_v14  ;;  %4389 = vmatpush1.bf16.msra.mxu0 %v6313_v27  ;;  %v6886_v14 = vmov 1983009808  }
  0xef   :  { %4390 = vmatprep.subr.bf16.mxu0 %v6321_v29  ;;  %v943_v15 = vunpack.c.l.s4 %v6886_v14 }
  0xf1   :  { %v944_v3 = vunpack.c.0.s8 %v943_v15 }
  0xf2   :  { %4391 = vmatpush1.bf16.msra.mxu0 %v6319_v31 }
  0xf3   :  { %4392 = vmatprep.subr.bf16.mxu0 %v6327_v59  ;;  %v7267_v20 = vsub.s32 %v944_v3, %v7264_v18 }
  0xf5   :  { %893 = vmatmul.mubr.bf16.gmra.mrb[20].mxu0 %v368_v19  ;;  %8725 = vst [vmem:[#allocation13_spill] sm:$0xff] %v7267_v20 }
  0xf6   :  { %4393 = vmatpush1.bf16.msra.mxu0 %v6325_v39 }
  0xf7   :  { %4394 = vmatprep.subr.bf16.mxu0 %v6333_v50 }
  0xfa   :  { %4395 = vmatpush1.bf16.msra.mxu0 %v6331_v55 }
 0x194   :  { %v748_v33 = vpop.f32.mrb[0].mxu0  ;;  %v811_v6 = vpop.f32.mrb[0].mxu1 }
 0x195   :  { %v750_v34 = vpop.f32.mrb[1].mxu0  ;;  %v813_v2 = vpop.f32.mrb[1].mxu1 }
 0x196   :  { %v7236_v7 = vmax.f32 %v748_v33, %v813_v2  ;;  %v752_v8 = vpop.f32.mrb[2].mxu0  ;;  %v815_v35 = vpop.f32.mrb[2].mxu1 }
 0x197   :  { %v754_v58 = vpop.f32.mrb[3].mxu0  ;;  %v817_v52 = vpop.f32.mrb[3].mxu1 }
 0x198   :  { %v7238_v37 = vmax.f32 %v752_v8, %v817_v52 }
 0x19f   :  { %v758_v41 = vpop.f32.mrb[4].mxu0  ;;  %v7240_v42 = vpop.f32.mrb[4].mxu1 }
 0x1a0   :  { %v7242_v43 = vpop.f32.mrb[5].mxu0  ;;  %v823_v0 = vpop.f32.mrb[5].mxu1 }
 0x1a1   :  { %v7244_v1 = vmax.f32 %v758_v41, %v823_v0  ;;  %v762_v9 = vpop.f32.mrb[6].mxu0  ;;  %v7246_v45 = vpop.f32.mrb[6].mxu1 }
 0x1a2   :  { %v7248_v46 = vpop.f32.mrb[7].mxu0  ;;  %v827_v47 = vpop.f32.mrb[7].mxu1 }
 0x1a3   :  { %v7250_v48 = vmax.f32 %v762_v9, %v827_v47 }
 0x1aa   :  { %v768_v49 = vpop.f32.mrb[8].mxu0  ;;  %v7252_v38 = vpop.f32.mrb[8].mxu1 }
 0x1ab   :  { %v7254_v44 = vpop.f32.mrb[9].mxu0  ;;  %v833_v54 = vpop.f32.mrb[9].mxu1 }
 0x1ac   :  { %v7256_v57 = vmax.f32 %v768_v49, %v833_v54  ;;  %v772_v60 = vpop.f32.mrb[10].mxu0  ;;  %v7258_v61 = vpop.f32.mrb[10].mxu1 }
 0x1ad   :  { %v7260_v62 = vpop.f32.mrb[11].mxu0  ;;  %v837_v63 = vpop.f32.mrb[11].mxu1 }
 0x1ae   :  { %v7262_v13 = vmax.f32 %v772_v60, %v837_v63 }
 0x1b8   :  { %v874_v19 = vpop.f32.mrb[12].mxu0 }
 0x1b9   :  { %v904_v23 = vmax.f32 %v750_v34, %v874_v19  ;;  %v876_v24 = vpop.f32.mrb[13].mxu0 }
 0x1ba   :  { %v905_v5 = vmax.f32 %v811_v6, %v876_v24  ;;  %v878_v10 = vpop.f32.mrb[14].mxu0 }
 0x1bb   :  { %v939_v11 = vcombine.low %v7236_v7, %v904_v23  ;;  %v940_v17 = vcombine.high %v7236_v7, %v904_v23  ;;  %v907_v12 = vmax.f32 %v754_v58, %v878_v10  ;;  %v880_v22 = vpop.f32.mrb[15].mxu0  ;;  %v7291_v7 = vrot.slane %v2110_v25, %v8631_v32 }
 0x1bc   :  { %v941_v26 = vcombine.high %v905_v5, %v905_v5  ;;  %v962_v27 = vrot.slane %v905_v5, %v7267_v20  ;;  %v7280_v29 = vmax.f32 %v815_v35, %v880_v22  ;;  %v7295_v58 = vrot.slane %v2110_v25, %v8630_v4 }
 0x1bd   :  { %v948_v30 = vrot.slane %v939_v11, %v7267_v20  ;;  %v955_v31 = vrot.slane %v940_v17, %v7267_v20  ;;  %v974_v51 = vcombine.low %v7238_v37, %v907_v12  ;;  %v975_v33 = vcombine.high %v7238_v37, %v907_v12  ;;  %8727 = vst [vmem:[#allocation15_spill] sm:$0xff] %v7291_v7 }
 0x1be   :  { %v7287_v6 = vrot.slane %v941_v26, %v7267_v20  ;;  %v5755_v34 = vcombine.low %v962_v27, %v962_v27  ;;  %v5756_v2 = vcombine.high %v962_v27, %v962_v27  ;;  %v976_v52 = vcombine.high %v7280_v29, %v7280_v29 }
 0x1bf   :  { %v970_v8 = vcombine.low %v948_v30, %v962_v27  ;;  %v971_v35 = vcombine.high %v948_v30, %v962_v27  ;;  %v7310_v47 = vrot.slane %v974_v51, %v7267_v20  ;;  %v7319_v55 = vrot.slane %v975_v33, %v7267_v20 }
 0x1c0   :  { %v972_v59 = vcombine.low %v955_v31, %v7287_v6  ;;  %v973_v36 = vcombine.high %v955_v31, %v7287_v6  ;;  %v1163_v37 = vrot.slane %v5755_v34, %v7267_v20  ;;  %v1179_v39 = vrot.slane %v5756_v2, %v7267_v20  ;;  %v7303_v40 = vpop.f32.mrb[16].mxu0 }
 0x1c1   :  { %v1156_v41 = vrot.slane %v970_v8, %v7267_v20  ;;  %v1172_v0 = vrot.slane %v971_v35, %v7267_v20  ;;  %v5757_v9 = vcombine.low %v7287_v6, %v7287_v6  ;;  %v7312_v49 = vpop.f32.mrb[17].mxu0  ;;  %v5758_v53 = vcombine.high %v7287_v6, %v7287_v6 }
 0x1c2   :  { %v1188_v50 = vrot.slane %v972_v59, %v7267_v20  ;;  %v1620_v54 = vsel %vm250_vm6, %v1163_v37, -inf  ;;  %v7321_v56 = vpop.f32.mrb[18].mxu0  ;;  %v7324_v14 = vrot.slane %v973_v36, %v7267_v20  ;;  %v1641_v15 = vsel %vm250_vm6, %v1179_v39, -inf }
 0x1c3   :  { %v1164_v60 = vcombine.high %v1156_v41, %v1156_v41  ;;  %v1180_v63 = vcombine.high %v1172_v0, %v1172_v0  ;;  %v7327_v16 = vpop.f32.mrb[19].mxu0  ;;  %v1195_v3 = vrot.slane %v5757_v9, %v7267_v20  ;;  %v1606_v21 = vsel %vm250_vm6, %v1156_v41, -inf }
 0x1c4   :  { %v1196_v19 = vcombine.high %v1188_v50, %v1188_v50  ;;  %v1621_v23 = vrot.slane %v1620_v54, 4  ;;  %v1607_v24 = vrot.slane %v1606_v21, 4  ;;  %v1627_v5 = vsel %vm250_vm6, %v1172_v0, -inf }
 0x1c5   :  { %v1613_v25 = vsel %vm250_vm6, %v1164_v60, -inf  ;;  %v1634_v10 = vsel %vm250_vm6, %v1180_v63, -inf  ;;  %v1628_v12 = vrot.slane %v1627_v5, 4  ;;  %v1642_v27 = vrot.slane %v1641_v15, 4 }
 0x1c6   :  { %v1614_v11 = vrot.slane %v1613_v25, 4  ;;  %v1622_v17 = vmax.f32 %v1620_v54, %v1621_v23  ;;  %v1635_v22 = vrot.slane %v1634_v10, 4  ;;  %v1608_v26 = vmax.f32 %v1606_v21, %v1607_v24 }
 0x1c7   :  { %v1648_v30 = vsel %vm250_vm6, %v1188_v50, -inf  ;;  %v1655_v31 = vsel %vm250_vm6, %v1196_v19, -inf  ;;  %v1629_v6 = vmax.f32 %v1627_v5, %v1628_v12  ;;  %v1643_v35 = vmax.f32 %v1641_v15, %v1642_v27 }
 0x1c8   :  { %v1615_v51 = vmax.f32 %v1613_v25, %v1614_v11  ;;  %v1623_v33 = vrot.slane %v1622_v17, 2  ;;  %v1636_v34 = vmax.f32 %v1634_v10, %v1635_v22  ;;  %v7336_v2 = vpop.f32.mrb[20].mxu0  ;;  %v1609_v8 = vrot.slane %v1608_v26, 2 }
 0x1c9   :  { %v1649_v59 = vrot.slane %v1648_v30, 4  ;;  %v1656_v36 = vrot.slane %v1655_v31, 4  ;;  %v7338_v37 = vpop.f32.mrb[21].mxu0  ;;  %v1630_v0 = vrot.slane %v1629_v6, 2  ;;  %v1644_v50 = vrot.slane %v1643_v35, 2 }
 0x1ca   :  { %v1616_v39 = vrot.slane %v1615_v51, 2  ;;  %v1624_v41 = vmax.f32 %v1622_v17, %v1623_v33  ;;  %v1637_v9 = vrot.slane %v1636_v34, 2  ;;  %v1610_v54 = vmax.f32 %v1608_v26, %v1609_v8 }
 0x1cb   :  { %v1650_v60 = vmax.f32 %v1648_v30, %v1649_v59  ;;  %v1657_v63 = vmax.f32 %v1655_v31, %v1656_v36  ;;  %v1631_v23 = vmax.f32 %v1629_v6, %v1630_v0  ;;  %v1645_v5 = vmax.f32 %v1643_v35, %v1644_v50 }
 0x1cc   :  { %v1617_v19 = vmax.f32 %v1615_v51, %v1616_v39  ;;  %v1625_v21 = vrot.slane %v1624_v41, 1  ;;  %v1638_v24 = vmax.f32 %v1636_v34, %v1637_v9  ;;  %v1611_v25 = vrot.slane %v1610_v54, 1 }
 0x1cd   :  { %v1651_v10 = vrot.slane %v1650_v60, 2  ;;  %v1658_v15 = vrot.slane %v1657_v63, 2  ;;  %v1211_v11 = vrot.slane %v5758_v53, %v7267_v20  ;;  %v1212_v12 = vcombine.high %v7324_v14, %v7324_v14 }
 0x1ce   :  { %v1632_v17 = vrot.slane %v1631_v23, 1  ;;  %v1639_v22 = vrot.slane %v1638_v24, 1  ;;  %v1612_v27 = vmax.f32 %v1610_v54, %v1611_v25  ;;  %v1646_v26 = vrot.slane %v1645_v5, 1  ;;  %v7348_v54 = vpop.f32.mrb[22].mxu0 }
 0x1cf   :  { %v1652_v33 = vmax.f32 %v1650_v60, %v1651_v10  ;;  %v1659_v30 = vmax.f32 %v1657_v63, %v1658_v15  ;;  %v1618_v31 = vrot.slane %v1617_v19, 1  ;;  %v1626_v51 = vmax.f32 %v1624_v41, %v1625_v21 }
 0x1d0   :  { %v1633_v8 = vmax.f32 %v1631_v23, %v1632_v17  ;;  %v1662_v6 = vsel %vm250_vm6, %v1195_v3, -inf  ;;  %v1640_v34 = vmax.f32 %v1638_v24, %v1639_v22  ;;  %v1647_v39 = vmax.f32 %v1645_v5, %v1646_v26 }
 0x1d1   :  { %v1653_v35 = vrot.slane %v1652_v33, 1  ;;  %v1660_v59 = vrot.slane %v1659_v30, 1  ;;  %v1663_v36 = vrot.slane %v1662_v6, 4  ;;  %v1669_v53 = vsel %vm250_vm6, %v7324_v14, -inf }
 0x1d2   :  { %v1676_v0 = vsel %vm250_vm6, %v1212_v12, -inf  ;;  %v1683_v9 = vsel %vm250_vm6, %v1211_v11, -inf  ;;  %v1670_v41 = vrot.slane %v1669_v53, 4  ;;  %v2127_v63 = vadd.f32 %v7291_v7, %v1612_v27 }
 0x1d3   :  { %v1654_v50 = vmax.f32 %v1652_v33, %v1653_v35  ;;  %v1664_v60 = vmax.f32 %v1662_v6, %v1663_v36  ;;  %v1661_v3 = vmax.f32 %v1659_v30, %v1660_v59  ;;  %v1677_v21 = vrot.slane %v1676_v0, 4 }
 0x1d4   :  { %v1684_v23 = vrot.slane %v1683_v9, 4  ;;  %v2129_v24 = vadd.f32 %v7278_v28, %v1626_v51  ;;  %v1671_v5 = vmax.f32 %v1669_v53, %v1670_v41  ;;  %v2130_v14 = vadd.f32 %v7291_v7, %v1633_v8 }
 0x1d5   :  { %v1665_v25 = vrot.slane %v1664_v60, 2  ;;  %v2131_v10 = vadd.f32 %v7295_v58, %v1640_v34  ;;  %v1678_v15 = vmax.f32 %v1676_v0, %v1677_v21  ;;  %v2132_v12 = vadd.f32 %v7278_v28, %v1647_v39 }
 0x1d6   :  { %v1685_v11 = vmax.f32 %v1683_v9, %v1684_v23  ;;  %v2133_v17 = vadd.f32 %v7291_v7, %v1654_v50  ;;  %v1619_v22 = vmax.f32 %v1617_v19, %v1618_v31  ;;  %v1672_v27 = vrot.slane %v1671_v5, 2 }
 0x1d7   :  { %v1666_v26 = vmax.f32 %v1664_v60, %v1665_v25  ;;  %v2199_v33 = vmax.f32 %v2127_v63, 0.0  ;;  %v1679_v30 = vrot.slane %v1678_v15, 2  ;;  %v7357_v51 = vadd.f32 %v7295_v58, %v1661_v3 }
 0x1d8   :  { %v1686_v6 = vrot.slane %v1685_v11, 2  ;;  %v2202_v35 = vmax.f32 %v2130_v14, 0.0  ;;  %v1673_v8 = vmax.f32 %v1671_v5, %v1672_v27  ;;  %v2201_v36 = vmax.f32 %v2129_v24, 0.0 }
 0x1d9   :  { %v1667_v59 = vrot.slane %v1666_v26, 1  ;;  %v2203_v34 = vmax.f32 %v2131_v10, 0.0  ;;  %v1680_v53 = vmax.f32 %v1678_v15, %v1679_v30  ;;  %v2204_v9 = vmax.f32 %v2132_v12, 0.0 }
 0x1da   :  { %v1687_v0 = vmax.f32 %v1685_v11, %v1686_v6  ;;  %v2205_v39 = vmax.f32 %v2133_v17, 0.0  ;;  %v1674_v50 = vrot.slane %v1673_v8, 1  ;;  %v7360_v19 = vadd.f32 %v7295_v58, %v1619_v22 }
 0x1db   :  { %v1668_v41 = vmax.f32 %v1666_v26, %v1667_v59  ;;  %v7362_v31 = vpack.c.bf16 %v2199_v33, %v2199_v33  ;;  %v1681_v60 = vrot.slane %v1680_v53, 1  ;;  %v7365_v21 = vpack.c.bf16 %v2202_v35, %v2202_v35 }
 0x1dc   :  { %v1688_v63 = vrot.slane %v1687_v0, 1  ;;  %v1675_v23 = vmax.f32 %v1673_v8, %v1674_v50  ;;  %v7368_v25 = vpack.c.bf16 %v2201_v36, %v2201_v36  ;;  %v7370_v5 = vpack.c.bf16 %v2203_v34, %v2203_v34 }
 0x1dd   :  { %8728 = vst [vmem:[#allocation16_spill] sm:$0xff] %v7362_v31  ;;  %8729 = vst [vmem:[#allocation17_spill] sm:$0xff] %v7365_v21  ;;  %v2135_v24 = vadd.f32 %v7278_v28, %v1668_v41  ;;  %v1682_v14 = vmax.f32 %v1680_v53, %v1681_v60  ;;  %v7372_v15 = vpack.c.bf16 %v2204_v9, %v2204_v9  ;;  %v8632_v26 = vunpack.c.l.b16 %v7365_v21 }
 0x1de   :  { %8730 = vst [vmem:[#allocation18_spill] sm:$0xff] %v7368_v25  ;;  %v1689_v10 = vmax.f32 %v1687_v0, %v1688_v63  ;;  %v2277_v11 = vpack.c.bf16 %v2205_v39, %v2205_v39  ;;  %v2136_v12 = vadd.f32 %v7291_v7, %v1675_v23  ;;  %v997_v30 = vrot.slane %v7280_v29, %v7267_v20 }
 0x1df   :  { %v2207_v17 = vmax.f32 %v2135_v24, 0.0  ;;  %v2137_v27 = vadd.f32 %v7295_v58, %v1682_v14  ;;  %v1004_v6 = vrot.slane %v976_v52, %v7267_v20  ;;  %v7388_v36 = vmax.f32 %v7242_v43, %v7303_v40  ;;  %v6339_v14 = vld [vmem:[#allocation5 + $0x64] ss:$8 sps:$4 sm:$0xff]  }
 0x1e0   :  { %v2138_v33 = vadd.f32 %v7278_v28, %v1689_v10  ;;  %v2208_v35 = vmax.f32 %v2136_v12, 0.0  ;;  %v1005_v0 = vcombine.low %v7310_v47, %v997_v30  ;;  %v1006_v9 = vcombine.high %v7310_v47, %v997_v30  ;;  %v6342_v10 = vld [vmem:[#allocation5 + $0x264] ss:$8 sps:$4 sm:$0xff]   ;;  %4396 = vmatprep.subr.bf16.mxu0 %v6339_v14 }
 0x1e1   :  { %v2279_v59 = vpack.c.bf16 %v2207_v17, %v2207_v17  ;;  %v2209_v34 = vmax.f32 %v2137_v27, 0.0  ;;  %v7392_v41 = vunpack.c.l.b16 %v2277_v11  ;;  %v1007_v29 = vcombine.low %v7319_v55, %v1004_v6  ;;  %v6337_v27 = vld [vmem:[#allocation5 + $0x60] ss:$8 sps:$4 sm:$0xff]   ;;  %4482 = vmatprep.subr.bf16.mxu1 %v6342_v10 }
 0x1e2   :  { %v2210_v53 = vmax.f32 %v2138_v33, 0.0  ;;  %v2280_v39 = vpack.c.bf16 %v2208_v35, %v2208_v35  ;;  %v1008_v52 = vcombine.high %v7319_v55, %v1004_v6  ;;  %v7400_v60 = vrot.slane %v8632_v26, 7  ;;  %v6340_v33 = vld [vmem:[#allocation5 + $0x260] ss:$8 sps:$4 sm:$0xff]   ;;  %4397 = vmatpush1.bf16.msra.mxu0 %v6337_v27 }
 0x1e3   :  { %8731 = vst [vmem:[#allocation19_spill] sm:$0xff] %v7392_v41  ;;  %v7396_v50 = vunpack.c.l.b16 %v2279_v59  ;;  %v5759_v43 = vcombine.low %v997_v30, %v997_v30  ;;  %v1220_v40 = vrot.slane %v1005_v0, %v7267_v20  ;;  %v7403_v63 = vpack.c.bf16 %v2209_v34, %v2209_v34  ;;  %4483 = vmatpush1.bf16.msra.mxu1 %v6340_v33 }
 0x1e4   :  { %8732 = vst [vmem:[#allocation20_spill] sm:$0xff] %v7400_v60  ;;  %v5760_v23 = vcombine.high %v997_v30, %v997_v30  ;;  %v1236_v47 = vrot.slane %v1006_v9, %v7267_v20  ;;  %v5761_v24 = vcombine.low %v1004_v6, %v1004_v6  ;;  %v7406_v11 = vpack.c.bf16 %v2210_v53, %v2210_v53 }
 0x1e5   :  { %8733 = vst [vmem:[#allocation21_spill] sm:$0xff] %v7403_v63  ;;  %v1227_v55 = vrot.slane %v5759_v43, %v7267_v20  ;;  %v1228_v12 = vcombine.high %v1220_v40, %v1220_v40  ;;  %v1252_v17 = vrot.slane %v1007_v29, %v7267_v20  ;;  %v7410_v35 = vunpack.c.l.b16 %v2280_v39  ;;  %v7416_v43 = vpop.f32.mrb[23].mxu0 }
 0x1e6   :  { %v1243_v59 = vrot.slane %v5760_v23, %v7267_v20  ;;  %v1244_v34 = vcombine.high %v1236_v47, %v1236_v47  ;;  %v5762_v30 = vcombine.high %v1004_v6, %v1004_v6  ;;  %v1259_v0 = vrot.slane %v5761_v24, %v7267_v20 }
 0x1e7   :  { %8734 = vst [vmem:[#allocation22_spill] sm:$0xff] %v7410_v35  ;;  %v1260_v9 = vcombine.high %v1252_v17, %v1252_v17  ;;  %v1690_v53 = vsel %vm250_vm6, %v1220_v40, -inf  ;;  %v1697_v4 = vsel %vm250_vm6, %v1228_v12, -inf  ;;  %v7419_v29 = vrot.slane %v1008_v52, %v7267_v20 }
 0x1e8   :  { %v1691_v39 = vrot.slane %v1690_v53, 4  ;;  %v1698_v32 = vrot.slane %v1697_v4, 4  ;;  %v1704_v23 = vsel %vm250_vm6, %v1227_v55, -inf  ;;  %v1275_v6 = vrot.slane %v5762_v30, %v7267_v20 }
 0x1e9   :  { %v1705_v24 = vrot.slane %v1704_v23, 4  ;;  %v1711_v14 = vsel %vm250_vm6, %v1236_v47, -inf  ;;  %v1718_v40 = vsel %vm250_vm6, %v1244_v34, -inf  ;;  %v1725_v52 = vsel %vm250_vm6, %v1243_v59, -inf }
 0x1ea   :  { %v1692_v12 = vmax.f32 %v1690_v53, %v1691_v39  ;;  %v1699_v10 = vmax.f32 %v1697_v4, %v1698_v32  ;;  %v1712_v8 = vrot.slane %v1711_v14, 4  ;;  %v1719_v26 = vrot.slane %v1718_v40, 4 }
 0x1eb   :  { %v1706_v27 = vmax.f32 %v1704_v23, %v1705_v24  ;;  %v1732_v22 = vsel %vm250_vm6, %v1252_v17, -inf  ;;  %v1739_v3 = vsel %vm250_vm6, %v1260_v9, -inf  ;;  %v1726_v21 = vrot.slane %v1725_v52, 4 }
 0x1ec   :  { %v1693_v55 = vrot.slane %v1692_v12, 2  ;;  %v1700_v33 = vrot.slane %v1699_v10, 2  ;;  %v1713_v18 = vmax.f32 %v1711_v14, %v1712_v8  ;;  %v1720_v30 = vmax.f32 %v1718_v40, %v1719_v26 }
 0x1ed   :  { %v1707_v25 = vrot.slane %v1706_v27, 2  ;;  %v1733_v47 = vrot.slane %v1732_v22, 4  ;;  %v1740_v35 = vrot.slane %v1739_v3, 4  ;;  %v1727_v23 = vmax.f32 %v1725_v52, %v1726_v21 }
 0x1ee   :  { %v1694_v34 = vmax.f32 %v1692_v12, %v1693_v55  ;;  %v1701_v53 = vmax.f32 %v1699_v10, %v1700_v33  ;;  %v1714_v32 = vrot.slane %v1713_v18, 2  ;;  %v1721_v4 = vrot.slane %v1720_v30, 2 }
 0x1ef   :  { %v1708_v39 = vmax.f32 %v1706_v27, %v1707_v25  ;;  %v1734_v24 = vmax.f32 %v1732_v22, %v1733_v47  ;;  %v1741_v59 = vmax.f32 %v1739_v3, %v1740_v35  ;;  %v1728_v63 = vrot.slane %v1727_v23, 2  ;;  %v6345_v22 = vld [vmem:[#allocation5 + $0x74] ss:$8 sps:$4 sm:$0xff]   ;;  %v6346_v47 = vld [vmem:[#allocation5 + $0x270] ss:$8 sps:$4 sm:$0xff]  }
 0x1f0   :  { %v1695_v41 = vrot.slane %v1694_v34, 1  ;;  %v1702_v17 = vrot.slane %v1701_v53, 1  ;;  %v1715_v60 = vmax.f32 %v1713_v18, %v1714_v32  ;;  %v1722_v9 = vmax.f32 %v1720_v30, %v1721_v4  ;;  %v6348_v3 = vld [vmem:[#allocation5 + $0x274] ss:$8 sps:$4 sm:$0xff]   ;;  %v6343_v30 = vld [vmem:[#allocation5 + $0x70] ss:$8 sps:$4 sm:$0xff]   ;;  %4398 = vmatprep.subr.bf16.mxu0 %v6345_v22 }
 0x1f1   :  { %v1709_v31 = vrot.slane %v1708_v39, 1  ;;  %v1735_v8 = vrot.slane %v1734_v24, 2  ;;  %v1742_v26 = vrot.slane %v1741_v59, 2  ;;  %v1276_v14 = vcombine.high %v7419_v29, %v7419_v29  ;;  %4484 = vmatprep.subr.bf16.mxu1 %v6348_v3  ;;  %4399 = vmatpush1.bf16.msra.mxu0 %v6343_v30 }
 0x1f2   :  { %v1696_v40 = vmax.f32 %v1694_v34, %v1695_v41  ;;  %v1716_v12 = vrot.slane %v1715_v60, 1  ;;  %v1723_v10 = vrot.slane %v1722_v9, 1  ;;  %v1703_v55 = vmax.f32 %v1701_v53, %v1702_v17  ;;  %4485 = vmatpush1.bf16.msra.mxu1 %v6346_v47 }
 0x1f3   :  { %v1729_v33 = vmax.f32 %v1727_v23, %v1728_v63  ;;  %v1736_v25 = vmax.f32 %v1734_v24, %v1735_v8  ;;  %v1743_v21 = vmax.f32 %v1741_v59, %v1742_v26  ;;  %v1710_v35 = vmax.f32 %v1708_v39, %v1709_v31  ;;  %v6351_v24 = vld [vmem:[#allocation5 + $0x84] ss:$8 sps:$4 sm:$0xff]  }
 0x1f4   :  { %v1717_v27 = vmax.f32 %v1715_v60, %v1716_v12  ;;  %v1746_v18 = vsel %vm250_vm6, %v1259_v0, -inf  ;;  %v1753_v52 = vsel %vm250_vm6, %v7419_v29, -inf  ;;  %v1724_v32 = vmax.f32 %v1722_v9, %v1723_v10  ;;  %v6354_v59 = vld [vmem:[#allocation5 + $0x284] ss:$8 sps:$4 sm:$0xff]   ;;  %v6349_v12 = vld [vmem:[#allocation5 + $0x80] ss:$8 sps:$4 sm:$0xff]   ;;  %4400 = vmatprep.subr.bf16.mxu0 %v6351_v24 }
 0x1f5   :  { %v1730_v4 = vrot.slane %v1729_v33, 1  ;;  %v1737_v41 = vrot.slane %v1736_v25, 1  ;;  %v1747_v34 = vrot.slane %v1746_v18, 4  ;;  %v1744_v63 = vrot.slane %v1743_v21, 1  ;;  %v6352_v10 = vld [vmem:[#allocation5 + $0x280] ss:$8 sps:$4 sm:$0xff]   ;;  %4486 = vmatprep.subr.bf16.mxu1 %v6354_v59  ;;  %4401 = vmatpush1.bf16.msra.mxu0 %v6349_v12 }
 0x1f6   :  { %v1754_v53 = vrot.slane %v1753_v52, 4  ;;  %v1760_v23 = vsel %vm250_vm6, %v1276_v14, -inf  ;;  %v1767_v31 = vsel %vm250_vm6, %v1275_v6, -inf  ;;  %v2139_v29 = vadd.f32 %v7291_v7, %v1696_v40  ;;  %4487 = vmatpush1.bf16.msra.mxu1 %v6352_v10  ;;  %v6363_v12 = vld [vmem:[#allocation5 + $0xa4] ss:$8 sps:$4 sm:$0xff]  }
 0x1f7   :  { %v1731_v60 = vmax.f32 %v1729_v33, %v1730_v4  ;;  %v1738_v0 = vmax.f32 %v1736_v25, %v1737_v41  ;;  %v1748_v39 = vmax.f32 %v1746_v18, %v1747_v34  ;;  %v1761_v9 = vrot.slane %v1760_v23, 4  ;;  %v6357_v4 = vld [vmem:[#allocation5 + $0x94] ss:$8 sps:$4 sm:$0xff]  }
 0x1f8   :  { %v1755_v17 = vmax.f32 %v1753_v52, %v1754_v53  ;;  %v1768_v8 = vrot.slane %v1767_v31, 4  ;;  %v2140_v26 = vadd.f32 %v7295_v58, %v1703_v55  ;;  %v2141_v14 = vadd.f32 %v7278_v28, %v1710_v35  ;;  %v6360_v35 = vld [vmem:[#allocation5 + $0x294] ss:$8 sps:$4 sm:$0xff]   ;;  %v6355_v53 = vld [vmem:[#allocation5 + $0x90] ss:$8 sps:$4 sm:$0xff]   ;;  %4402 = vmatprep.subr.bf16.mxu0 %v6357_v4 }
 0x1f9   :  { %v1749_v22 = vrot.slane %v1748_v39, 2  ;;  %v2142_v6 = vadd.f32 %v7291_v7, %v1717_v27  ;;  %v2143_v33 = vadd.f32 %v7295_v58, %v1724_v32  ;;  %v1762_v40 = vmax.f32 %v1760_v23, %v1761_v9  ;;  %4488 = vmatprep.subr.bf16.mxu1 %v6360_v35  ;;  %4403 = vmatpush1.bf16.msra.mxu0 %v6355_v53  ;;  %v6372_v53 = vld [vmem:[#allocation5 + $0x2b4] ss:$8 sps:$4 sm:$0xff]  }
 0x1fa   :  { %v1756_v25 = vrot.slane %v1755_v17, 2  ;;  %v1769_v3 = vmax.f32 %v1767_v31, %v1768_v8  ;;  %v2144_v18 = vadd.f32 %v7278_v28, %v1731_v60  ;;  %v1745_v52 = vmax.f32 %v1743_v21, %v1744_v63  ;;  %v6358_v60 = vld [vmem:[#allocation5 + $0x290] ss:$8 sps:$4 sm:$0xff]   ;;  %4404 = vmatprep.subr.bf16.mxu0 %v6363_v12  ;;  %v6375_v12 = vld [vmem:[#allocation5 + $0xc4] ss:$8 sps:$4 sm:$0xff]  }
 0x1fb   :  { %v1750_v55 = vmax.f32 %v1748_v39, %v1749_v22  ;;  %v2145_v30 = vadd.f32 %v7291_v7, %v1738_v0  ;;  %v2211_v47 = vmax.f32 %v2139_v29, 0.0  ;;  %v1763_v27 = vrot.slane %v1762_v40, 2  ;;  %4489 = vmatpush1.bf16.msra.mxu1 %v6358_v60  ;;  %v6370_v60 = vld [vmem:[#allocation5 + $0x2b0] ss:$8 sps:$4 sm:$0xff]  }
 0x1fc   :  { %v1757_v41 = vmax.f32 %v1755_v17, %v1756_v25  ;;  %v1770_v34 = vrot.slane %v1769_v3, 2  ;;  %v2212_v32 = vmax.f32 %v2140_v26, 0.0  ;;  %v2213_v59 = vmax.f32 %v2141_v14, 0.0  ;;  %v6366_v26 = vld [vmem:[#allocation5 + $0x2a4] ss:$8 sps:$4 sm:$0xff]  }
 0x1fd   :  { %v1751_v24 = vrot.slane %v1750_v55, 1  ;;  %v2214_v23 = vmax.f32 %v2142_v6, 0.0  ;;  %v2215_v31 = vmax.f32 %v2143_v33, 0.0  ;;  %v1764_v21 = vmax.f32 %v1762_v40, %v1763_v27  ;;  %v6361_v33 = vld [vmem:[#allocation5 + $0xa0] ss:$8 sps:$4 sm:$0xff]   ;;  %4490 = vmatprep.subr.bf16.mxu1 %v6366_v26 }
 0x1fe   :  { %v1758_v9 = vrot.slane %v1757_v41, 1  ;;  %v1771_v63 = vmax.f32 %v1769_v3, %v1770_v34  ;;  %v2216_v39 = vmax.f32 %v2144_v18, 0.0  ;;  %v2217_v29 = vmax.f32 %v2145_v30, 0.0  ;;  %v6364_v25 = vld [vmem:[#allocation5 + $0x2a0] ss:$8 sps:$4 sm:$0xff]   ;;  %4405 = vmatpush1.bf16.msra.mxu0 %v6361_v33 }
 0x1ff   :  { %v1752_v0 = vmax.f32 %v1750_v55, %v1751_v24  ;;  %v2283_v8 = vpack.c.bf16 %v2211_v47, %v2211_v47  ;;  %v2284_v17 = vpack.c.bf16 %v2212_v32, %v2212_v32  ;;  %v1765_v22 = vrot.slane %v1764_v21, 1  ;;  %4491 = vmatpush1.bf16.msra.mxu1 %v6364_v25  ;;  %v6376_v25 = vld [vmem:[#allocation5 + $0x2c0] ss:$8 sps:$4 sm:$0xff]  }
 0x200   :  { %v1759_v10 = vmax.f32 %v1757_v41, %v1758_v9  ;;  %v1772_v14 = vrot.slane %v1771_v63, 1  ;;  %v2285_v6 = vpack.c.bf16 %v2213_v59, %v2213_v59  ;;  %v7443_v4 = vunpack.c.l.b16 %v7406_v11  ;;  %v6369_v11 = vld [vmem:[#allocation5 + $0xb4] ss:$8 sps:$4 sm:$0xff]   ;;  %4492 = vmatprep.subr.bf16.mxu1 %v6372_v53 }
 0x201   :  { %v2147_v40 = vadd.f32 %v7278_v28, %v1752_v0  ;;  %v2286_v3 = vpack.c.bf16 %v2214_v23, %v2214_v23  ;;  %v2287_v18 = vpack.c.bf16 %v2215_v31, %v2215_v31  ;;  %v7447_v30 = vadd.f32 %v7295_v58, %v1745_v52  ;;  %v6367_v31 = vld [vmem:[#allocation5 + $0xb0] ss:$8 sps:$4 sm:$0xff]   ;;  %4406 = vmatprep.subr.bf16.mxu0 %v6369_v11 }
 0x202   :  { %v1773_v55 = vmax.f32 %v1771_v63, %v1772_v14  ;;  %v2148_v47 = vadd.f32 %v7291_v7, %v1759_v10  ;;  %v2288_v35 = vpack.c.bf16 %v2216_v39, %v2216_v39  ;;  %v7450_v41 = vmax.f32 %v1764_v21, %v1765_v22  ;;  %4407 = vmatpush1.bf16.msra.mxu0 %v6367_v31 }
 0x203   :  { %v2219_v27 = vmax.f32 %v2147_v40, 0.0  ;;  %v2289_v34 = vpack.c.bf16 %v2217_v29, %v2217_v29  ;;  %v7452_v32 = vunpack.c.l.b16 %v2283_v8  ;;  %v7455_v23 = vunpack.c.l.b16 %v2284_v17  ;;  %4493 = vmatpush1.bf16.msra.mxu1 %v6370_v60  ;;  %4408 = vmatprep.subr.bf16.mxu0 %v6375_v12 }
 0x204   :  { %v2150_v24 = vadd.f32 %v7278_v28, %v1773_v55  ;;  %v2220_v59 = vmax.f32 %v2148_v47, 0.0  ;;  %v7457_v52 = vunpack.c.l.b16 %v2285_v6  ;;  %v7459_v21 = vunpack.c.l.b16 %v2286_v3  ;;  %v6373_v6 = vld [vmem:[#allocation5 + $0xc0] ss:$8 sps:$4 sm:$0xff]  }
 0x205   :  { %8735 = vst [vmem:[#allocation23_spill] sm:$0xff] %v7452_v32  ;;  %8736 = vst [vmem:[#allocation24_spill] sm:$0xff] %v7455_v23  ;;  %v2291_v9 = vpack.c.bf16 %v2219_v27, %v2219_v27  ;;  %v7461_v63 = vunpack.c.l.b16 %v2287_v18  ;;  %v1009_v39 = vcombine.low %v7244_v1, %v7388_v36  ;;  %v1010_v8 = vcombine.high %v7244_v1, %v7388_v36  ;;  %v6378_v1 = vld [vmem:[#allocation5 + $0x2c4] ss:$8 sps:$4 sm:$0xff]  }
 0x206   :  { %8737 = vst [vmem:[#allocation25_spill] sm:$0xff] %v7457_v52  ;;  %8738 = vst [vmem:[#allocation26_spill] sm:$0xff] %v7459_v21  ;;  %v2222_v0 = vmax.f32 %v2150_v24, 0.0  ;;  %v2292_v29 = vpack.c.bf16 %v2220_v59, %v2220_v59  ;;  %v911_v17 = vmax.f32 %v7240_v42, %v7312_v49  ;;  %v7469_v26 = vunpack.c.l.b16 %v2288_v35  ;;  %4494 = vmatprep.subr.bf16.mxu1 %v6378_v1  ;;  %v6384_v35 = vld [vmem:[#allocation5 + $0x2d4] ss:$8 sps:$4 sm:$0xff]  }
 0x207   :  { %8739 = vst [vmem:[#allocation27_spill] sm:$0xff] %v7461_v63  ;;  %v1018_v10 = vrot.slane %v1009_v39, %v7267_v20  ;;  %v7474_v22 = vmax.f32 %v7248_v46, %v7321_v56  ;;  %v7478_v14 = vmax.f32 %v7246_v45, %v7327_v16  ;;  %v7480_v36 = vunpack.c.l.b16 %v2289_v34  ;;  %v6381_v16 = vld [vmem:[#allocation5 + $0xd4] ss:$8 sps:$4 sm:$0xff]   ;;  %4409 = vmatpush1.bf16.msra.mxu0 %v6373_v6  ;;  %v6379_v24 = vld [vmem:[#allocation5 + $0xd0] ss:$8 sps:$4 sm:$0xff]  }
 0x208   :  { %v7482_v42 = vunpack.c.l.b16 %v2291_v9  ;;  %v1025_v49 = vrot.slane %v1010_v8, %v7267_v20  ;;  %v1011_v33 = vcombine.high %v911_v17, %v911_v17  ;;  %v7485_v40 = vpack.c.bf16 %v2222_v0, %v2222_v0  ;;  %4495 = vmatpush1.bf16.msra.mxu1 %v6376_v25  ;;  %4410 = vmatprep.subr.bf16.mxu0 %v6381_v16  ;;  %v6385_v25 = vld [vmem:[#allocation5 + $0xe0] ss:$8 sps:$4 sm:$0xff]  }
 0x209   :  { %8740 = vst [vmem:[#allocation28_spill] sm:$0xff] %v7480_v36  ;;  %v1032_v46 = vrot.slane %v911_v17, %v7267_v20  ;;  %v7492_v3 = vunpack.c.l.b16 %v2292_v29  ;;  %v7499_v55 = vmax.f32 %v7254_v44, %v7336_v2  ;;  %v7503_v47 = vmax.f32 %v7252_v38, %v7338_v37  ;;  %v6382_v38 = vld [vmem:[#allocation5 + $0x2d0] ss:$8 sps:$4 sm:$0xff]   ;;  %v6387_v2 = vld [vmem:[#allocation5 + $0xe4] ss:$8 sps:$4 sm:$0xff]   ;;  %4496 = vmatprep.subr.bf16.mxu1 %v6384_v35 }
 0x20a   :  { %v7495_v18 = vrot.slane %v1011_v33, %v7267_v20  ;;  %v6390_v29 = vld [vmem:[#allocation5 + $0x2e4] ss:$8 sps:$4 sm:$0xff]  }
 0x20b   :  { %8741 = vst [vmem:[#allocation29_spill] sm:$0xff] %v7492_v3  ;;  %v1040_v27 = vcombine.low %v1018_v10, %v1032_v46  ;;  %v1041_v34 = vcombine.high %v1018_v10, %v1032_v46  ;;  %v5763_v11 = vcombine.low %v1032_v46, %v1032_v46  ;;  %v5764_v53 = vcombine.high %v1032_v46, %v1032_v46 }
 0x20c   :  { %v1042_v59 = vcombine.low %v1025_v49, %v7495_v18  ;;  %v1043_v31 = vcombine.high %v1025_v49, %v7495_v18  ;;  %v5765_v60 = vcombine.low %v7495_v18, %v7495_v18  ;;  %v5766_v12 = vcombine.high %v7495_v18, %v7495_v18  ;;  %4411 = vmatpush1.bf16.msra.mxu0 %v6379_v24  ;;  %v6388_v18 = vld [vmem:[#allocation5 + $0x2e0] ss:$8 sps:$4 sm:$0xff]   ;;  %v6396_v24 = vld [vmem:[#allocation5 + $0x2f4] ss:$8 sps:$4 sm:$0xff]  }
 0x20d   :  { %v1284_v37 = vrot.slane %v1040_v27, %v7267_v20  ;;  %v1291_v9 = vrot.slane %v5763_v11, %v7267_v20  ;;  %v1300_v39 = vrot.slane %v1041_v34, %v7267_v20  ;;  %v1307_v0 = vrot.slane %v5764_v53, %v7267_v20  ;;  %4497 = vmatpush1.bf16.msra.mxu1 %v6382_v38  ;;  %v6393_v11 = vld [vmem:[#allocation5 + $0xf4] ss:$8 sps:$4 sm:$0xff]  }
 0x20e   :  { %v1316_v8 = vrot.slane %v1042_v59, %v7267_v20  ;;  %v1323_v17 = vrot.slane %v5765_v60, %v7267_v20  ;;  %v7521_v10 = vrot.slane %v7478_v14, %v7267_v20  ;;  %v7526_v16 = vrot.slane %v1043_v31, %v7267_v20  ;;  %4412 = vmatprep.subr.bf16.mxu0 %v6387_v2 }
 0x20f   :  { %v1292_v6 = vcombine.high %v1284_v37, %v1284_v37  ;;  %v1308_v1 = vcombine.high %v1300_v39, %v1300_v39  ;;  %v1774_v49 = vsel %vm250_vm6, %v1284_v37, -inf  ;;  %v1788_v33 = vsel %vm250_vm6, %v1291_v9, -inf  ;;  %4498 = vmatprep.subr.bf16.mxu1 %v6390_v29 }
 0x210   :  { %v1324_v46 = vcombine.high %v1316_v8, %v1316_v8  ;;  %8742 = vst [vmem:[#allocation30_spill] sm:$0xff] %v7526_v16  ;;  %v1775_v27 = vrot.slane %v1774_v49, 4  ;;  %v1789_v34 = vrot.slane %v1788_v33, 4  ;;  %v1795_v53 = vsel %vm250_vm6, %v1300_v39, -inf  ;;  %4413 = vmatpush1.bf16.msra.mxu0 %v6385_v25 }
 0x211   :  { %v1781_v35 = vsel %vm250_vm6, %v1292_v6, -inf  ;;  %v1802_v59 = vsel %vm250_vm6, %v1308_v1, -inf  ;;  %v1809_v60 = vsel %vm250_vm6, %v1307_v0, -inf  ;;  %v1796_v44 = vrot.slane %v1795_v53, 4  ;;  %v6391_v6 = vld [vmem:[#allocation5 + $0xf0] ss:$8 sps:$4 sm:$0xff]   ;;  %4499 = vmatpush1.bf16.msra.mxu1 %v6388_v18  ;;  %4414 = vmatprep.subr.bf16.mxu0 %v6393_v11 }
 0x212   :  { %v1776_v37 = vmax.f32 %v1774_v49, %v1775_v27  ;;  %v1782_v9 = vrot.slane %v1781_v35, 4  ;;  %v1790_v31 = vmax.f32 %v1788_v33, %v1789_v34  ;;  %v1803_v56 = vrot.slane %v1802_v59, 4  ;;  %v6394_v0 = vld [vmem:[#allocation5 + $0x2f0] ss:$8 sps:$4 sm:$0xff]   ;;  %4500 = vmatprep.subr.bf16.mxu1 %v6396_v24 }
 0x213   :  { %v1810_v45 = vrot.slane %v1809_v60, 4  ;;  %v1816_v38 = vsel %vm250_vm6, %v1316_v8, -inf  ;;  %v1823_v2 = vsel %vm250_vm6, %v1324_v46, -inf  ;;  %v1797_v1 = vmax.f32 %v1795_v53, %v1796_v44 }
 0x214   :  { %v1777_v3 = vrot.slane %v1776_v37, 2  ;;  %v1783_v39 = vmax.f32 %v1781_v35, %v1782_v9  ;;  %v1791_v36 = vrot.slane %v1790_v31, 2  ;;  %v7534_v29 = vmax.f32 %v1802_v59, %v1803_v56  ;;  %4415 = vmatpush1.bf16.msra.mxu0 %v6391_v6 }
 0x215   :  { %v1811_v49 = vmax.f32 %v1809_v60, %v1810_v45  ;;  %v1817_v33 = vrot.slane %v1816_v38, 4  ;;  %v1824_v27 = vrot.slane %v1823_v2, 4  ;;  %v1798_v32 = vrot.slane %v1797_v1, 2  ;;  %4501 = vmatpush1.bf16.msra.mxu1 %v6394_v0 }
 0x216   :  { %8743 = vst [vmem:[#allocation31_spill] sm:$0xff] %v7534_v29  ;;  %v1778_v34 = vmax.f32 %v1776_v37, %v1777_v3  ;;  %v1784_v21 = vrot.slane %v1783_v39, 2  ;;  %v1792_v8 = vmax.f32 %v1790_v31, %v1791_v36  ;;  %v1339_v25 = vrot.slane %v5766_v12, %v7267_v20 }
 0x217   :  { %v1812_v35 = vrot.slane %v1811_v49, 2  ;;  %v7539_v44 = vmax.f32 %v1823_v2, %v1824_v27  ;;  %v1799_v11 = vmax.f32 %v1797_v1, %v1798_v32  ;;  %v1830_v36 = vsel %vm250_vm6, %v1323_v17, -inf }
 0x218   :  { %v1779_v18 = vrot.slane %v1778_v34, 1  ;;  %v1785_v56 = vmax.f32 %v1783_v39, %v1784_v21  ;;  %v1793_v53 = vrot.slane %v1792_v8, 1  ;;  %v1837_v12 = vsel %vm250_vm6, %v7526_v16, -inf }
 0x219   :  { %8744 = vst [vmem:[#allocation32_spill] sm:$0xff] %v7539_v44  ;;  %v1813_v3 = vmax.f32 %v1811_v49, %v1812_v35  ;;  %v1800_v60 = vrot.slane %v1799_v11, 1  ;;  %v7545_v24 = vmax.f32 %v1816_v38, %v1817_v33  ;;  %v1838_v32 = vrot.slane %v1837_v12, 4 }
 0x21a   :  { %v1786_v59 = vrot.slane %v1785_v56, 1  ;;  %v7548_v9 = vmax.f32 %v1778_v34, %v1779_v18  ;;  %v1851_v31 = vsel %vm250_vm6, %v1339_v25, -inf  ;;  %v1831_v6 = vrot.slane %v1830_v36, 4 }
 0x21b   :  { %8745 = vst [vmem:[#allocation33_spill] sm:$0xff] %v7545_v24  ;;  %v1814_v21 = vrot.slane %v1813_v3, 1  ;;  %v1852_v39 = vrot.slane %v1851_v31, 4  ;;  %v8747_v17 = vcombine.low %v7250_v48, %v7474_v22  ;;  %v7555_v0 = vmax.f32 %v1792_v8, %v1793_v53 }
 0x21c   :  { %8746 = vst [vmem:[#allocation34_spill] sm:$0xff] %v7548_v9  ;;  %v1787_v2 = vmax.f32 %v1785_v56, %v1786_v59  ;;  %v7557_v38 = vmax.f32 %v1799_v11, %v1800_v60  ;;  %v7559_v49 = vmax.f32 %v1837_v12, %v1838_v32  ;;  %v8750_v33 = vcombine.high %v7250_v48, %v7474_v22  ;;  %v6399_v32 = vld [vmem:[#allocation5 + $0x104] ss:$8 sps:$4 sm:$0xff]  }
 0x21d   :  { %v1053_v1 = vrot.slane %v8747_v17, %v7267_v20  ;;  %v7565_v34 = vmax.f32 %v1851_v31, %v1852_v39  ;;  %v8752_v35 = vcombine.high %v7478_v14, %v7478_v14  ;;  %v7573_v56 = vmax.f32 %v1813_v3, %v1814_v21  ;;  %4427 = vmatprep.subr.bf16.mxu0 %v6399_v32 }
 0x21e   :  { %8748 = vst [vmem:[#allocation35_spill] sm:$0xff] %v7557_v38  ;;  %8749 = vst [vmem:[#allocation36_spill] sm:$0xff] %v7559_v49  ;;  %v1060_v27 = vrot.slane %v8750_v33, %v7267_v20  ;;  %v2152_v25 = vadd.f32 %v7295_v58, %v1787_v2  ;;  %v5767_v53 = vcombine.low %v7521_v10, %v7521_v10  ;;  %v6402_v2 = vld [vmem:[#allocation5 + $0x304] ss:$8 sps:$4 sm:$0xff]  }
 0x21f   :  { %8751 = vst [vmem:[#allocation37_spill] sm:$0xff] %v7565_v34  ;;  %v1074_v18 = vrot.slane %v8752_v35, %v7267_v20  ;;  %v1075_v8 = vcombine.low %v1053_v1, %v7521_v10  ;;  %8753 = vst [vmem:[#allocation38_spill] sm:$0xff] %v7573_v56  ;;  %v1076_v11 = vcombine.high %v1053_v1, %v7521_v10  ;;  %4513 = vmatprep.subr.bf16.mxu1 %v6402_v2 }
 0x220   :  { %v5768_v48 = vcombine.high %v7521_v10, %v7521_v10  ;;  %v7580_v22 = vmax.f32 %v1830_v36, %v1831_v6  ;;  %v2224_v12 = vmax.f32 %v2152_v25, 0.0  ;;  %v1355_v3 = vrot.slane %v5767_v53, %v7267_v20 }
 0x221   :  { %v1077_v59 = vcombine.low %v1060_v27, %v1074_v18  ;;  %v1078_v60 = vcombine.high %v1060_v27, %v1074_v18  ;;  %v1348_v31 = vrot.slane %v1075_v8, %v7267_v20  ;;  %v1364_v21 = vrot.slane %v1076_v11, %v7267_v20 }
 0x222   :  { %8754 = vst [vmem:[#allocation39_spill] sm:$0xff] %v7580_v22  ;;  %v2296_v17 = vpack.c.bf16 %v2224_v12, %v2224_v12  ;;  %v5769_v1 = vcombine.low %v1074_v18, %v1074_v18  ;;  %v1371_v6 = vrot.slane %v5768_v48, %v7267_v20  ;;  %v5770_v8 = vcombine.high %v1074_v18, %v1074_v18 }
 0x223   :  { %v1380_v10 = vrot.slane %v1077_v59, %v7267_v20  ;;  %v1356_v36 = vcombine.high %v1348_v31, %v1348_v31  ;;  %v1372_v33 = vcombine.high %v1364_v21, %v1364_v21  ;;  %v1858_v27 = vsel %vm250_vm6, %v1348_v31, -inf }
 0x224   :  { %v7590_v25 = vunpack.c.l.b16 %v2296_v17  ;;  %v1387_v35 = vrot.slane %v5769_v1, %v7267_v20  ;;  %v1396_v11 = vrot.slane %v1078_v60, %v7267_v20  ;;  %v1859_v12 = vrot.slane %v1858_v27, 4 }
 0x225   :  { %v1388_v53 = vcombine.high %v1380_v10, %v1380_v10  ;;  %v1865_v39 = vsel %vm250_vm6, %v1356_v36, -inf  ;;  %v1872_v59 = vsel %vm250_vm6, %v1355_v3, -inf  ;;  %v1879_v48 = vsel %vm250_vm6, %v1364_v21, -inf }
 0x226   :  { %8755 = vst [vmem:[#allocation40_spill] sm:$0xff] %v7590_v25  ;;  %v1866_v32 = vrot.slane %v1865_v39, 4  ;;  %v1873_v14 = vrot.slane %v1872_v59, 4  ;;  %v1886_v31 = vsel %vm250_vm6, %v1372_v33, -inf  ;;  %v1860_v2 = vmax.f32 %v1858_v27, %v1859_v12 }
 0x227   :  { %v1880_v17 = vrot.slane %v1879_v48, 4  ;;  %v1887_v46 = vrot.slane %v1886_v31, 4  ;;  %v1893_v1 = vsel %vm250_vm6, %v1371_v6, -inf  ;;  %v1900_v45 = vsel %vm250_vm6, %v1380_v10, -inf }
 0x228   :  { %v1867_v18 = vmax.f32 %v1865_v39, %v1866_v32  ;;  %v1874_v37 = vmax.f32 %v1872_v59, %v1873_v14  ;;  %v1894_v60 = vrot.slane %v1893_v1, 4  ;;  %v1861_v34 = vrot.slane %v1860_v2, 2 }
 0x229   :  { %v1881_v36 = vmax.f32 %v1879_v48, %v1880_v17  ;;  %v1888_v49 = vmax.f32 %v1886_v31, %v1887_v46  ;;  %v1901_v3 = vrot.slane %v1900_v45, 4  ;;  %v1907_v21 = vsel %vm250_vm6, %v1388_v53, -inf }
 0x22a   :  { %v1868_v16 = vrot.slane %v1867_v18, 2  ;;  %v1875_v44 = vrot.slane %v1874_v37, 2  ;;  %v1895_v22 = vmax.f32 %v1893_v1, %v1894_v60  ;;  %v1862_v33 = vmax.f32 %v1860_v2, %v1861_v34 }
 0x22b   :  { %v1882_v27 = vrot.slane %v1881_v36, 2  ;;  %v1889_v12 = vrot.slane %v1888_v49, 2  ;;  %v1902_v56 = vmax.f32 %v1900_v45, %v1901_v3  ;;  %v1403_v6 = vrot.slane %v5770_v8, %v7267_v20 }
 0x22c   :  { %v1876_v39 = vmax.f32 %v1874_v37, %v1875_v44  ;;  %v1896_v14 = vrot.slane %v1895_v22, 2  ;;  %v1908_v59 = vrot.slane %v1907_v21, 4  ;;  %v1863_v32 = vrot.slane %v1862_v33, 1 }
 0x22d   :  { %v1883_v10 = vmax.f32 %v1881_v36, %v1882_v27  ;;  %v1890_v24 = vmax.f32 %v1888_v49, %v1889_v12  ;;  %v1903_v48 = vrot.slane %v1902_v56, 2  ;;  %v1404_v46 = vcombine.high %v1396_v11, %v1396_v11 }
 0x22e   :  { %v1877_v31 = vrot.slane %v1876_v39, 1  ;;  %v1897_v17 = vmax.f32 %v1895_v22, %v1896_v14  ;;  %v1909_v38 = vmax.f32 %v1907_v21, %v1908_v59  ;;  %v1869_v1 = vmax.f32 %v1867_v18, %v1868_v16 }
 0x22f   :  { %v1884_v60 = vrot.slane %v1883_v10, 1  ;;  %v1891_v53 = vrot.slane %v1890_v24, 1  ;;  %v1904_v34 = vmax.f32 %v1902_v56, %v1903_v48  ;;  %v1864_v2 = vmax.f32 %v1862_v33, %v1863_v32 }
 0x230   :  { %v1878_v29 = vmax.f32 %v1876_v39, %v1877_v31  ;;  %v1898_v45 = vrot.slane %v1897_v17, 1  ;;  %v1910_v3 = vrot.slane %v1909_v38, 2  ;;  %v1914_v9 = vsel %vm250_vm6, %v1387_v35, -inf }
 0x231   :  { %v1885_v8 = vmax.f32 %v1883_v10, %v1884_v60  ;;  %v1892_v44 = vmax.f32 %v1890_v24, %v1891_v53  ;;  %v1905_v37 = vrot.slane %v1904_v34, 1  ;;  %v1915_v27 = vrot.slane %v1914_v9, 4 }
 0x232   :  { %v1899_v36 = vmax.f32 %v1897_v17, %v1898_v45  ;;  %v1911_v49 = vmax.f32 %v1909_v38, %v1910_v3  ;;  %v1921_v12 = vsel %vm250_vm6, %v1396_v11, -inf  ;;  %v1928_v16 = vsel %vm250_vm6, %v1404_v46, -inf }
 0x233   :  { %v1906_v22 = vmax.f32 %v1904_v34, %v1905_v37  ;;  %v1922_v21 = vrot.slane %v1921_v12, 4  ;;  %v1935_v56 = vsel %vm250_vm6, %v1403_v6, -inf  ;;  %v1916_v33 = vmax.f32 %v1914_v9, %v1915_v27 }
 0x234   :  { %v1912_v18 = vrot.slane %v1911_v49, 1  ;;  %v1929_v39 = vrot.slane %v1928_v16, 4  ;;  %v1936_v14 = vrot.slane %v1935_v56, 4  ;;  %v1870_v59 = vrot.slane %v1869_v1, 1 }
 0x235   :  { %v1923_v24 = vmax.f32 %v1921_v12, %v1922_v21  ;;  %v2163_v32 = vadd.f32 %v7291_v7, %v1864_v2  ;;  %v2165_v35 = vadd.f32 %v7278_v28, %v1878_v29  ;;  %v1917_v10 = vrot.slane %v1916_v33, 2 }
 0x236   :  { %v1913_v38 = vmax.f32 %v1911_v49, %v1912_v18  ;;  %v1930_v48 = vmax.f32 %v1928_v16, %v1929_v39  ;;  %v1937_v11 = vmax.f32 %v1935_v56, %v1936_v14  ;;  %v2166_v17 = vadd.f32 %v7291_v7, %v1885_v8 }
 0x237   :  { %v1924_v31 = vrot.slane %v1923_v24, 2  ;;  %v2167_v46 = vadd.f32 %v7295_v58, %v1892_v44  ;;  %v2168_v6 = vadd.f32 %v7278_v28, %v1899_v36  ;;  %v1918_v9 = vmax.f32 %v1916_v33, %v1917_v10 }
 0x238   :  { %v1931_v60 = vrot.slane %v1930_v48, 2  ;;  %v1938_v53 = vrot.slane %v1937_v11, 2  ;;  %v2169_v34 = vadd.f32 %v7291_v7, %v1906_v22  ;;  %v1871_v45 = vmax.f32 %v1869_v1, %v1870_v59 }
 0x239   :  { %v1925_v2 = vmax.f32 %v1923_v24, %v1924_v31  ;;  %v7613_v29 = vadd.f32 %v7295_v58, %v1913_v38  ;;  %v2235_v3 = vmax.f32 %v2163_v32, 0.0  ;;  %v1919_v37 = vrot.slane %v1918_v9, 1 }
 0x23a   :  { %v1932_v49 = vmax.f32 %v1930_v48, %v1931_v60  ;;  %v1939_v27 = vmax.f32 %v1937_v11, %v1938_v53  ;;  %v2238_v12 = vmax.f32 %v2166_v17, 0.0  ;;  %v2237_v21 = vmax.f32 %v2165_v35, 0.0 }
 0x23b   :  { %v1926_v8 = vrot.slane %v1925_v2, 1  ;;  %v2239_v44 = vmax.f32 %v2167_v46, 0.0  ;;  %v2240_v16 = vmax.f32 %v2168_v6, 0.0  ;;  %v1920_v36 = vmax.f32 %v1918_v9, %v1919_v37 }
 0x23c   :  { %v1933_v56 = vrot.slane %v1932_v49, 1  ;;  %v1940_v18 = vrot.slane %v1939_v27, 1  ;;  %v2241_v33 = vmax.f32 %v2169_v34, 0.0  ;;  %v7616_v1 = vadd.f32 %v7295_v58, %v1871_v45 }
 0x23d   :  { %v1927_v39 = vmax.f32 %v1925_v2, %v1926_v8  ;;  %v7618_v22 = vpack.c.bf16 %v2235_v3, %v2235_v3  ;;  %v7620_v14 = vpack.c.bf16 %v2238_v12, %v2238_v12  ;;  %v2171_v32 = vadd.f32 %v7278_v28, %v1920_v36 }
 0x23e   :  { %v1934_v59 = vmax.f32 %v1932_v49, %v1933_v56  ;;  %v1941_v24 = vmax.f32 %v1939_v27, %v1940_v18  ;;  %v7625_v10 = vpack.c.bf16 %v2237_v21, %v2237_v21  ;;  %v7627_v48 = vpack.c.bf16 %v2239_v44, %v2239_v44 }
 0x23f   :  { %8756 = vst [vmem:[#allocation41_spill] sm:$0xff] %v7618_v22  ;;  %8757 = vst [vmem:[#allocation42_spill] sm:$0xff] %v7620_v14  ;;  %v2172_v38 = vadd.f32 %v7291_v7, %v1927_v39  ;;  %v7629_v11 = vpack.c.bf16 %v2240_v16, %v2240_v16  ;;  %v2243_v46 = vmax.f32 %v2171_v32, 0.0  ;;  %v2313_v6 = vpack.c.bf16 %v2241_v33, %v2241_v33 }
 0x240   :  { %8758 = vst [vmem:[#allocation43_spill] sm:$0xff] %v7625_v10  ;;  %v2173_v31 = vadd.f32 %v7295_v58, %v1934_v59  ;;  %v2174_v17 = vadd.f32 %v7278_v28, %v1941_v24  ;;  %v8656_v53 = vunpack.c.l.b16 %v7620_v14  ;;  %v1079_v34 = vcombine.low %v7256_v57, %v7499_v55 }
 0x241   :  { %v2244_v9 = vmax.f32 %v2172_v38, 0.0  ;;  %v2315_v3 = vpack.c.bf16 %v2243_v46, %v2243_v46  ;;  %v1080_v37 = vcombine.high %v7256_v57, %v7499_v55  ;;  %v1081_v8 = vcombine.high %v7503_v47, %v7503_v47 }
 0x242   :  { %v2245_v45 = vmax.f32 %v2173_v31, 0.0  ;;  %v2246_v2 = vmax.f32 %v2174_v17, 0.0  ;;  %v1088_v12 = vrot.slane %v1079_v34, %v7267_v20  ;;  %v7643_v44 = vunpack.c.l.b16 %v2313_v6 }
 0x243   :  { %v2316_v49 = vpack.c.bf16 %v2244_v9, %v2244_v9  ;;  %v7647_v16 = vrot.slane %v8656_v53, 7  ;;  %v1095_v36 = vrot.slane %v1080_v37, %v7267_v20  ;;  %v1102_v57 = vrot.slane %v7503_v47, %v7267_v20 }
 0x244   :  { %v2318_v21 = vpack.c.bf16 %v2246_v2, %v2246_v2  ;;  %8759 = vst [vmem:[#allocation44_spill] sm:$0xff] %v7643_v44  ;;  %v7650_v56 = vpack.c.bf16 %v2245_v45, %v2245_v45  ;;  %v7655_v55 = vrot.slane %v1081_v8, %v7267_v20  ;;  %v7659_v18 = vmax.f32 %v7260_v62, %v7348_v54 }
 0x245   :  { %8760 = vst [vmem:[#allocation45_spill] sm:$0xff] %v7647_v16  ;;  %v7661_v33 = vunpack.c.l.b16 %v2315_v3  ;;  %v7663_v39 = vunpack.c.l.b16 %v2316_v49  ;;  %v7669_v24 = vmax.f32 %v7258_v61, %v7416_v43  ;;  %v1110_v32 = vcombine.low %v1088_v12, %v1102_v57 }
 0x246   :  { %v7665_v59 = vunpack.c.l.b16 %v2318_v21  ;;  %v1111_v38 = vcombine.high %v1088_v12, %v1102_v57  ;;  %v1112_v47 = vcombine.low %v1095_v36, %v7655_v55  ;;  %v1113_v31 = vcombine.high %v1095_v36, %v7655_v55 }
 0x247   :  { %8761 = vst [vmem:[#allocation46_spill] sm:$0xff] %v7663_v39  ;;  %v5771_v17 = vcombine.low %v1102_v57, %v1102_v57  ;;  %v5772_v46 = vcombine.high %v1102_v57, %v1102_v57  ;;  %v5773_v62 = vcombine.low %v7655_v55, %v7655_v55  ;;  %v7677_v54 = vadd.f32 %v7278_v28, %v7555_v0 }
 0x248   :  { %v1412_v6 = vrot.slane %v1110_v32, %v7267_v20  ;;  %v1428_v61 = vrot.slane %v1111_v38, %v7267_v20  ;;  %v1444_v43 = vrot.slane %v1112_v47, %v7267_v20  ;;  %v7683_v9 = vrot.slane %v1113_v31, %v7267_v20 }
 0x249   :  { %v1419_v34 = vrot.slane %v5771_v17, %v7267_v20  ;;  %v1435_v45 = vrot.slane %v5772_v46, %v7267_v20  ;;  %v1451_v2 = vrot.slane %v5773_v62, %v7267_v20  ;;  %v5774_v3 = vcombine.high %v7655_v55, %v7655_v55 }
 0x24a   :  { %v1420_v0 = vcombine.high %v1412_v6, %v1412_v6  ;;  %v1436_v37 = vcombine.high %v1428_v61, %v1428_v61  ;;  %v1452_v49 = vcombine.high %v1444_v43, %v1444_v43  ;;  %v1468_v12 = vcombine.high %v7683_v9, %v7683_v9 }
 0x24b   :  { %v1942_v8 = vsel %vm250_vm6, %v1412_v6, -inf  ;;  %v1956_v21 = vsel %vm250_vm6, %v1419_v34, -inf  ;;  %v1963_v36 = vsel %vm250_vm6, %v1428_v61, -inf  ;;  %v1977_v57 = vsel %vm250_vm6, %v1435_v45, -inf }
 0x24c   :  { %v1943_v32 = vrot.slane %v1942_v8, 4  ;;  %v1949_v38 = vsel %vm250_vm6, %v1420_v0, -inf  ;;  %v1957_v47 = vrot.slane %v1956_v21, 4  ;;  %v1964_v31 = vrot.slane %v1963_v36, 4 }
 0x24d   :  { %v1950_v55 = vrot.slane %v1949_v38, 4  ;;  %v1970_v17 = vsel %vm250_vm6, %v1436_v37, -inf  ;;  %v1978_v46 = vrot.slane %v1977_v57, 4  ;;  %v1984_v62 = vsel %vm250_vm6, %v1444_v43, -inf }
 0x24e   :  { %v1944_v27 = vmax.f32 %v1942_v8, %v1943_v32  ;;  %v1958_v53 = vmax.f32 %v1956_v21, %v1957_v47  ;;  %v1965_v6 = vmax.f32 %v1963_v36, %v1964_v31  ;;  %v1971_v60 = vrot.slane %v1970_v17, 4 }
 0x24f   :  { %v1951_v34 = vmax.f32 %v1949_v38, %v1950_v55  ;;  %v1979_v35 = vmax.f32 %v1977_v57, %v1978_v46  ;;  %v1985_v61 = vrot.slane %v1984_v62, 4  ;;  %v1991_v45 = vsel %vm250_vm6, %v1452_v49, -inf }
 0x250   :  { %v1945_v10 = vrot.slane %v1944_v27, 2  ;;  %v1959_v14 = vrot.slane %v1958_v53, 2  ;;  %v1966_v0 = vrot.slane %v1965_v6, 2  ;;  %v1972_v25 = vmax.f32 %v1970_v17, %v1971_v60 }
 0x251   :  { %v1952_v39 = vrot.slane %v1951_v34, 2  ;;  %v1980_v44 = vrot.slane %v1979_v35, 2  ;;  %v1986_v16 = vmax.f32 %v1984_v62, %v1985_v61  ;;  %v1992_v37 = vrot.slane %v1991_v45, 4 }
 0x252   :  { %v1946_v22 = vmax.f32 %v1944_v27, %v1945_v10  ;;  %v1960_v63 = vmax.f32 %v1958_v53, %v1959_v14  ;;  %v1967_v43 = vmax.f32 %v1965_v6, %v1966_v0  ;;  %v1973_v8 = vrot.slane %v1972_v25, 2 }
 0x253   :  { %v1953_v21 = vmax.f32 %v1951_v34, %v1952_v39  ;;  %v1981_v36 = vmax.f32 %v1979_v35, %v1980_v44  ;;  %v1987_v32 = vrot.slane %v1986_v16, 2  ;;  %v1993_v38 = vmax.f32 %v1991_v45, %v1992_v37 }
 0x254   :  { %v1947_v57 = vrot.slane %v1946_v22, 1  ;;  %v1961_v47 = vrot.slane %v1960_v63, 1  ;;  %v1968_v31 = vrot.slane %v1967_v43, 1  ;;  %v1974_v49 = vmax.f32 %v1972_v25, %v1973_v8 }
 0x255   :  { %v1954_v55 = vrot.slane %v1953_v21, 1  ;;  %v1982_v46 = vrot.slane %v1981_v36, 1  ;;  %v1988_v23 = vmax.f32 %v1986_v16, %v1987_v32  ;;  %v1994_v60 = vrot.slane %v1993_v38, 2 }
 0x256   :  { %v1467_v17 = vrot.slane %v5774_v3, %v7267_v20  ;;  %v1948_v62 = vmax.f32 %v1946_v22, %v1947_v57  ;;  %v1962_v61 = vmax.f32 %v1960_v63, %v1961_v47  ;;  %v1975_v10 = vrot.slane %v1974_v49, 1 }
 0x257   :  { %v1955_v14 = vmax.f32 %v1953_v21, %v1954_v55  ;;  %v1969_v53 = vmax.f32 %v1967_v43, %v1968_v31  ;;  %v1989_v27 = vrot.slane %v1988_v23, 1  ;;  %v1995_v39 = vmax.f32 %v1993_v38, %v1994_v60 }
 0x258   :  { %v1976_v35 = vmax.f32 %v1974_v49, %v1975_v10  ;;  %v1998_v44 = vsel %vm250_vm6, %v1451_v2, -inf  ;;  %v2005_v6 = vsel %vm250_vm6, %v7683_v9, -inf  ;;  %v2012_v25 = vsel %vm250_vm6, %v1468_v12, -inf }
 0x259   :  { %v1983_v34 = vmax.f32 %v1981_v36, %v1982_v46  ;;  %v1990_v16 = vmax.f32 %v1988_v23, %v1989_v27  ;;  %v1999_v45 = vrot.slane %v1998_v44, 4  ;;  %v2006_v0 = vrot.slane %v2005_v6, 4 }
 0x25a   :  { %v1996_v3 = vrot.slane %v1995_v39, 1  ;;  %v2013_v22 = vrot.slane %v2012_v25, 4  ;;  %v2019_v63 = vsel %vm250_vm6, %v1467_v17, -inf  ;;  %v2175_v37 = vadd.f32 %v7291_v7, %v1948_v62 }
 0x25b   :  { %v2000_v43 = vmax.f32 %v1998_v44, %v1999_v45  ;;  %v2007_v8 = vmax.f32 %v2005_v6, %v2006_v0  ;;  %v2020_v21 = vrot.slane %v2019_v63, 4  ;;  %v2176_v2 = vadd.f32 %v7295_v58, %v1955_v14 }
 0x25c   :  { %v2014_v32 = vmax.f32 %v2012_v25, %v2013_v22  ;;  %v2177_v9 = vadd.f32 %v7278_v28, %v1962_v61  ;;  %v2178_v12 = vadd.f32 %v7291_v7, %v1969_v53  ;;  %v2179_v23 = vadd.f32 %v7295_v58, %v1976_v35 }
 0x25d   :  { %v2001_v36 = vrot.slane %v2000_v43, 2  ;;  %v2008_v38 = vrot.slane %v2007_v8, 2  ;;  %v2021_v57 = vmax.f32 %v2019_v63, %v2020_v21  ;;  %v2180_v47 = vadd.f32 %v7278_v28, %v1983_v34 }
 0x25e   :  { %v1997_v31 = vmax.f32 %v1995_v39, %v1996_v3  ;;  %v2015_v49 = vrot.slane %v2014_v32, 2  ;;  %v2181_v55 = vadd.f32 %v7291_v7, %v1990_v16  ;;  %v2247_v46 = vmax.f32 %v2175_v37, 0.0 }
 0x25f   :  { %v2002_v60 = vmax.f32 %v2000_v43, %v2001_v36  ;;  %v2009_v17 = vmax.f32 %v2007_v8, %v2008_v38  ;;  %v2022_v62 = vrot.slane %v2021_v57, 2  ;;  %v2248_v10 = vmax.f32 %v2176_v2, 0.0 }
 0x260   :  { %v2016_v14 = vmax.f32 %v2014_v32, %v2015_v49  ;;  %v2249_v61 = vmax.f32 %v2177_v9, 0.0  ;;  %v2250_v27 = vmax.f32 %v2178_v12, 0.0  ;;  %v2251_v53 = vmax.f32 %v2179_v23, 0.0 }
 0x261   :  { %v2003_v44 = vrot.slane %v2002_v60, 1  ;;  %v2010_v35 = vrot.slane %v2009_v17, 1  ;;  %v2023_v6 = vmax.f32 %v2021_v57, %v2022_v62  ;;  %v2252_v25 = vmax.f32 %v2180_v47, 0.0 }
 0x262   :  { %v2017_v45 = vrot.slane %v2016_v14, 1  ;;  %v2253_v0 = vmax.f32 %v2181_v55, 0.0  ;;  %v2319_v34 = vpack.c.bf16 %v2247_v46, %v2247_v46  ;;  %v2320_v39 = vpack.c.bf16 %v2248_v10, %v2248_v10 }
 0x263   :  { %v2004_v3 = vmax.f32 %v2002_v60, %v2003_v44  ;;  %v2011_v22 = vmax.f32 %v2009_v17, %v2010_v35  ;;  %v2024_v16 = vrot.slane %v2023_v6, 1  ;;  %v2321_v63 = vpack.c.bf16 %v2249_v61, %v2249_v61 }
 0x264   :  { %v7714_v37 = vadd.f32 %v7295_v58, %v1997_v31  ;;  %v2322_v43 = vpack.c.bf16 %v2250_v27, %v2250_v27  ;;  %v2323_v8 = vpack.c.bf16 %v2251_v53, %v2251_v53  ;;  %v2324_v12 = vpack.c.bf16 %v2252_v25, %v2252_v25 }
 0x265   :  { %v2025_v2 = vmax.f32 %v2023_v6, %v2024_v16  ;;  %v2183_v32 = vadd.f32 %v7278_v28, %v2004_v3  ;;  %v2184_v9 = vadd.f32 %v7291_v7, %v2011_v22  ;;  %v7719_v23 = vmax.f32 %v2016_v14, %v2017_v45 }
 0x266   :  { %v2325_v36 = vpack.c.bf16 %v2253_v0, %v2253_v0  ;;  %v7721_v38 = vunpack.c.l.b16 %v2319_v34  ;;  %v7723_v57 = vunpack.c.l.b16 %v2320_v39  ;;  %v7726_v55 = vunpack.c.l.b16 %v2321_v63 }
 0x267   :  { %v2186_v47 = vadd.f32 %v7278_v28, %v2025_v2  ;;  %v2255_v31 = vmax.f32 %v2183_v32, 0.0  ;;  %v2256_v49 = vmax.f32 %v2184_v9, 0.0  ;;  %v7728_v46 = vunpack.c.l.b16 %v2322_v43 }
 0x268   :  { %8762 = vst [vmem:[#allocation47_spill] sm:$0xff] %v7721_v38  ;;  %v7730_v60 = vunpack.c.l.b16 %v2323_v8  ;;  %v1114_v17 = vcombine.low %v7262_v13, %v7659_v18  ;;  %v1115_v62 = vcombine.high %v7262_v13, %v7659_v18  ;;  %v7736_v61 = vunpack.c.l.b16 %v2324_v12 }
 0x269   :  { %8763 = vst [vmem:[#allocation48_spill] sm:$0xff] %v7728_v46  ;;  %v2258_v10 = vmax.f32 %v2186_v47, 0.0  ;;  %v2327_v14 = vpack.c.bf16 %v2255_v31, %v2255_v31  ;;  %v1116_v27 = vcombine.high %v7669_v24, %v7669_v24  ;;  %v7740_v53 = vunpack.c.l.b16 %v2325_v36 }
 0x26a   :  { %8764 = vst [vmem:[#allocation49_spill] sm:$0xff] %v7736_v61  ;;  %v1123_v44 = vrot.slane %v1114_v17, %v7267_v20  ;;  %v1130_v35 = vrot.slane %v1115_v62, %v7267_v20  ;;  %v1137_v6 = vrot.slane %v7669_v24, %v7267_v20  ;;  %v2328_v25 = vpack.c.bf16 %v2256_v49, %v2256_v49 }
 0x26b   :  { %8765 = vst [vmem:[#allocation50_spill] sm:$0xff] %v7740_v53  ;;  %v7746_v45 = vpack.c.bf16 %v2258_v10, %v2258_v10  ;;  %v1144_v13 = vrot.slane %v1116_v27, %v7267_v20  ;;  %v7750_v22 = vunpack.c.l.b16 %v2327_v14 }
 0x26c   :  { %v1145_v0 = vcombine.low %v1123_v44, %v1137_v6  ;;  %v1146_v34 = vcombine.high %v1123_v44, %v1137_v6  ;;  %v5775_v39 = vcombine.low %v1137_v6, %v1137_v6  ;;  %v5776_v3 = vcombine.high %v1137_v6, %v1137_v6 }
 0x26d   :  { %8766 = vst [vmem:[#allocation51_spill] sm:$0xff] %v7750_v22  ;;  %v1147_v16 = vcombine.low %v1130_v35, %v1144_v13  ;;  %v1148_v63 = vcombine.high %v1130_v35, %v1144_v13  ;;  %v5777_v43 = vcombine.low %v1144_v13, %v1144_v13  ;;  %v7756_v9 = vunpack.c.l.b16 %v2328_v25 }
 0x26e   :  { %v1476_v8 = vrot.slane %v1145_v0, %v7267_v20  ;;  %v1483_v24 = vrot.slane %v5775_v39, %v7267_v20  ;;  %v1492_v2 = vrot.slane %v1146_v34, %v7267_v20  ;;  %v1499_v32 = vrot.slane %v5776_v3, %v7267_v20 }
 0x26f   :  { %8767 = vst [vmem:[#allocation52_spill] sm:$0xff] %v7756_v9  ;;  %v1508_v12 = vrot.slane %v1147_v16, %v7267_v20  ;;  %v1515_v36 = vrot.slane %v5777_v43, %v7267_v20  ;;  %v5778_v47 = vcombine.high %v1144_v13, %v1144_v13  ;;  %v7763_v14 = vrot.slane %v1148_v63, %v7267_v20 }
 0x270   :  { %v1484_v31 = vcombine.high %v1476_v8, %v1476_v8  ;;  %v1500_v49 = vcombine.high %v1492_v2, %v1492_v2  ;;  %v2026_v17 = vsel %vm250_vm6, %v1476_v8, -inf  ;;  %v2040_v62 = vsel %vm250_vm6, %v1483_v24, -inf }
 0x271   :  { %v1516_v10 = vcombine.high %v1508_v12, %v1508_v12  ;;  %8768 = vst [vmem:[#allocation53_spill] sm:$0xff] %v7763_v14  ;;  %v2027_v27 = vrot.slane %v2026_v17, 4  ;;  %v2041_v44 = vrot.slane %v2040_v62, 4  ;;  %v2047_v6 = vsel %vm250_vm6, %v1492_v2, -inf }
 0x272   :  { %v2033_v35 = vsel %vm250_vm6, %v1484_v31, -inf  ;;  %v2054_v25 = vsel %vm250_vm6, %v1500_v49, -inf  ;;  %v2061_v13 = vsel %vm250_vm6, %v1499_v32, -inf  ;;  %v2048_v3 = vrot.slane %v2047_v6, 4 }
 0x273   :  { %v2028_v0 = vmax.f32 %v2026_v17, %v2027_v27  ;;  %v2034_v34 = vrot.slane %v2033_v35, 4  ;;  %v2042_v39 = vmax.f32 %v2040_v62, %v2041_v44  ;;  %v2055_v16 = vrot.slane %v2054_v25, 4 }
 0x274   :  { %v2062_v43 = vrot.slane %v2061_v13, 4  ;;  %v2068_v8 = vsel %vm250_vm6, %v1508_v12, -inf  ;;  %v2075_v63 = vsel %vm250_vm6, %v1516_v10, -inf  ;;  %v2049_v31 = vmax.f32 %v2047_v6, %v2048_v3 }
 0x275   :  { %v2029_v24 = vrot.slane %v2028_v0, 2  ;;  %v2035_v21 = vmax.f32 %v2033_v35, %v2034_v34  ;;  %v2043_v18 = vrot.slane %v2042_v39, 2  ;;  %v7771_v7 = vmax.f32 %v2054_v25, %v2055_v16 }
 0x276   :  { %v2063_v2 = vmax.f32 %v2061_v13, %v2062_v43  ;;  %v2069_v49 = vrot.slane %v2068_v8, 4  ;;  %v2076_v9 = vrot.slane %v2075_v63, 4  ;;  %v2050_v62 = vrot.slane %v2049_v31, 2 }
 0x277   :  { %v2030_v32 = vmax.f32 %v2028_v0, %v2029_v24  ;;  %v2036_v17 = vrot.slane %v2035_v21, 2  ;;  %v2044_v27 = vmax.f32 %v2042_v39, %v2043_v18  ;;  %v1531_v44 = vrot.slane %v5778_v47, %v7267_v20 }
 0x278   :  { %v2064_v53 = vrot.slane %v2063_v2, 2  ;;  %v2051_v6 = vmax.f32 %v2049_v31, %v2050_v62  ;;  %v7777_v25 = vmax.f32 %v2075_v63, %v2076_v9  ;;  %v2082_v0 = vsel %vm250_vm6, %v1515_v36, -inf }
 0x279   :  { %v2037_v35 = vmax.f32 %v2035_v21, %v2036_v17  ;;  %v2045_v34 = vrot.slane %v2044_v27, 1  ;;  %v2031_v13 = vrot.slane %v2030_v32, 1  ;;  %v2089_v18 = vsel %vm250_vm6, %v7763_v14, -inf }
 0x27a   :  { %8769 = vst [vmem:[#allocation54_spill] sm:$0xff] %v7777_v25  ;;  %v2065_v3 = vmax.f32 %v2063_v2, %v2064_v53  ;;  %v2052_v16 = vrot.slane %v2051_v6, 1  ;;  %v7782_v43 = vmax.f32 %v2068_v8, %v2069_v49  ;;  %v2083_v12 = vrot.slane %v2082_v0, 4 }
 0x27b   :  { %v2038_v39 = vrot.slane %v2037_v35, 1  ;;  %v2046_v47 = vmax.f32 %v2044_v27, %v2045_v34  ;;  %v2090_v10 = vrot.slane %v2089_v18, 4  ;;  %v2103_v21 = vsel %vm250_vm6, %v1531_v44, -inf }
 0x27c   :  { %8770 = vst [vmem:[#allocation55_spill] sm:$0xff] %v7782_v43  ;;  %v2066_v24 = vrot.slane %v2065_v3, 1  ;;  %v2104_v63 = vrot.slane %v2103_v21, 4  ;;  %v7787_v36 = vmax.f32 %v2030_v32, %v2031_v13  ;;  %v7789_v2 = vmax.f32 %v2051_v6, %v2052_v16 }
 0x27d   :  { %v2039_v31 = vmax.f32 %v2037_v35, %v2038_v39  ;;  %v2189_v53 = vadd.f32 %v7278_v28, %v2046_v47  ;;  %v7793_v27 = vmax.f32 %v2082_v0, %v2083_v12  ;;  %v7795_v8 = vmax.f32 %v2089_v18, %v2090_v10 }
 0x27e   :  { %8771 = vst [vmem:[#allocation56_spill] sm:$0xff] %v7789_v2  ;;  %v7791_v17 = vmax.f32 %v2065_v3, %v2066_v24  ;;  %v8775_v44 = vmax.f32 %v7677_v54, 0.0  ;;  %v7801_v34 = vmax.f32 %v2103_v21, %v2104_v63  ;;  %v7804_v32 = vunpack.c.l.b16 %v7485_v40 }
 0x27f   :  { %8773 = vst [vmem:[#allocation58_spill] sm:$0xff] %v7793_v27  ;;  %8774 = vst [vmem:[#allocation59_spill] sm:$0xff] %v7795_v8  ;;  %v2188_v49 = vadd.f32 %v7295_v58, %v2039_v31  ;;  %v2261_v62 = vmax.f32 %v2189_v53, 0.0  ;;  %v2420_v6 = vunpack.c.l.b16 %v7629_v11  ;;  %v7808_v13 = vunpack.c.l.b16 %v7746_v45  ;;  %v8798_v8 = vld [vmem:[#allocation29_spill] sm:$0xff] }
 0x280   :  { %8772 = vst [vmem:[#allocation57_spill] sm:$0xff] %v7791_v17  ;;  %v2297_v35 = vpack.c.bf16 %v8775_v44, %v8775_v44  ;;  %8776 = vst [vmem:[#allocation60_spill] sm:$0xff] %v7801_v34  ;;  %v8778_v3 = vunpack.c.l.b16 %v7372_v15  ;;  %v2576_v18 = vrot.slane %v7396_v50, 7  ;;  %v2578_v39 = vrot.slane %v7443_v4, 6 }
 0x281   :  { %8777 = vst [vmem:[#allocation61_spill] sm:$0xff] %v7808_v13  ;;  %v2260_v12 = vmax.f32 %v2188_v49, 0.0  ;;  %v2333_v10 = vpack.c.bf16 %v2261_v62, %v2261_v62  ;;  %v7814_v40 = vrot.slane %v2420_v6, 7  ;;  %v2580_v16 = vrot.slane %v7457_v52, 5 }
 0x282   :  { %v7812_v0 = vrot.slane %v8778_v3, 7  ;;  %v7816_v11 = vunpack.c.l.b16 %v2297_v35  ;;  %v2582_v24 = vrot.slane %v7469_v26, 4  ;;  %v2584_v21 = vrot.slane %v7482_v42, 3 }
 0x283   :  { %v2332_v54 = vpack.c.bf16 %v2260_v12, %v2260_v12  ;;  %v7818_v45 = vunpack.c.l.b16 %v2333_v10  ;;  %v8782_v31 = vmov %v8778_v3  ;;  %v2586_v53 = vrot.slane %v7804_v32, 2 }
 0x284   :  { %8779 = vst [vmem:[#allocation62_spill] sm:$0xff] %v7816_v11  ;;  %v2577_v63 = vsel %vm2440_vm2, %v2576_v18, %v8782_v31  ;;  %v2588_v49 = vrot.slane %v7816_v11, 1  ;;  %v2618_v62 = vrot.slane %v7661_v33, 7  ;;  %v2620_v35 = vrot.slane %v7665_v59, 6 }
 0x285   :  { %8780 = vst [vmem:[#allocation63_spill] sm:$0xff] %v7818_v45  ;;  %v7822_v47 = vunpack.c.l.b16 %v2332_v54  ;;  %v2579_v44 = vsel %vm2443_vm3, %v2578_v39, %v2577_v63  ;;  %v2622_v12 = vrot.slane %v7726_v55, 5  ;;  %v2624_v10 = vrot.slane %v7736_v61, 4 }
 0x286   :  { %v2581_v54 = vsel %vm2446_vm4, %v2580_v16, %v2579_v44  ;;  %v2619_v15 = vsel %vm2440_vm2, %v2618_v62, %v2420_v6  ;;  %v2626_v3 = vrot.slane %v7750_v22, 3  ;;  %v2628_v18 = vrot.slane %v7808_v13, 2  ;;  %v6397_v22 = vld [vmem:[#allocation5 + $0x100] ss:$8 sps:$4 sm:$0xff]  }
 0x287   :  { %8781 = vst [vmem:[#allocation64_spill] sm:$0xff] %v7822_v47  ;;  %v2583_v31 = vsel %vm2449_vm5, %v2582_v24, %v2581_v54  ;;  %v2621_v9 = vsel %vm2443_vm3, %v2620_v35, %v2619_v15  ;;  %v2630_v39 = vrot.slane %v7818_v45, 1  ;;  %v2149_v63 = vadd.f32 %v7295_v58, %v7450_v41 }
 0x288   :  { %v2585_v20 = vsel %vm2452_vm7, %v2584_v21, %v2583_v31  ;;  %v2623_v14 = vsel %vm2446_vm4, %v2622_v12, %v2621_v9  ;;  %v2185_v6 = vadd.f32 %v7295_v58, %v7719_v23  ;;  %v2200_v16 = vmax.f32 %v7360_v19, 0.0 }
 0x289   :  { %v2587_v62 = vsel %vm2455_vm8, %v2586_v53, %v2585_v20  ;;  %v2625_v24 = vsel %vm2449_vm5, %v2624_v10, %v2623_v14  ;;  %v2218_v44 = vmax.f32 %v7447_v30, 0.0  ;;  %v2221_v35 = vmax.f32 %v2149_v63, 0.0 }
 0x28a   :  { %v2589_v54 = vsel %vm2458_vm9, %v2588_v49, %v2587_v62  ;;  %v2627_v41 = vsel %vm2452_vm7, %v2626_v3, %v2625_v24  ;;  %v2236_v21 = vmax.f32 %v7616_v1, 0.0  ;;  %v2254_v9 = vmax.f32 %v7714_v37, 0.0 }
 0x28b   :  { %v2629_v12 = vsel %vm2455_vm8, %v2628_v18, %v2627_v41  ;;  %v2257_v23 = vmax.f32 %v2185_v6, 0.0  ;;  %v2272_v15 = vpack.c.bf16 %v2200_v16, %v2200_v16  ;;  %v8783_v19 = vmax.f32 %v7357_v51, 0.0  ;;  %v8785_v51 = vld [vmem:[#allocation21_spill] sm:$0xff] }
 0x28c   :  { %v2631_v14 = vsel %vm2458_vm9, %v2630_v39, %v2629_v12  ;;  %v2290_v30 = vpack.c.bf16 %v2218_v44, %v2218_v44  ;;  %v2293_v53 = vpack.c.bf16 %v2221_v35, %v2221_v35  ;;  %v2308_v10 = vpack.c.bf16 %v2236_v21, %v2236_v21 }
 0x28d   :  { %v2278_v20 = vpack.c.bf16 %v8783_v19, %v8783_v19  ;;  %v2634_v49 = vpack.c.b16 %v2631_v14, %v2589_v54  ;;  %v8784_v3 = vmax.f32 %v7613_v29, 0.0  ;;  %v2326_v31 = vpack.c.bf16 %v2254_v9, %v2254_v9  ;;  %v8789_v19 = vld [vmem:[#allocation27_spill] sm:$0xff] }
 0x28e   :  { %v2329_v37 = vpack.c.bf16 %v2257_v23, %v2257_v23  ;;  %v2392_v63 = vunpack.c.l.b16 %v2272_v15  ;;  %v8673_v18 = vunpack.c.l.b16 %v7370_v5  ;;  %v7870_v16 = vunpack.c.l.b16 %v8785_v51  ;;  %v8788_v23 = vld [vmem:[#allocation24_spill] sm:$0xff] }
 0x28f   :  { %v2314_v1 = vpack.c.bf16 %v8784_v3, %v8784_v3  ;;  %v7867_v6 = vunpack.c.l.b16 %v2278_v20  ;;  %4502 = vmatprep.mubr.bf16.mxu1 %v2634_v49  ;;  %v7872_v39 = vunpack.c.l.b16 %v2290_v30  ;;  %v7874_v62 = vunpack.c.l.b16 %v2293_v53 }
 0x290   :  { %v2416_v24 = vunpack.c.l.b16 %v2308_v10  ;;  %v8674_v29 = vunpack.c.l.b16 %v7627_v48  ;;  %v7880_v35 = vunpack.c.l.b16 %v7650_v56  ;;  %v7882_v54 = vunpack.c.l.b16 %v2326_v31 }
 0x291   :  { %8786 = vst [vmem:[#allocation21_spill] sm:$0xff] %v7872_v39  ;;  %v7877_v44 = vunpack.c.l.b16 %v2314_v1  ;;  %v7884_v41 = vunpack.c.l.b16 %v2329_v37  ;;  %v2460_v21 = vrot.slane %v8673_v18, 7  ;;  %v2462_v9 = vrot.slane %v7867_v6, 6 }
 0x292   :  { %v2464_v12 = vrot.slane %v7870_v16, 5  ;;  %v2466_v15 = vrot.slane %v8788_v23, 4  ;;  %v2468_v20 = vrot.slane %v8789_v19, 3  ;;  %v2470_v14 = vrot.slane %v7872_v39, 2 }
 0x293   :  { %8787 = vst [vmem:[#allocation65_spill] sm:$0xff] %v7884_v41  ;;  %v2472_v56 = vrot.slane %v7874_v62, 1  ;;  %v2502_v30 = vrot.slane %v8674_v29, 7  ;;  %v2461_v53 = vsel %vm2440_vm2, %v2460_v21, %v2392_v63  ;;  %v2504_v10 = vrot.slane %v7877_v44, 6 }
 0x294   :  { %v2506_v49 = vrot.slane %v7880_v35, 5  ;;  %v2508_v3 = vrot.slane %v7723_v57, 4  ;;  %v2463_v1 = vsel %vm2443_vm3, %v2462_v9, %v2461_v53  ;;  %v2510_v37 = vrot.slane %v7730_v60, 3  ;;  %v8790_v53 = vld [vmem:[#allocation16_spill] sm:$0xff] }
 0x295   :  { %v2503_v31 = vsel %vm2440_vm2, %v2502_v30, %v2416_v24  ;;  %v2512_v51 = vrot.slane %v7882_v54, 2  ;;  %v2465_v18 = vsel %vm2446_vm4, %v2464_v12, %v2463_v1  ;;  %v2514_v63 = vrot.slane %v7884_v41, 1  ;;  %v8792_v30 = vld [vmem:[#allocation20_spill] sm:$0xff] }
 0x296   :  { %v2505_v29 = vsel %vm2443_vm3, %v2504_v10, %v2503_v31  ;;  %v2562_v21 = vrot.slane %v7867_v6, 7  ;;  %v2467_v25 = vsel %vm2449_vm5, %v2466_v15, %v2465_v18  ;;  %v2604_v9 = vrot.slane %v7877_v44, 7  ;;  %v8793_v10 = vld [vmem:[#allocation19_spill] sm:$0xff]  ;;  %v8794_v31 = vld [vmem:[#allocation22_spill] sm:$0xff] }
 0x297   :  { %v2507_v27 = vsel %vm2446_vm4, %v2506_v49, %v2505_v29  ;;  %v8791_v24 = vunpack.c.l.b16 %v8790_v53  ;;  %v2469_v11 = vsel %vm2452_vm7, %v2468_v20, %v2467_v25  ;;  %v2442_v1 = vrot.slane %v8793_v10, 6  ;;  %v8795_v29 = vld [vmem:[#allocation23_spill] sm:$0xff]  ;;  %v8796_v49 = vld [vmem:[#allocation26_spill] sm:$0xff]  ;;  %v8797_v20 = vld [vmem:[#allocation28_spill] sm:$0xff] }
 0x298   :  { %v2509_v12 = vsel %vm2449_vm5, %v2508_v3, %v2507_v27  ;;  %v2445_v34 = vrot.slane %v8794_v31, 5  ;;  %v2471_v17 = vsel %vm2455_vm8, %v2470_v14, %v2469_v11  ;;  %v2448_v15 = vrot.slane %v8795_v29, 4  ;;  %v8799_v14 = vld [vmem:[#allocation41_spill] sm:$0xff] }
 0x299   :  { %v2441_v45 = vsel %vm2440_vm2, %v8792_v30, %v8791_v24  ;;  %v2511_v18 = vsel %vm2452_vm7, %v2510_v37, %v2509_v12  ;;  %v2451_v28 = vrot.slane %v8796_v49, 3  ;;  %v2473_v53 = vsel %vm2458_vm9, %v2472_v56, %v2471_v17  ;;  %v8801_v12 = vld [vmem:[#allocation45_spill] sm:$0xff]  ;;  %v8802_v56 = vld [vmem:[#allocation44_spill] sm:$0xff] }
 0x29a   :  { %v2513_v24 = vsel %vm2455_vm8, %v2512_v51, %v2511_v18  ;;  %v2444_v25 = vsel %vm2443_vm3, %v2442_v1, %v2441_v45  ;;  %v2454_v27 = vrot.slane %v8797_v20, 2  ;;  %v2457_v11 = vrot.slane %v8798_v8, 1  ;;  %v8803_v18 = vld [vmem:[#allocation46_spill] sm:$0xff] }
 0x29b   :  { %v2515_v3 = vsel %vm2458_vm9, %v2514_v63, %v2513_v24  ;;  %v2447_v30 = vsel %vm2446_vm4, %v2445_v34, %v2444_v25  ;;  %v8800_v37 = vunpack.c.l.b16 %v8799_v14  ;;  %v2490_v51 = vrot.slane %v8802_v56, 6  ;;  %v8804_v24 = vld [vmem:[#allocation50_spill] sm:$0xff] }
 0x29c   :  { %v2531_v2 = vpack.c.b16 %v2515_v3, %v2473_v53  ;;  %v2450_v17 = vsel %vm2449_vm5, %v2448_v15, %v2447_v30  ;;  %v2492_v45 = vrot.slane %v8803_v18, 5  ;;  %v2494_v63 = vrot.slane %v7721_v38, 4  ;;  %v8805_v53 = vld [vmem:[#allocation52_spill] sm:$0xff] }
 0x29d   :  { %v2489_v43 = vsel %vm2440_vm2, %v8801_v12, %v8800_v37  ;;  %v2453_v1 = vsel %vm2452_vm7, %v2451_v28, %v2450_v17  ;;  %v2496_v34 = vrot.slane %v7728_v46, 3  ;;  %v2498_v25 = vrot.slane %v8804_v24, 2 }
 0x29e   :  { %4416 = vmatprep.mubr.bf16.mxu0 %v2531_v2  ;;  %v2456_v14 = vsel %vm2455_vm8, %v2454_v27, %v2453_v1  ;;  %v2491_v37 = vsel %vm2443_vm3, %v2490_v51, %v2489_v43  ;;  %v2500_v3 = vrot.slane %v8805_v53, 1  ;;  %v8806_v15 = vunpack.c.l.b16 %v7370_v5  ;;  %v8807_v1 = vld [vmem:[#allocation40_spill] sm:$0xff] }
 0x29f   :  { %v2459_v12 = vsel %vm2458_vm9, %v2457_v11, %v2456_v14  ;;  %v2493_v28 = vsel %vm2446_vm4, %v2492_v45, %v2491_v37  ;;  %v2564_v17 = vrot.slane %v7870_v16, 6  ;;  %v2566_v13 = vrot.slane %v8788_v23, 5 }
 0x2a0   :  { %v2563_v30 = vsel %vm2440_vm2, %v2562_v21, %v8806_v15  ;;  %v2495_v2 = vsel %vm2449_vm5, %v2494_v63, %v2493_v28  ;;  %v2568_v27 = vrot.slane %v8789_v19, 4  ;;  %v2570_v43 = vrot.slane %v7872_v39, 3 }
 0x2a1   :  { %v2572_v51 = vrot.slane %v7874_v62, 2  ;;  %v2497_v5 = vsel %vm2452_vm7, %v2496_v34, %v2495_v2  ;;  %v2565_v21 = vsel %vm2443_vm3, %v2564_v17, %v2563_v30  ;;  %v2574_v11 = vrot.slane %v8807_v1, 1  ;;  %v6405_v2 = vld [vmem:[#allocation5 + $0x114] ss:$8 sps:$4 sm:$0xff]  }
 0x2a2   :  { %v8808_v45 = vunpack.c.l.b16 %v7627_v48  ;;  %v2499_v37 = vsel %vm2455_vm8, %v2498_v25, %v2497_v5  ;;  %v2567_v63 = vsel %vm2446_vm4, %v2566_v13, %v2565_v21  ;;  %v2606_v15 = vrot.slane %v7880_v35, 6 }
 0x2a3   :  { %v2608_v28 = vrot.slane %v7723_v57, 5  ;;  %v2501_v61 = vsel %vm2458_vm9, %v2500_v3, %v2499_v37  ;;  %v2569_v34 = vsel %vm2449_vm5, %v2568_v27, %v2567_v63  ;;  %v2610_v30 = vrot.slane %v7730_v60, 4  ;;  %v8810_v27 = vld [vmem:[#allocation15_spill] sm:$0xff] }
 0x2a4   :  { %v2605_v14 = vsel %vm2440_vm2, %v2604_v9, %v8808_v45  ;;  %v2612_v17 = vrot.slane %v7882_v54, 3  ;;  %v2530_v48 = vpack.c.b16 %v2501_v61, %v2459_v12  ;;  %v2571_v9 = vsel %vm2452_vm7, %v2570_v43, %v2569_v34  ;;  %v8809_v45 = vld [vmem:[#allocation34_spill] sm:$0xff] }
 0x2a5   :  { %v2607_v25 = vsel %vm2443_vm3, %v2606_v15, %v2605_v14  ;;  %v2614_v13 = vrot.slane %v7884_v41, 2  ;;  %v2573_v5 = vsel %vm2455_vm8, %v2572_v51, %v2571_v9  ;;  %v2616_v3 = vrot.slane %v7822_v47, 1  ;;  %v6403_v34 = vld [vmem:[#allocation5 + $0x110] ss:$8 sps:$4 sm:$0xff]  }
 0x2a6   :  { %v2609_v21 = vsel %vm2446_vm4, %v2608_v28, %v2607_v25  ;;  %v2151_v37 = vadd.f32 %v8810_v27, %v8809_v45  ;;  %4417 = vmatmul.mubr.bf16.vlgmr.msra.gmra.mrb[24].mxu0 %v2530_v48  ;;  %v2575_v63 = vsel %vm2458_vm9, %v2574_v11, %v2573_v5  ;;  %v2187_v12 = vadd.f32 %v8810_v27, %v7787_v36  ;;  %v8811_v11 = vld [vmem:[#allocation17_spill] sm:$0xff] }
 0x2a7   :  { %v2611_v61 = vsel %vm2449_vm5, %v2610_v30, %v2609_v21  ;;  %v2548_v43 = vrot.slane %v8793_v10, 7  ;;  %4428 = vmatpush1.bf16.msra.mxu0 %v6397_v22  ;;  %v2550_v15 = vrot.slane %v8794_v31, 6  ;;  %v2552_v28 = vrot.slane %v8795_v29, 5  ;;  %v6411_v5 = vld [vmem:[#allocation5 + $0x124] ss:$8 sps:$4 sm:$0xff]  }
 0x2a8   :  { %v2613_v51 = vsel %vm2452_vm7, %v2612_v17, %v2611_v61  ;;  %v2223_v14 = vmax.f32 %v2151_v37, 0.0  ;;  %v2259_v9 = vmax.f32 %v2187_v12, 0.0  ;;  %v8812_v25 = vunpack.c.l.b16 %v8811_v11  ;;  %4429 = vmatprep.subr.bf16.mxu0 %v6405_v2  ;;  %v6400_v22 = vld [vmem:[#allocation5 + $0x300] ss:$8 sps:$4 sm:$0xff]  }
 0x2a9   :  { %v2615_v48 = vsel %vm2455_vm8, %v2614_v13, %v2613_v51  ;;  %v2554_v36 = vrot.slane %v8796_v49, 4  ;;  %v2556_v37 = vrot.slane %v8797_v20, 3  ;;  %v2558_v12 = vrot.slane %v8798_v8, 2  ;;  %v6408_v51 = vld [vmem:[#allocation5 + $0x314] ss:$8 sps:$4 sm:$0xff]  }
 0x2aa   :  { %v2549_v30 = vsel %vm2440_vm2, %v2548_v43, %v8812_v25  ;;  %v2617_v17 = vsel %vm2458_vm9, %v2616_v3, %v2615_v48  ;;  %v2295_v21 = vpack.c.bf16 %v2223_v14, %v2223_v14  ;;  %v2331_v10 = vpack.c.bf16 %v2259_v9, %v2259_v9  ;;  %v6409_v14 = vld [vmem:[#allocation5 + $0x120] ss:$8 sps:$4 sm:$0xff]   ;;  %v6417_v9 = vld [vmem:[#allocation5 + $0x134] ss:$8 sps:$4 sm:$0xff]  }
 0x2ab   :  { %v2551_v45 = vsel %vm2443_vm3, %v2550_v15, %v2549_v30  ;;  %v2633_v61 = vpack.c.b16 %v2617_v17, %v2575_v63  ;;  %v2590_v11 = vrot.slane %v8802_v56, 7  ;;  %v2592_v3 = vrot.slane %v8803_v18, 6  ;;  %4430 = vmatpush1.bf16.msra.mxu0 %v6403_v34 }
 0x2ac   :  { %v2553_v13 = vsel %vm2446_vm4, %v2552_v28, %v2551_v45  ;;  %v7995_v43 = vunpack.c.l.b16 %v2295_v21  ;;  %v8000_v15 = vunpack.c.l.b16 %v2331_v10  ;;  %v2594_v28 = vrot.slane %v7721_v38, 5  ;;  %4431 = vmatprep.subr.bf16.mxu0 %v6411_v5  ;;  %v6406_v21 = vld [vmem:[#allocation5 + $0x310] ss:$8 sps:$4 sm:$0xff]  }
 0x2ad   :  { %v2555_v2 = vsel %vm2449_vm5, %v2554_v36, %v2553_v13  ;;  %4503 = vmatmul.mubr.bf16.vlgmr.msra.gmra.mrb[12].mxu1 %v2633_v61  ;;  %v2596_v48 = vrot.slane %v7728_v46, 4  ;;  %v8815_v36 = vld [vmem:[#allocation42_spill] sm:$0xff]  ;;  %v2598_v10 = vrot.slane %v8804_v24, 3  ;;  %v8817_v5 = vld [vmem:[#allocation31_spill] sm:$0xff] }
 0x2ae   :  { %8813 = vst [vmem:[#allocation24_spill] sm:$0xff] %v7995_v43  ;;  %8814 = vst [vmem:[#allocation27_spill] sm:$0xff] %v8000_v15  ;;  %v2557_v63 = vsel %vm2452_vm7, %v2556_v37, %v2555_v2  ;;  %4514 = vmatpush1.bf16.msra.mxu1 %v6400_v22  ;;  %v2560_v30 = vrot.slane %v7995_v43, 1  ;;  %v8816_v17 = vunpack.c.l.b16 %v8815_v36  ;;  %v2600_v37 = vrot.slane %v8805_v53, 2 }
 0x2af   :  { %v2559_v25 = vsel %vm2455_vm8, %v2558_v12, %v2557_v63  ;;  %v2602_v61 = vrot.slane %v8000_v15, 1  ;;  %v8818_v13 = vrot.slane %v8817_v5, 2  ;;  %4515 = vmatprep.subr.bf16.mxu1 %v6408_v51  ;;  %v6414_v12 = vld [vmem:[#allocation5 + $0x324] ss:$8 sps:$4 sm:$0xff]   ;;  %4432 = vmatpush1.bf16.msra.mxu0 %v6409_v14  ;;  %v2666_v53 = vrot.slane %v8788_v23, 6 }
 0x2b0   :  { %v2591_v34 = vsel %vm2440_vm2, %v2590_v11, %v8816_v17  ;;  %v2561_v2 = vsel %vm2458_vm9, %v2560_v30, %v2559_v25  ;;  %v8819_v11 = vrot.slane %v7771_v7, 2  ;;  %v6415_v17 = vld [vmem:[#allocation5 + $0x130] ss:$8 sps:$4 sm:$0xff]   ;;  %v2668_v51 = vrot.slane %v8789_v19, 5  ;;  %4433 = vmatprep.subr.bf16.mxu0 %v6417_v9  ;;  %v6412_v14 = vld [vmem:[#allocation5 + $0x320] ss:$8 sps:$4 sm:$0xff]  }
 0x2b1   :  { %v2593_v45 = vsel %vm2443_vm3, %v2592_v3, %v2591_v34  ;;  %v1806_v22 = vmax.f32 %v8817_v5, %v8818_v13  ;;  %v2664_v3 = vrot.slane %v7870_v16, 7  ;;  %v6423_v5 = vld [vmem:[#allocation5 + $0x144] ss:$8 sps:$4 sm:$0xff]   ;;  %v6420_v9 = vld [vmem:[#allocation5 + $0x334] ss:$8 sps:$4 sm:$0xff]  }
 0x2b2   :  { %v2595_v63 = vsel %vm2446_vm4, %v2594_v28, %v2593_v45  ;;  %v2058_v36 = vmax.f32 %v7771_v7, %v8819_v11  ;;  %v2670_v7 = vrot.slane %v7872_v39, 4  ;;  %4516 = vmatpush1.bf16.msra.mxu1 %v6406_v21 }
 0x2b3   :  { %v2597_v34 = vsel %vm2449_vm5, %v2596_v48, %v2595_v63  ;;  %v1807_v15 = vrot.slane %v1806_v22, 1  ;;  %v2665_v30 = vsel %vm2440_vm2, %v2664_v3, %v7867_v6  ;;  %v2672_v63 = vrot.slane %v7874_v62, 3  ;;  %4517 = vmatprep.subr.bf16.mxu1 %v6414_v12  ;;  %4434 = vmatpush1.bf16.msra.mxu0 %v6415_v17  ;;  %v6421_v3 = vld [vmem:[#allocation5 + $0x140] ss:$8 sps:$4 sm:$0xff]   ;;  %v6418_v17 = vld [vmem:[#allocation5 + $0x330] ss:$8 sps:$4 sm:$0xff]  }
 0x2b4   :  { %v2599_v25 = vsel %vm2452_vm7, %v2598_v10, %v2597_v34  ;;  %v2059_v28 = vrot.slane %v2058_v36, 1  ;;  %v2667_v13 = vsel %vm2443_vm3, %v2666_v53, %v2665_v30  ;;  %v2674_v6 = vrot.slane %v8807_v1, 2  ;;  %4435 = vmatprep.subr.bf16.mxu0 %v6423_v5 }
 0x2b5   :  { %v2601_v45 = vsel %vm2455_vm8, %v2600_v37, %v2599_v25  ;;  %v1808_v48 = vmax.f32 %v1806_v22, %v1807_v15  ;;  %v2669_v34 = vsel %vm2446_vm4, %v2668_v51, %v2667_v13  ;;  %v2706_v53 = vrot.slane %v7880_v35, 7  ;;  %v6429_v37 = vld [vmem:[#allocation5 + $0x154] ss:$8 sps:$4 sm:$0xff]  }
 0x2b6   :  { %v2603_v11 = vsel %vm2458_vm9, %v2602_v61, %v2601_v45  ;;  %v2060_v10 = vmax.f32 %v2058_v36, %v2059_v28  ;;  %v2671_v15 = vsel %vm2449_vm5, %v2670_v7, %v2669_v34  ;;  %v2708_v12 = vrot.slane %v7723_v57, 6  ;;  %4518 = vmatpush1.bf16.msra.mxu1 %v6412_v14  ;;  %v6426_v28 = vld [vmem:[#allocation5 + $0x344] ss:$8 sps:$4 sm:$0xff]   ;;  %v6427_v14 = vld [vmem:[#allocation5 + $0x150] ss:$8 sps:$4 sm:$0xff]  }
 0x2b7   :  { %v2632_v21 = vpack.c.b16 %v2603_v11, %v2561_v2  ;;  %v2155_v39 = vadd.f32 %v7295_v58, %v1808_v48  ;;  %v2673_v61 = vsel %vm2452_vm7, %v2672_v63, %v2671_v15  ;;  %v2710_v36 = vrot.slane %v7730_v60, 5  ;;  %4519 = vmatprep.subr.bf16.mxu1 %v6420_v9  ;;  %4436 = vmatpush1.bf16.msra.mxu0 %v6421_v3  ;;  %v6435_v63 = vld [vmem:[#allocation5 + $0x164] ss:$8 sps:$4 sm:$0xff]   ;;  %v8820_v11 = vld [vmem:[#allocation18_spill] sm:$0xff] }
 0x2b8   :  { %v2191_v22 = vadd.f32 %v7295_v58, %v2060_v10  ;;  %v2675_v51 = vsel %vm2455_vm8, %v2674_v6, %v2673_v61  ;;  %v2707_v25 = vsel %vm2440_vm2, %v2706_v53, %v7877_v44  ;;  %v2712_v5 = vrot.slane %v7882_v54, 4  ;;  %4437 = vmatprep.subr.bf16.mxu0 %v6429_v37 }
 0x2b9   :  { %4459 = vmatprep.mubr.bf16.mxu0 %v2632_v21  ;;  %v2227_v2 = vmax.f32 %v2155_v39, 0.0  ;;  %v2709_v7 = vsel %vm2443_vm3, %v2708_v12, %v2707_v25  ;;  %v2714_v45 = vrot.slane %v7884_v41, 3  ;;  %v2716_v48 = vrot.slane %v7822_v47, 2  ;;  %v6424_v21 = vld [vmem:[#allocation5 + $0x340] ss:$8 sps:$4 sm:$0xff]  }
 0x2ba   :  { %v2263_v30 = vmax.f32 %v2191_v22, 0.0  ;;  %v2711_v39 = vsel %vm2446_vm4, %v2710_v36, %v2709_v7  ;;  %v8821_v44 = vunpack.c.l.b16 %v8820_v11  ;;  %v2476_v10 = vrot.slane %v7396_v50, 6  ;;  %4520 = vmatpush1.bf16.msra.mxu1 %v6418_v17  ;;  %v6432_v22 = vld [vmem:[#allocation5 + $0x354] ss:$8 sps:$4 sm:$0xff]   ;;  %v6433_v17 = vld [vmem:[#allocation5 + $0x160] ss:$8 sps:$4 sm:$0xff]  }
 0x2bb   :  { %v2299_v13 = vpack.c.bf16 %v2227_v2, %v2227_v2  ;;  %v2713_v6 = vsel %vm2449_vm5, %v2712_v5, %v2711_v39  ;;  %v2478_v3 = vrot.slane %v7443_v4, 5  ;;  %v2480_v15 = vrot.slane %v7457_v52, 4  ;;  %4521 = vmatprep.subr.bf16.mxu1 %v6426_v28  ;;  %4438 = vmatpush1.bf16.msra.mxu0 %v6427_v14  ;;  %v6430_v14 = vld [vmem:[#allocation5 + $0x350] ss:$8 sps:$4 sm:$0xff]   ;;  %v6465_v41 = vld [vmem:[#allocation5 + $0x1b4] ss:$8 sps:$4 sm:$0xff]  }
 0x2bc   :  { %v2475_v9 = vsel %vm2440_vm2, %v7812_v0, %v8821_v44  ;;  %v2335_v34 = vpack.c.bf16 %v2263_v30, %v2263_v30  ;;  %v2715_v37 = vsel %vm2452_vm7, %v2714_v45, %v2713_v6  ;;  %v2482_v0 = vrot.slane %v7469_v26, 3  ;;  %4439 = vmatprep.subr.bf16.mxu0 %v6435_v63  ;;  %v6441_v30 = vld [vmem:[#allocation5 + $0x174] ss:$8 sps:$4 sm:$0xff]  }
 0x2bd   :  { %v8059_v53 = vunpack.c.l.b16 %v2299_v13  ;;  %v2477_v61 = vsel %vm2443_vm3, %v2476_v10, %v2475_v9  ;;  %v2717_v36 = vsel %vm2455_vm8, %v2716_v48, %v2715_v37  ;;  %v2484_v25 = vrot.slane %v7482_v42, 2  ;;  %v8823_v45 = vld [vmem:[#allocation43_spill] sm:$0xff]  ;;  %v6438_v10 = vld [vmem:[#allocation5 + $0x364] ss:$8 sps:$4 sm:$0xff]  }
 0x2be   :  { %v8064_v12 = vunpack.c.l.b16 %v2335_v34  ;;  %v2479_v2 = vsel %vm2446_vm4, %v2478_v3, %v2477_v61  ;;  %v2486_v7 = vrot.slane %v7804_v32, 1  ;;  %v8824_v13 = vunpack.c.l.b16 %v8823_v45  ;;  %4522 = vmatpush1.bf16.msra.mxu1 %v6424_v21  ;;  %v8825_v3 = vld [vmem:[#allocation49_spill] sm:$0xff]  ;;  %v8828_v45 = vld [vmem:[#allocation35_spill] sm:$0xff] }
 0x2bf   :  { %v2676_v5 = vrot.slane %v8059_v53, 1  ;;  %v2481_v28 = vsel %vm2449_vm5, %v2480_v15, %v2479_v2  ;;  %v2518_v44 = vrot.slane %v7661_v33, 6  ;;  %v2520_v63 = vrot.slane %v7665_v59, 5  ;;  %4523 = vmatprep.subr.bf16.mxu1 %v6432_v22  ;;  %4440 = vmatpush1.bf16.msra.mxu0 %v6433_v17  ;;  %v6439_v21 = vld [vmem:[#allocation5 + $0x170] ss:$8 sps:$4 sm:$0xff]  }
 0x2c0   :  { %8822 = vst [vmem:[#allocation16_spill] sm:$0xff] %v8064_v12  ;;  %v2517_v39 = vsel %vm2440_vm2, %v7814_v40, %v8824_v13  ;;  %v2718_v48 = vrot.slane %v8064_v12, 1  ;;  %v2483_v11 = vsel %vm2452_vm7, %v2482_v0, %v2481_v28  ;;  %v2522_v6 = vrot.slane %v7726_v55, 4  ;;  %v8826_v0 = vld [vmem:[#allocation51_spill] sm:$0xff]  ;;  %4441 = vmatprep.subr.bf16.mxu0 %v6441_v30  ;;  %v6447_v22 = vld [vmem:[#allocation5 + $0x184] ss:$8 sps:$4 sm:$0xff]  }
 0x2c1   :  { %v2677_v9 = vsel %vm2458_vm9, %v2676_v5, %v2675_v51  ;;  %v2485_v34 = vsel %vm2455_vm8, %v2484_v25, %v2483_v11  ;;  %v2524_v40 = vrot.slane %v8825_v3, 3  ;;  %v2519_v61 = vsel %vm2443_vm3, %v2518_v44, %v2517_v39  ;;  %v8827_v5 = vld [vmem:[#allocation61_spill] sm:$0xff]  ;;  %v6444_v30 = vld [vmem:[#allocation5 + $0x374] ss:$8 sps:$4 sm:$0xff]  }
 0x2c2   :  { %v2719_v15 = vsel %vm2458_vm9, %v2718_v48, %v2717_v36  ;;  %v8086_v37 = vsel %vm2458_vm9, %v2486_v7, %v2485_v34  ;;  %v2526_v2 = vrot.slane %v8826_v0, 2  ;;  %v2521_v25 = vsel %vm2446_vm4, %v2520_v63, %v2519_v61  ;;  %4524 = vmatpush1.bf16.msra.mxu1 %v6430_v14  ;;  %v6436_v36 = vld [vmem:[#allocation5 + $0x360] ss:$8 sps:$4 sm:$0xff]  }
 0x2c3   :  { %v2735_v51 = vpack.c.b16 %v2719_v15, %v2677_v9  ;;  %v2528_v28 = vrot.slane %v8827_v5, 1  ;;  %v2154_v13 = vadd.f32 %v8810_v27, %v8828_v45  ;;  %v2523_v17 = vsel %vm2449_vm5, %v2522_v6, %v2521_v25  ;;  %v8829_v7 = vld [vmem:[#allocation56_spill] sm:$0xff]  ;;  %4525 = vmatprep.subr.bf16.mxu1 %v6438_v10  ;;  %4442 = vmatpush1.bf16.msra.mxu0 %v6439_v21  ;;  %v8830_v61 = vld [vmem:[#allocation19_spill] sm:$0xff] }
 0x2c4   :  { %v2190_v48 = vadd.f32 %v8810_v27, %v8829_v7  ;;  %v2650_v39 = vrot.slane %v8794_v31, 7  ;;  %v2652_v11 = vrot.slane %v8795_v29, 6  ;;  %v2525_v44 = vsel %vm2452_vm7, %v2524_v40, %v2523_v17  ;;  %v6445_v34 = vld [vmem:[#allocation5 + $0x180] ss:$8 sps:$4 sm:$0xff]   ;;  %4443 = vmatprep.subr.bf16.mxu0 %v6447_v22  ;;  %v6453_v10 = vld [vmem:[#allocation5 + $0x194] ss:$8 sps:$4 sm:$0xff]  }
 0x2c5   :  { %4545 = vmatprep.mubr.bf16.mxu1 %v2735_v51  ;;  %v2226_v63 = vmax.f32 %v2154_v13, 0.0  ;;  %v2654_v9 = vrot.slane %v8796_v49, 5  ;;  %v2656_v14 = vrot.slane %v8797_v20, 4  ;;  %v2527_v6 = vsel %vm2455_vm8, %v2526_v2, %v2525_v44  ;;  %v6442_v21 = vld [vmem:[#allocation5 + $0x370] ss:$8 sps:$4 sm:$0xff]  }
 0x2c6   :  { %v2262_v15 = vmax.f32 %v2190_v48, 0.0  ;;  %v2651_v25 = vsel %vm2440_vm2, %v2650_v39, %v8830_v61  ;;  %v2658_v45 = vrot.slane %v8798_v8, 3  ;;  %v8107_v51 = vsel %vm2458_vm9, %v2528_v28, %v2527_v6  ;;  %4526 = vmatpush1.bf16.msra.mxu1 %v6436_v36  ;;  %v6450_v22 = vld [vmem:[#allocation5 + $0x384] ss:$8 sps:$4 sm:$0xff]   ;;  %v6451_v36 = vld [vmem:[#allocation5 + $0x190] ss:$8 sps:$4 sm:$0xff]  }
 0x2c7   :  { %v2298_v40 = vpack.c.bf16 %v2226_v63, %v2226_v63  ;;  %v2653_v13 = vsel %vm2443_vm3, %v2652_v11, %v2651_v25  ;;  %v2660_v17 = vrot.slane %v7995_v43, 2  ;;  %v2692_v39 = vrot.slane %v8803_v18, 7  ;;  %4527 = vmatprep.subr.bf16.mxu1 %v6444_v30  ;;  %4444 = vmatpush1.bf16.msra.mxu0 %v6445_v34  ;;  %v6459_v61 = vld [vmem:[#allocation5 + $0x1a4] ss:$8 sps:$4 sm:$0xff]   ;;  %v6457_v12 = vld [vmem:[#allocation5 + $0x1a0] ss:$8 sps:$4 sm:$0xff]  }
 0x2c8   :  { %v2334_v7 = vpack.c.bf16 %v2262_v15, %v2262_v15  ;;  %v2655_v48 = vsel %vm2446_vm4, %v2654_v9, %v2653_v13  ;;  %v2694_v11 = vrot.slane %v7721_v38, 6  ;;  %v2696_v63 = vrot.slane %v7728_v46, 5  ;;  %4445 = vmatprep.subr.bf16.mxu0 %v6453_v10  ;;  %v8833_v13 = vld [vmem:[#allocation52_spill] sm:$0xff]  ;;  %v6456_v10 = vld [vmem:[#allocation5 + $0x394] ss:$8 sps:$4 sm:$0xff]  }
 0x2c9   :  { %v8115_v44 = vunpack.c.l.b16 %v2298_v40  ;;  %v2657_v28 = vsel %vm2449_vm5, %v2656_v14, %v2655_v48  ;;  %v2693_v9 = vsel %vm2440_vm2, %v2692_v39, %v8802_v56  ;;  %v2698_v30 = vrot.slane %v8804_v24, 4  ;;  %v8835_v39 = vld [vmem:[#allocation33_spill] sm:$0xff] }
 0x2ca   :  { %v8120_v6 = vunpack.c.l.b16 %v2334_v7  ;;  %v2659_v15 = vsel %vm2452_vm7, %v2658_v45, %v2657_v28  ;;  %v2695_v40 = vsel %vm2443_vm3, %v2694_v11, %v2693_v9  ;;  %v2700_v34 = vrot.slane %v8833_v13, 3  ;;  %4528 = vmatpush1.bf16.msra.mxu1 %v6442_v21  ;;  %v6448_v7 = vld [vmem:[#allocation5 + $0x380] ss:$8 sps:$4 sm:$0xff]  }
 0x2cb   :  { %8831 = vst [vmem:[#allocation20_spill] sm:$0xff] %v8115_v44  ;;  %v2661_v25 = vsel %vm2455_vm8, %v2660_v17, %v2659_v15  ;;  %v2662_v14 = vrot.slane %v8115_v44, 1  ;;  %v2697_v48 = vsel %vm2446_vm4, %v2696_v63, %v2695_v40  ;;  %v8834_v45 = vld [vmem:[#allocation27_spill] sm:$0xff]  ;;  %v1819_v2 = vrot.slane %v8835_v39, 2  ;;  %4529 = vmatprep.subr.bf16.mxu1 %v6450_v22  ;;  %4446 = vmatpush1.bf16.msra.mxu0 %v6451_v36 }
 0x2cc   :  { %8832 = vst [vmem:[#allocation22_spill] sm:$0xff] %v8120_v6  ;;  %v2702_v28 = vrot.slane %v8834_v45, 2  ;;  %v2704_v56 = vrot.slane %v8120_v6, 1  ;;  %v2699_v15 = vsel %vm2449_vm5, %v2698_v30, %v2697_v48  ;;  %v8836_v11 = vld [vmem:[#allocation55_spill] sm:$0xff]  ;;  %v2752_v21 = vrot.slane %v8795_v29, 7  ;;  %4447 = vmatprep.subr.bf16.mxu0 %v6459_v61 }
 0x2cd   :  { %v8135_v17 = vsel %vm2458_vm9, %v2662_v14, %v2661_v25  ;;  %v2071_v9 = vrot.slane %v8836_v11, 2  ;;  %v2701_v63 = vsel %vm2452_vm7, %v2700_v34, %v2699_v15  ;;  %v1820_v40 = vmax.f32 %v8835_v39, %v1819_v2  ;;  %v6454_v48 = vld [vmem:[#allocation5 + $0x390] ss:$8 sps:$4 sm:$0xff]   ;;  %v6462_v15 = vld [vmem:[#allocation5 + $0x3a4] ss:$8 sps:$4 sm:$0xff]  }
 0x2ce   :  { %v2754_v47 = vrot.slane %v8796_v49, 6  ;;  %v2756_v22 = vrot.slane %v8797_v20, 5  ;;  %v2703_v25 = vsel %vm2455_vm8, %v2702_v28, %v2701_v63  ;;  %v2753_v14 = vsel %vm2440_vm2, %v2752_v21, %v8794_v31  ;;  %4530 = vmatpush1.bf16.msra.mxu1 %v6448_v7  ;;  %v6463_v7 = vld [vmem:[#allocation5 + $0x1b0] ss:$8 sps:$4 sm:$0xff]  }
 0x2cf   :  { %v2072_v30 = vmax.f32 %v8836_v11, %v2071_v9  ;;  %v2758_v36 = vrot.slane %v8798_v8, 4  ;;  %v8150_v34 = vsel %vm2458_vm9, %v2704_v56, %v2703_v25  ;;  %v1821_v2 = vrot.slane %v1820_v40, 1  ;;  %4531 = vmatprep.subr.bf16.mxu1 %v6456_v10  ;;  %4448 = vmatpush1.bf16.msra.mxu0 %v6457_v12  ;;  %v8837_v25 = vld [vmem:[#allocation59_spill] sm:$0xff] }
 0x2d0   :  { %v2755_v39 = vsel %vm2443_vm3, %v2754_v47, %v2753_v14  ;;  %v2760_v61 = vrot.slane %v7995_v43, 3  ;;  %v2762_v9 = vrot.slane %v8115_v44, 2  ;;  %v2794_v63 = vrot.slane %v7721_v38, 7  ;;  %4449 = vmatprep.subr.bf16.mxu0 %v6465_v41  ;;  %v6471_v14 = vld [vmem:[#allocation5 + $0x1c4] ss:$8 sps:$4 sm:$0xff]  }
 0x2d1   :  { %v2073_v11 = vrot.slane %v2072_v30, 1  ;;  %v2757_v31 = vsel %vm2446_vm4, %v2756_v22, %v2755_v39  ;;  %v1822_v21 = vmax.f32 %v1820_v40, %v1821_v2  ;;  %v2796_v47 = vrot.slane %v7728_v46, 6  ;;  %v6460_v39 = vld [vmem:[#allocation5 + $0x3a0] ss:$8 sps:$4 sm:$0xff]  }
 0x2d2   :  { %v2759_v56 = vsel %vm2449_vm5, %v2758_v36, %v2757_v31  ;;  %v2798_v22 = vrot.slane %v8804_v24, 5  ;;  %4532 = vmatpush1.bf16.msra.mxu1 %v6454_v48  ;;  %v2795_v36 = vsel %vm2440_vm2, %v2794_v63, %v8803_v18  ;;  %v2800_v2 = vrot.slane %v8833_v13, 4  ;;  %v6468_v31 = vld [vmem:[#allocation5 + $0x3b4] ss:$8 sps:$4 sm:$0xff]   ;;  %v6481_v38 = vld [vmem:[#allocation5 + $0x1e0] ss:$8 sps:$4 sm:$0xff]  }
 0x2d3   :  { %v2074_v43 = vmax.f32 %v2072_v30, %v2073_v11  ;;  %v2761_v28 = vsel %vm2452_vm7, %v2760_v61, %v2759_v56  ;;  %v2157_v12 = vadd.f32 %v8810_v27, %v1822_v21  ;;  %4533 = vmatprep.subr.bf16.mxu1 %v6462_v15  ;;  %v2797_v30 = vsel %vm2443_vm3, %v2796_v47, %v2795_v36  ;;  %v8838_v11 = vld [vmem:[#allocation38_spill] sm:$0xff]  ;;  %v6469_v21 = vld [vmem:[#allocation5 + $0x1c0] ss:$8 sps:$4 sm:$0xff]  }
 0x2d4   :  { %v2763_v40 = vsel %vm2455_vm8, %v2762_v9, %v2761_v28  ;;  %v2802_v61 = vrot.slane %v8834_v45, 3  ;;  %v8839_v48 = vld [vmem:[#allocation14_spill] sm:$0xff]  ;;  %4450 = vmatpush1.bf16.msra.mxu0 %v6463_v7  ;;  %v2799_v28 = vsel %vm2446_vm4, %v2798_v22, %v2797_v30  ;;  %v8840_v9 = vld [vmem:[#allocation57_spill] sm:$0xff]  ;;  %v2678_v15 = vrot.slane %v7443_v4, 7 }
 0x2d5   :  { %v2193_v41 = vadd.f32 %v8810_v27, %v2074_v43  ;;  %v2156_v56 = vadd.f32 %v8839_v48, %v8838_v11  ;;  %v2229_v10 = vmax.f32 %v2157_v12, 0.0  ;;  %v2192_v18 = vadd.f32 %v8839_v48, %v8840_v9  ;;  %4451 = vmatprep.subr.bf16.mxu0 %v6471_v14  ;;  %v6477_v63 = vld [vmem:[#allocation5 + $0x1d4] ss:$8 sps:$4 sm:$0xff]   ;;  %v6466_v11 = vld [vmem:[#allocation5 + $0x3b0] ss:$8 sps:$4 sm:$0xff]  }
 0x2d6   :  { %v2801_v47 = vsel %vm2449_vm5, %v2800_v2, %v2799_v28  ;;  %v2680_v45 = vrot.slane %v7457_v52, 6  ;;  %4534 = vmatpush1.bf16.msra.mxu1 %v6460_v39  ;;  %v2804_v12 = vrot.slane %v8120_v6, 2  ;;  %v2679_v30 = vsel %vm2440_vm2, %v2678_v15, %v7396_v50  ;;  %v6474_v9 = vld [vmem:[#allocation5 + $0x3c4] ss:$8 sps:$4 sm:$0xff]   ;;  %v6475_v39 = vld [vmem:[#allocation5 + $0x1d0] ss:$8 sps:$4 sm:$0xff]  }
 0x2d7   :  { %v2265_v43 = vmax.f32 %v2193_v41, 0.0  ;;  %v2228_v36 = vmax.f32 %v2156_v56, 0.0  ;;  %v8180_v7 = vpack.c.bf16 %v2229_v10, %v2229_v10  ;;  %v2264_v22 = vmax.f32 %v2192_v18, 0.0  ;;  %4535 = vmatprep.subr.bf16.mxu1 %v6468_v31  ;;  %v6483_v31 = vld [vmem:[#allocation5 + $0x1e4] ss:$8 sps:$4 sm:$0xff]  }
 0x2d8   :  { %v2803_v41 = vsel %vm2452_vm7, %v2802_v61, %v2801_v47  ;;  %v2681_v56 = vsel %vm2443_vm3, %v2680_v45, %v2679_v30  ;;  %4452 = vmatpush1.bf16.msra.mxu0 %v6469_v21  ;;  %v2682_v6 = vrot.slane %v7469_v26, 5  ;;  %v2684_v18 = vrot.slane %v7482_v42, 4  ;;  %v8842_v61 = vld [vmem:[#allocation62_spill] sm:$0xff]  ;;  %v6472_v45 = vld [vmem:[#allocation5 + $0x3c0] ss:$8 sps:$4 sm:$0xff]  }
 0x2d9   :  { %v8185_v14 = vpack.c.bf16 %v2265_v43, %v2265_v43  ;;  %v2300_v2 = vpack.c.bf16 %v2228_v36, %v2228_v36  ;;  %v8710_v10 = vunpack.c.l.b16 %v8180_v7  ;;  %v2336_v28 = vpack.c.bf16 %v2264_v22, %v2264_v22  ;;  %4453 = vmatprep.subr.bf16.mxu0 %v6477_v63  ;;  %v6480_v63 = vld [vmem:[#allocation5 + $0x3d4] ss:$8 sps:$4 sm:$0xff]  }
 0x2da   :  { %v2688_v47 = vrot.slane %v8842_v61, 2  ;;  %4536 = vmatpush1.bf16.msra.mxu1 %v6466_v11  ;;  %v2805_v36 = vsel %vm2455_vm8, %v2804_v12, %v2803_v41  ;;  %v2683_v22 = vsel %vm2446_vm4, %v2682_v6, %v2681_v56  ;;  %v2686_v30 = vrot.slane %v7804_v32, 3  ;;  %v6489_v41 = vld [vmem:[#allocation5 + $0x1f4] ss:$8 sps:$4 sm:$0xff]  }
 0x2db   :  { %v8711_v15 = vunpack.c.l.b16 %v8185_v14  ;;  %v8194_v43 = vunpack.c.l.b16 %v2300_v2  ;;  %v2764_v21 = vrot.slane %v8710_v10, 1  ;;  %4537 = vmatprep.subr.bf16.mxu1 %v6474_v9  ;;  %v8204_v2 = vunpack.c.l.b16 %v2336_v28 }
 0x2dc   :  { %v2685_v13 = vsel %vm2449_vm5, %v2684_v18, %v2683_v22  ;;  %4454 = vmatpush1.bf16.msra.mxu0 %v6475_v39  ;;  %v2720_v12 = vrot.slane %v7665_v59, 7  ;;  %v2722_v9 = vrot.slane %v7726_v55, 6  ;;  %v2724_v18 = vrot.slane %v8825_v3, 5  ;;  %v8843_v22 = vld [vmem:[#allocation63_spill] sm:$0xff] }
 0x2dd   :  { %v2806_v50 = vrot.slane %v8711_v15, 1  ;;  %v2690_v11 = vrot.slane %v8194_v43, 1  ;;  %v8209_v10 = vsel %vm2458_vm9, %v2764_v21, %v2763_v40  ;;  %v2687_v6 = vsel %vm2452_vm7, %v2686_v30, %v2685_v13  ;;  %4455 = vmatprep.subr.bf16.mxu0 %v6483_v31  ;;  %v6478_v40 = vld [vmem:[#allocation5 + $0x3d0] ss:$8 sps:$4 sm:$0xff]  }
 0x2de   :  { %v2689_v28 = vsel %vm2455_vm8, %v2688_v47, %v2687_v6  ;;  %v2726_v39 = vrot.slane %v8826_v0, 4  ;;  %4538 = vmatpush1.bf16.msra.mxu1 %v6472_v45  ;;  %v2721_v31 = vsel %vm2440_vm2, %v2720_v12, %v7661_v33  ;;  %v2730_v30 = vrot.slane %v8843_v22, 2  ;;  %v8844_v6 = vld [vmem:[#allocation39_spill] sm:$0xff] }
 0x2df   :  { %v8215_v56 = vsel %vm2458_vm9, %v2806_v50, %v2805_v36  ;;  %v8223_v21 = vsel %vm2458_vm9, %v2690_v11, %v2689_v28  ;;  %v2728_v50 = vrot.slane %v8827_v5, 3  ;;  %4539 = vmatprep.subr.bf16.mxu1 %v6480_v63  ;;  %v6486_v36 = vld [vmem:[#allocation5 + $0x3e4] ss:$8 sps:$4 sm:$0xff]   ;;  %v2723_v47 = vsel %vm2443_vm3, %v2722_v9, %v2721_v31  ;;  %v6487_v13 = vld [vmem:[#allocation5 + $0x1f0] ss:$8 sps:$4 sm:$0xff]  }
 0x2e0   :  { %v2732_v45 = vrot.slane %v8204_v2, 1  ;;  %v1833_v15 = vrot.slane %v8844_v6, 2  ;;  %4456 = vmatpush1.bf16.msra.mxu0 %v6481_v38  ;;  %v2725_v11 = vsel %vm2446_vm4, %v2724_v18, %v2723_v47  ;;  %v8845_v28 = vld [vmem:[#allocation58_spill] sm:$0xff]  ;;  %v2780_v33 = vrot.slane %v7457_v52, 7  ;;  %v6484_v38 = vld [vmem:[#allocation5 + $0x3e0] ss:$8 sps:$4 sm:$0xff]  }
 0x2e1   :  { %v2085_v24 = vrot.slane %v8845_v28, 2  ;;  %v2782_v12 = vrot.slane %v7469_v26, 6  ;;  %4457 = vmatprep.subr.bf16.mxu0 %v6489_v41  ;;  %v2727_v63 = vsel %vm2449_vm5, %v2726_v39, %v2725_v11  ;;  %v2784_v31 = vrot.slane %v7482_v42, 5  ;;  %v6492_v41 = vld [vmem:[#allocation5 + $0x3f4] ss:$8 sps:$4 sm:$0xff]  }
 0x2e2   :  { %v1834_v9 = vmax.f32 %v8844_v6, %v1833_v15  ;;  %v2786_v46 = vrot.slane %v7804_v32, 4  ;;  %4540 = vmatpush1.bf16.msra.mxu1 %v6478_v40  ;;  %v2729_v44 = vsel %vm2452_vm7, %v2728_v50, %v2727_v63  ;;  %v2781_v47 = vsel %vm2440_vm2, %v2780_v33, %v7443_v4  ;;  %v6490_v33 = vld [vmem:[#allocation5 + $0x3f0] ss:$8 sps:$4 sm:$0xff]  }
 0x2e3   :  { %v2086_v18 = vmax.f32 %v8845_v28, %v2085_v24  ;;  %v2788_v52 = vrot.slane %v8842_v61, 3  ;;  %4541 = vmatprep.subr.bf16.mxu1 %v6486_v36  ;;  %v2731_v39 = vsel %vm2455_vm8, %v2730_v30, %v2729_v44  ;;  %v2783_v6 = vsel %vm2443_vm3, %v2782_v12, %v2781_v47 }
 0x2e4   :  { %v1835_v15 = vrot.slane %v1834_v9, 1  ;;  %v2790_v11 = vrot.slane %v8194_v43, 2  ;;  %4458 = vmatpush1.bf16.msra.mxu0 %v6487_v13  ;;  %v8249_v40 = vsel %vm2458_vm9, %v2732_v45, %v2731_v39  ;;  %v2785_v24 = vsel %vm2446_vm4, %v2784_v31, %v2783_v6 }
 0x2e5   :  { %v2087_v50 = vrot.slane %v2086_v18, 1  ;;  %v2822_v4 = vrot.slane %v7726_v55, 7  ;;  %v2787_v44 = vsel %vm2449_vm5, %v2786_v46, %v2785_v24  ;;  %v2824_v30 = vrot.slane %v8825_v3, 6  ;;  %v8850_v24 = vld [vmem:[#allocation54_spill] sm:$0xff] }
 0x2e6   :  { %v1836_v28 = vmax.f32 %v1834_v9, %v1835_v15  ;;  %4542 = vmatpush1.bf16.msra.mxu1 %v6484_v38  ;;  %v2789_v13 = vsel %vm2452_vm7, %v2788_v52, %v2787_v44  ;;  %v2826_v63 = vrot.slane %v8826_v0, 5  ;;  %v8846_v31 = vpack.c.b16 %v8107_v51, %v8086_v37  ;;  %v6495_v9 = vld [vmem:[#allocation5 + $0x404] ss:$8 sps:$4 sm:$0xff]   ;;  %v6493_v44 = vld [vmem:[#allocation5 + $0x400] ss:$8 sps:$4 sm:$0xff]  }
 0x2e7   :  { %v2088_v12 = vmax.f32 %v2086_v18, %v2087_v50  ;;  %v2823_v45 = vsel %vm2440_vm2, %v2822_v4, %v7665_v59  ;;  %4543 = vmatprep.subr.bf16.mxu1 %v6492_v41  ;;  %v8847_v46 = vunpack.c.l.b16 %v8180_v7  ;;  %v2828_v52 = vrot.slane %v8827_v5, 4  ;;  %v8848_v7 = vld [vmem:[#allocation32_spill] sm:$0xff] }
 0x2e8   :  { %4460 = vmatmul.mubr.bf16.vlgmr.msra.gmra.mrb[24].mxu0 %v8846_v31  ;;  %v2159_v38 = vadd.f32 %v8839_v48, %v1836_v28  ;;  %v2825_v18 = vsel %vm2443_vm3, %v2824_v30, %v2823_v45  ;;  %v2791_v39 = vsel %vm2455_vm8, %v2790_v11, %v2789_v13  ;;  %v2830_v37 = vrot.slane %v8843_v22, 3  ;;  %v6498_v45 = vld [vmem:[#allocation5 + $0x414] ss:$8 sps:$4 sm:$0xff]  }
 0x2e9   :  { %v8266_v47 = vrot.slane %v8847_v46, 2  ;;  %v2195_v59 = vadd.f32 %v8839_v48, %v2088_v12  ;;  %v2827_v41 = vsel %vm2446_vm4, %v2826_v63, %v2825_v18  ;;  %v8849_v6 = vrot.slane %v8848_v7, 2 }
 0x2ea   :  { %v2231_v51 = vmax.f32 %v2159_v38, 0.0  ;;  %v2829_v15 = vsel %vm2449_vm5, %v2828_v52, %v2827_v41  ;;  %v8851_v4 = vrot.slane %v8850_v24, 2  ;;  %4544 = vmatpush1.bf16.msra.mxu1 %v6490_v33  ;;  %v2832_v11 = vrot.slane %v8204_v2, 2  ;;  %v8852_v52 = vld [vmem:[#allocation21_spill] sm:$0xff] }
 0x2eb   :  { %v1827_v50 = vmax.f32 %v8848_v7, %v8849_v6  ;;  %v2267_v30 = vmax.f32 %v2195_v59, 0.0  ;;  %v2766_v12 = vrot.slane %v8788_v23, 7  ;;  %v2768_v13 = vrot.slane %v8789_v19, 6  ;;  %4556 = vmatprep.subr.bf16.mxu1 %v6495_v9 }
 0x2ec   :  { %v2079_v28 = vmax.f32 %v8850_v24, %v8851_v4  ;;  %v8285_v63 = vpack.c.bf16 %v2231_v51, %v2231_v51  ;;  %v2831_v31 = vsel %vm2452_vm7, %v2830_v37, %v2829_v15  ;;  %v2770_v59 = vrot.slane %v8852_v52, 5 }
 0x2ed   :  { %v1828_v46 = vrot.slane %v1827_v50, 1  ;;  %v8288_v18 = vpack.c.bf16 %v2267_v30, %v2267_v30  ;;  %v2767_v33 = vsel %vm2440_vm2, %v2766_v12, %v7870_v16  ;;  %v2772_v41 = vrot.slane %v7874_v62, 4  ;;  %v6496_v16 = vld [vmem:[#allocation5 + $0x410] ss:$8 sps:$4 sm:$0xff]  }
 0x2ee   :  { %v2080_v38 = vrot.slane %v2079_v28, 1  ;;  %v8853_v7 = vpack.c.b16 %v8150_v34, %v8135_v17  ;;  %v2748_v9 = vunpack.c.l.b16 %v8285_v63  ;;  %v2769_v37 = vsel %vm2443_vm3, %v2768_v13, %v2767_v33  ;;  %v6501_v34 = vld [vmem:[#allocation5 + $0x424] ss:$8 sps:$4 sm:$0xff]  }
 0x2ef   :  { %v1829_v51 = vmax.f32 %v1827_v50, %v1828_v46  ;;  %v8854_v15 = vpack.c.b16 %v8215_v56, %v8209_v10  ;;  %v2751_v24 = vunpack.c.l.b16 %v8288_v18  ;;  %v2771_v4 = vsel %vm2446_vm4, %v2770_v59, %v2769_v37  ;;  %v6499_v59 = vld [vmem:[#allocation5 + $0x420] ss:$8 sps:$4 sm:$0xff]  }
 0x2f0   :  { %4546 = vmatmul.mubr.bf16.vlgmr.msra.gmra.mrb[12].mxu1 %v8853_v7  ;;  %v2081_v6 = vmax.f32 %v2079_v28, %v2080_v38  ;;  %v2774_v30 = vrot.slane %v8807_v1, 3  ;;  %v2776_v17 = vrot.slane %v8059_v53, 2  ;;  %v2792_v50 = vrot.slane %v2748_v9, 1 }
 0x2f1   :  { %4557 = vmatpush1.bf16.msra.mxu1 %v6493_v44  ;;  %4588 = vmatprep.mubr.bf16.mxu1 %v8854_v15  ;;  %v2833_v28 = vsel %vm2455_vm8, %v2832_v11, %v2831_v31  ;;  %v2158_v44 = vadd.f32 %v7295_v58, %v1829_v51  ;;  %v8855_v56 = vunpack.c.l.b16 %v8185_v14  ;;  %v2834_v13 = vrot.slane %v2751_v24, 1 }
 0x2f2   :  { %4558 = vmatprep.subr.bf16.mxu1 %v6498_v45  ;;  %v2194_v10 = vadd.f32 %v7295_v58, %v2081_v6  ;;  %v2773_v46 = vsel %vm2449_vm5, %v2772_v41, %v2771_v4  ;;  %v2808_v45 = vrot.slane %v7723_v57, 7  ;;  %v8320_v38 = vsel %vm2458_vm9, %v2792_v50, %v2791_v39  ;;  %v6504_v6 = vld [vmem:[#allocation5 + $0x434] ss:$8 sps:$4 sm:$0xff]  }
 0x2f3   :  { %v8313_v12 = vrot.slane %v8855_v56, 2  ;;  %v2230_v33 = vmax.f32 %v2158_v44, 0.0  ;;  %v2775_v31 = vsel %vm2452_vm7, %v2774_v30, %v2773_v46  ;;  %v8324_v14 = vsel %vm2458_vm9, %v2834_v13, %v2833_v28  ;;  %v8856_v30 = vld [vmem:[#allocation65_spill] sm:$0xff]  ;;  %v8857_v28 = vld [vmem:[#allocation64_spill] sm:$0xff]  ;;  %v8859_v13 = vld [vmem:[#allocation30_spill] sm:$0xff] }
 0x2f4   :  { %v2266_v11 = vmax.f32 %v2194_v10, 0.0  ;;  %v2777_v7 = vsel %vm2455_vm8, %v2776_v17, %v2775_v31  ;;  %v2809_v51 = vsel %vm2440_vm2, %v2808_v45, %v7880_v35  ;;  %v2810_v41 = vrot.slane %v7730_v60, 6  ;;  %v8858_v44 = vld [vmem:[#allocation16_spill] sm:$0xff] }
 0x2f5   :  { %4559 = vmatpush1.bf16.msra.mxu1 %v6496_v16  ;;  %v2302_v37 = vpack.c.bf16 %v2230_v33, %v2230_v33  ;;  %v2812_v16 = vrot.slane %v7882_v54, 5  ;;  %v2814_v50 = vrot.slane %v8856_v30, 4  ;;  %v2816_v17 = vrot.slane %v8857_v28, 3  ;;  %v6502_v33 = vld [vmem:[#allocation5 + $0x430] ss:$8 sps:$4 sm:$0xff]  }
 0x2f6   :  { %4560 = vmatprep.subr.bf16.mxu1 %v6501_v34  ;;  %v2338_v15 = vpack.c.bf16 %v2266_v11, %v2266_v11  ;;  %v2811_v4 = vsel %vm2443_vm3, %v2810_v41, %v2809_v51  ;;  %v2818_v10 = vrot.slane %v8858_v44, 2  ;;  %v8860_v46 = vcombine.high %v8859_v13, %v8859_v13  ;;  %v8861_v51 = vld [vmem:[#allocation53_spill] sm:$0xff] }
 0x2f7   :  { %v2747_v35 = vunpack.c.l.b16 %v2302_v37  ;;  %v2813_v34 = vsel %vm2446_vm4, %v2812_v16, %v2811_v4  ;;  %v8862_v41 = vcombine.high %v8861_v51, %v8861_v51  ;;  %v2868_v37 = vrot.slane %v8789_v19, 7 }
 0x2f8   :  { %v2750_v56 = vunpack.c.l.b16 %v2338_v15  ;;  %v1844_v45 = vsel %vm250_vm6, %v8860_v46, -inf  ;;  %v2815_v11 = vsel %vm2449_vm5, %v2814_v50, %v2813_v34  ;;  %v6507_v15 = vld [vmem:[#allocation5 + $0x444] ss:$8 sps:$4 sm:$0xff]   ;;  %v2870_v34 = vrot.slane %v8852_v52, 6  ;;  %v6510_v52 = vld [vmem:[#allocation5 + $0x454] ss:$8 sps:$4 sm:$0xff]  }
 0x2f9   :  { %4561 = vmatpush1.bf16.msra.mxu1 %v6499_v59  ;;  %v1845_v31 = vrot.slane %v1844_v45, 4  ;;  %v2096_v39 = vsel %vm250_vm6, %v8862_v41, -inf  ;;  %v2778_v16 = vrot.slane %v2747_v35, 1  ;;  %v2817_v4 = vsel %vm2452_vm7, %v2816_v17, %v2815_v11  ;;  %v6505_v17 = vld [vmem:[#allocation5 + $0x440] ss:$8 sps:$4 sm:$0xff]  }
 0x2fa   :  { %4562 = vmatprep.subr.bf16.mxu1 %v6504_v6  ;;  %v2820_v13 = vrot.slane %v2750_v56, 1  ;;  %v2097_v36 = vrot.slane %v2096_v39, 4  ;;  %v2819_v59 = vsel %vm2455_vm8, %v2818_v10, %v2817_v4  ;;  %v2869_v50 = vsel %vm2440_vm2, %v2868_v37, %v8788_v23 }
 0x2fb   :  { %v1846_v46 = vmax.f32 %v1844_v45, %v1845_v31  ;;  %v8354_v51 = vsel %vm2458_vm9, %v2778_v16, %v2777_v7  ;;  %v2872_v41 = vrot.slane %v7874_v62, 5  ;;  %v2871_v11 = vsel %vm2443_vm3, %v2870_v34, %v2869_v50 }
 0x2fc   :  { %v8357_v19 = vsel %vm2458_vm9, %v2820_v13, %v2819_v59  ;;  %v2098_v6 = vmax.f32 %v2096_v39, %v2097_v36  ;;  %v2874_v23 = vrot.slane %v8807_v1, 4  ;;  %v2876_v37 = vrot.slane %v8059_v53, 3  ;;  %v6508_v59 = vld [vmem:[#allocation5 + $0x450] ss:$8 sps:$4 sm:$0xff]  }
 0x2fd   :  { %4563 = vmatpush1.bf16.msra.mxu1 %v6502_v33  ;;  %v2837_v10 = vpack.c.b16 %v8357_v19, %v8354_v51  ;;  %v1847_v45 = vrot.slane %v1846_v46, 2  ;;  %v2873_v31 = vsel %vm2446_vm4, %v2872_v41, %v2871_v11  ;;  %v2878_v36 = vrot.slane %v2747_v35, 2  ;;  %v6606_v51 = vld [vmem:[#allocation5 + $0x654] ss:$8 sps:$4 sm:$0xff]   ;;  %v6604_v19 = vld [vmem:[#allocation5 + $0x650] ss:$8 sps:$4 sm:$0xff]  }
 0x2fe   :  { %4564 = vmatprep.subr.bf16.mxu1 %v6507_v15  ;;  %v2099_v7 = vrot.slane %v2098_v6, 2  ;;  %v2875_v62 = vsel %vm2449_vm5, %v2874_v23, %v2873_v31  ;;  %v2910_v33 = vrot.slane %v7730_v60, 7  ;;  %v2912_v16 = vrot.slane %v7882_v54, 6  ;;  %v6513_v54 = vld [vmem:[#allocation5 + $0x464] ss:$8 sps:$4 sm:$0xff]  }
 0x2ff   :  { %v1848_v39 = vmax.f32 %v1846_v46, %v1847_v45  ;;  %v2877_v13 = vsel %vm2452_vm7, %v2876_v37, %v2875_v62  ;;  %v2914_v1 = vrot.slane %v8856_v30, 5  ;;  %v2916_v15 = vrot.slane %v8857_v28, 4  ;;  %v8863_v30 = vld [vmem:[#allocation36_spill] sm:$0xff] }
 0x300   :  { %v2100_v4 = vmax.f32 %v2098_v6, %v2099_v7  ;;  %v8373_v53 = vsel %vm2455_vm8, %v2878_v36, %v2877_v13  ;;  %v2911_v35 = vsel %vm2440_vm2, %v2910_v33, %v7723_v57  ;;  %v2918_v60 = vrot.slane %v8858_v44, 3 }
 0x301   :  { %4565 = vmatpush1.bf16.msra.mxu1 %v6505_v17  ;;  %v1849_v50 = vrot.slane %v1848_v39, 1  ;;  %v2913_v34 = vsel %vm2443_vm3, %v2912_v16, %v2911_v35  ;;  %v2920_v6 = vrot.slane %v2750_v56, 2  ;;  %v8864_v41 = vrot.slane %v8863_v30, 2  ;;  %v6511_v56 = vld [vmem:[#allocation5 + $0x460] ss:$8 sps:$4 sm:$0xff]  }
 0x302   :  { %4566 = vmatprep.subr.bf16.mxu1 %v6510_v52  ;;  %v2101_v46 = vrot.slane %v2100_v4, 1  ;;  %v2915_v45 = vsel %vm2446_vm4, %v2914_v1, %v2913_v34  ;;  %v8865_v11 = vrot.slane %v8837_v25, 2  ;;  %v2854_v57 = vrot.slane %v8796_v49, 7 }
 0x303   :  { %v1841_v28 = vmax.f32 %v8863_v30, %v8864_v41  ;;  %v1850_v17 = vmax.f32 %v1848_v39, %v1849_v50  ;;  %v2917_v52 = vsel %vm2449_vm5, %v2916_v15, %v2915_v45  ;;  %v2856_v31 = vrot.slane %v8797_v20, 6  ;;  %v8866_v15 = vld [vmem:[#allocation24_spill] sm:$0xff]  ;;  %v8869_v41 = vld [vmem:[#allocation50_spill] sm:$0xff] }
 0x304   :  { %v2093_v23 = vmax.f32 %v8837_v25, %v8865_v11  ;;  %v2102_v44 = vmax.f32 %v2100_v4, %v2101_v46  ;;  %v2919_v36 = vsel %vm2452_vm7, %v2918_v60, %v2917_v52  ;;  %v2855_v62 = vsel %vm2440_vm2, %v2854_v57, %v8795_v29  ;;  %v6516_v25 = vld [vmem:[#allocation5 + $0x474] ss:$8 sps:$4 sm:$0xff]   ;;  %v8867_v60 = vld [vmem:[#allocation20_spill] sm:$0xff] }
 0x305   :  { %v1842_v7 = vrot.slane %v1841_v28, 1  ;;  %4567 = vmatpush1.bf16.msra.mxu1 %v6508_v59  ;;  %v2161_v37 = vadd.f32 %v7295_v58, %v1850_v17  ;;  %v2921_v33 = vsel %vm2455_vm8, %v2920_v6, %v2919_v36  ;;  %v2857_v4 = vsel %vm2443_vm3, %v2856_v31, %v2855_v62  ;;  %v8871_v36 = vld [vmem:[#allocation52_spill] sm:$0xff] }
 0x306   :  { %v2094_v39 = vrot.slane %v2093_v23, 1  ;;  %4568 = vmatprep.subr.bf16.mxu1 %v6513_v54  ;;  %v2197_v49 = vadd.f32 %v7295_v58, %v2102_v44  ;;  %v2858_v1 = vrot.slane %v8798_v8, 5  ;;  %v2860_v59 = vrot.slane %v8866_v15, 4  ;;  %v8868_v54 = vld [vmem:[#allocation48_spill] sm:$0xff]  ;;  %v6514_v58 = vld [vmem:[#allocation5 + $0x470] ss:$8 sps:$4 sm:$0xff]  }
 0x307   :  { %v1843_v16 = vmax.f32 %v1841_v28, %v1842_v7  ;;  %v2233_v20 = vmax.f32 %v2161_v37, 0.0  ;;  %v2862_v29 = vrot.slane %v8867_v60, 3  ;;  %v2896_v46 = vrot.slane %v8868_v54, 7  ;;  %v6519_v8 = vld [vmem:[#allocation5 + $0x484] ss:$8 sps:$4 sm:$0xff]   ;;  %v8875_v60 = vld [vmem:[#allocation22_spill] sm:$0xff] }
 0x308   :  { %v2095_v13 = vmax.f32 %v2093_v23, %v2094_v39  ;;  %v2269_v50 = vmax.f32 %v2197_v49, 0.0  ;;  %v2859_v30 = vsel %vm2446_vm4, %v2858_v1, %v2857_v4  ;;  %v2898_v28 = vrot.slane %v8869_v41, 6  ;;  %v8870_v23 = vld [vmem:[#allocation47_spill] sm:$0xff]  ;;  %v8876_v41 = vld [vmem:[#allocation60_spill] sm:$0xff] }
 0x309   :  { %v2160_v35 = vadd.f32 %v8810_v27, %v1843_v16  ;;  %4569 = vmatpush1.bf16.msra.mxu1 %v6511_v56  ;;  %v2305_v34 = vpack.c.bf16 %v2233_v20, %v2233_v20  ;;  %v2861_v11 = vsel %vm2449_vm5, %v2860_v59, %v2859_v30  ;;  %v2897_v57 = vsel %vm2440_vm2, %v2896_v46, %v8870_v23  ;;  %v6517_v62 = vld [vmem:[#allocation5 + $0x480] ss:$8 sps:$4 sm:$0xff]   ;;  %v6522_v15 = vld [vmem:[#allocation5 + $0x494] ss:$8 sps:$4 sm:$0xff]  }
 0x30a   :  { %v2196_v6 = vadd.f32 %v8810_v27, %v2095_v13  ;;  %4570 = vmatprep.subr.bf16.mxu1 %v6516_v25  ;;  %v2341_v17 = vpack.c.bf16 %v2269_v50, %v2269_v50  ;;  %v2863_v7 = vsel %vm2452_vm7, %v2862_v29, %v2861_v11  ;;  %v2899_v31 = vsel %vm2443_vm3, %v2898_v28, %v2897_v57  ;;  %v8872_v16 = vld [vmem:[#allocation27_spill] sm:$0xff]  ;;  %v8873_v20 = vld [vmem:[#allocation37_spill] sm:$0xff] }
 0x30b   :  { %v2232_v45 = vmax.f32 %v2160_v35, 0.0  ;;  %v2849_v44 = vunpack.c.l.b16 %v2305_v34  ;;  %v2865_v37 = vsel %vm2455_vm8, %v8266_v47, %v2863_v7  ;;  %v2900_v39 = vrot.slane %v8871_v36, 5 }
 0x30c   :  { %v2268_v52 = vmax.f32 %v2196_v6, 0.0  ;;  %v2852_v27 = vunpack.c.l.b16 %v2341_v17  ;;  %v2902_v4 = vrot.slane %v8872_v16, 4  ;;  %v8874_v13 = vrot.slane %v8873_v20, 2  ;;  %v6520_v17 = vld [vmem:[#allocation5 + $0x490] ss:$8 sps:$4 sm:$0xff]  }
 0x30d   :  { %v2304_v56 = vpack.c.bf16 %v2232_v45, %v2232_v45  ;;  %4571 = vmatpush1.bf16.msra.mxu1 %v6514_v58  ;;  %v2880_v25 = vrot.slane %v2849_v44, 1  ;;  %v2901_v35 = vsel %vm2446_vm4, %v2900_v39, %v2899_v31  ;;  %v2904_v47 = vrot.slane %v8875_v60, 3 }
 0x30e   :  { %v2340_v49 = vpack.c.bf16 %v2268_v52, %v2268_v52  ;;  %v1855_v1 = vmax.f32 %v8873_v20, %v8874_v13  ;;  %4572 = vmatprep.subr.bf16.mxu1 %v6519_v8  ;;  %v2922_v59 = vrot.slane %v2852_v27, 1  ;;  %v2903_v46 = vsel %vm2449_vm5, %v2902_v4, %v2901_v35 }
 0x30f   :  { %v2848_v50 = vunpack.c.l.b16 %v2304_v56  ;;  %v8420_v29 = vsel %vm2458_vm9, %v2880_v25, %v8373_v53  ;;  %v2905_v30 = vsel %vm2452_vm7, %v2904_v47, %v2903_v46  ;;  %v8877_v28 = vrot.slane %v8876_v41, 2  ;;  %v6531_v47 = vld [vmem:[#allocation5 + $0x4c4] ss:$8 sps:$4 sm:$0xff]  }
 0x310   :  { %v2851_v54 = vunpack.c.l.b16 %v2340_v49  ;;  %v1856_v58 = vrot.slane %v1855_v1, 1  ;;  %v8424_v34 = vsel %vm2458_vm9, %v2922_v59, %v2921_v33  ;;  %v2907_v45 = vsel %vm2455_vm8, %v8313_v12, %v2905_v30  ;;  %v6525_v33 = vld [vmem:[#allocation5 + $0x4a4] ss:$8 sps:$4 sm:$0xff]  }
 0x311   :  { %v2866_v6 = vrot.slane %v2848_v50, 1  ;;  %v2107_v8 = vmax.f32 %v8876_v41, %v8877_v28  ;;  %4573 = vmatpush1.bf16.msra.mxu1 %v6517_v62  ;;  %v2939_v53 = vpack.c.b16 %v8424_v34, %v8420_v29  ;;  %v2882_v52 = vrot.slane %v7469_v26, 7  ;;  %v6529_v41 = vld [vmem:[#allocation5 + $0x4c0] ss:$8 sps:$4 sm:$0xff]   ;;  %v6612_v34 = vld [vmem:[#allocation5 + $0x674] ss:$8 sps:$4 sm:$0xff]  }
 0x312   :  { %v2908_v11 = vrot.slane %v2851_v54, 1  ;;  %v1857_v23 = vmax.f32 %v1855_v1, %v1856_v58  ;;  %4574 = vmatprep.subr.bf16.mxu1 %v6522_v15  ;;  %v2884_v7 = vrot.slane %v7482_v42, 6  ;;  %v2886_v56 = vrot.slane %v7804_v32, 5  ;;  %v6523_v42 = vld [vmem:[#allocation5 + $0x4a0] ss:$8 sps:$4 sm:$0xff]  }
 0x313   :  { %v8435_v57 = vsel %vm2458_vm9, %v2866_v6, %v2865_v37  ;;  %v2108_v44 = vrot.slane %v2107_v8, 1  ;;  %v2888_v12 = vrot.slane %v8842_v61, 4  ;;  %v8878_v37 = vld [vmem:[#allocation25_spill] sm:$0xff]  ;;  %v2890_v26 = vrot.slane %v8194_v43, 3  ;;  %v6528_v61 = vld [vmem:[#allocation5 + $0x4b4] ss:$8 sps:$4 sm:$0xff]  }
 0x314   :  { %v8440_v31 = vsel %vm2458_vm9, %v2908_v11, %v2907_v45  ;;  %v2162_v27 = vadd.f32 %v8839_v48, %v1857_v23  ;;  %v2883_v62 = vsel %vm2440_vm2, %v2882_v52, %v8878_v37  ;;  %v2892_v25 = vrot.slane %v2748_v9, 2  ;;  %v6537_v45 = vld [vmem:[#allocation5 + $0x4e4] ss:$8 sps:$4 sm:$0xff]   ;;  %v6535_v11 = vld [vmem:[#allocation5 + $0x4e0] ss:$8 sps:$4 sm:$0xff]  }
 0x315   :  { %v2938_v36 = vpack.c.b16 %v8440_v31, %v8435_v57  ;;  %v2109_v39 = vmax.f32 %v2107_v8, %v2108_v44  ;;  %4575 = vmatpush1.bf16.msra.mxu1 %v6520_v17  ;;  %v2885_v16 = vsel %vm2443_vm3, %v2884_v7, %v2883_v62  ;;  %v2924_v32 = vrot.slane %v8825_v3, 7  ;;  %v6540_v23 = vld [vmem:[#allocation5 + $0x4f4] ss:$8 sps:$4 sm:$0xff]   ;;  %v6543_v44 = vld [vmem:[#allocation5 + $0x504] ss:$8 sps:$4 sm:$0xff]  }
 0x316   :  { %v2234_v49 = vmax.f32 %v2162_v27, 0.0  ;;  %4576 = vmatprep.subr.bf16.mxu1 %v6525_v33  ;;  %v2887_v20 = vsel %vm2446_vm4, %v2886_v56, %v2885_v16  ;;  %v2926_v13 = vrot.slane %v8826_v0, 6  ;;  %v2928_v43 = vrot.slane %v8827_v5, 5  ;;  %v6538_v33 = vld [vmem:[#allocation5 + $0x4f0] ss:$8 sps:$4 sm:$0xff]  }
 0x317   :  { %v2198_v4 = vadd.f32 %v8839_v48, %v2109_v39  ;;  %v2889_v15 = vsel %vm2449_vm5, %v2888_v12, %v2887_v20  ;;  %v2925_v63 = vsel %vm2440_vm2, %v2924_v32, %v7726_v55  ;;  %v2930_v50 = vrot.slane %v8843_v22, 4  ;;  %v6526_v48 = vld [vmem:[#allocation5 + $0x4b0] ss:$8 sps:$4 sm:$0xff]   ;;  %v6541_v52 = vld [vmem:[#allocation5 + $0x500] ss:$8 sps:$4 sm:$0xff]  }
 0x318   :  { %v2306_v1 = vpack.c.bf16 %v2234_v49, %v2234_v49  ;;  %v2891_v59 = vsel %vm2452_vm7, %v2890_v26, %v2889_v15  ;;  %v2927_v3 = vsel %vm2443_vm3, %v2926_v13, %v2925_v63  ;;  %v2932_v60 = vrot.slane %v8204_v2, 3  ;;  %v6534_v2 = vld [vmem:[#allocation5 + $0x4d4] ss:$8 sps:$4 sm:$0xff]   ;;  %v6544_v12 = vld [vmem:[#allocation5 + $0x510] ss:$8 sps:$4 sm:$0xff]  }
 0x319   :  { %v2270_v9 = vmax.f32 %v2198_v4, 0.0  ;;  %4577 = vmatpush1.bf16.msra.mxu1 %v6523_v42  ;;  %v2893_v0 = vsel %vm2455_vm8, %v2892_v25, %v2891_v59  ;;  %v2929_v5 = vsel %vm2446_vm4, %v2928_v43, %v2927_v3  ;;  %v2934_v55 = vrot.slane %v2751_v24, 2  ;;  %v6532_v24 = vld [vmem:[#allocation5 + $0x4d0] ss:$8 sps:$4 sm:$0xff]   ;;  %v6546_v7 = vld [vmem:[#allocation5 + $0x514] ss:$8 sps:$4 sm:$0xff]  }
 0x31a   :  { %v2850_v35 = vunpack.c.l.b16 %v2306_v1  ;;  %4578 = vmatprep.subr.bf16.mxu1 %v6528_v61  ;;  %v2931_v46 = vsel %vm2449_vm5, %v2930_v50, %v2929_v5  ;;  %v8879_v27 = vpack.c.b16 %v8249_v40, %v8223_v21  ;;  %v8880_v56 = vpack.c.b16 %v8324_v14, %v8320_v38  ;;  %v6549_v39 = vld [vmem:[#allocation5 + $0x524] ss:$8 sps:$4 sm:$0xff]   ;;  %v6547_v37 = vld [vmem:[#allocation5 + $0x520] ss:$8 sps:$4 sm:$0xff]   ;;  %v6552_v62 = vld [vmem:[#allocation5 + $0x534] ss:$8 sps:$4 sm:$0xff]  }
 0x31b   :  { %v2342_v54 = vpack.c.bf16 %v2270_v9, %v2270_v9  ;;  %v2933_v22 = vsel %vm2452_vm7, %v2932_v60, %v2931_v46  ;;  %v6550_v26 = vld [vmem:[#allocation5 + $0x530] ss:$8 sps:$4 sm:$0xff]   ;;  %v6555_v42 = vld [vmem:[#allocation5 + $0x544] ss:$8 sps:$4 sm:$0xff]   ;;  %v6553_v25 = vld [vmem:[#allocation5 + $0x540] ss:$8 sps:$4 sm:$0xff]  }
 0x31c   :  { %v2894_v58 = vrot.slane %v2850_v35, 1  ;;  %v2935_v30 = vsel %vm2455_vm8, %v2934_v55, %v2933_v22  ;;  %v6558_v21 = vld [vmem:[#allocation5 + $0x554] ss:$8 sps:$4 sm:$0xff]   ;;  %v6556_v40 = vld [vmem:[#allocation5 + $0x550] ss:$8 sps:$4 sm:$0xff]  }
 0x31d   :  { %v2853_v6 = vunpack.c.l.b16 %v2342_v54  ;;  %4579 = vmatpush1.bf16.msra.mxu1 %v6526_v48  ;;  %v6561_v38 = vld [vmem:[#allocation5 + $0x564] ss:$8 sps:$4 sm:$0xff]   ;;  %v6559_v14 = vld [vmem:[#allocation5 + $0x560] ss:$8 sps:$4 sm:$0xff]   ;;  %v6564_v49 = vld [vmem:[#allocation5 + $0x574] ss:$8 sps:$4 sm:$0xff]  }
 0x31e   :  { %v8473_v28 = vsel %vm2458_vm9, %v2894_v58, %v2893_v0  ;;  %4580 = vmatprep.subr.bf16.mxu1 %v6531_v47  ;;  %v6562_v16 = vld [vmem:[#allocation5 + $0x570] ss:$8 sps:$4 sm:$0xff]   ;;  %v6567_v32 = vld [vmem:[#allocation5 + $0x584] ss:$8 sps:$4 sm:$0xff]   ;;  %v6565_v61 = vld [vmem:[#allocation5 + $0x580] ss:$8 sps:$4 sm:$0xff]  }
 0x31f   :  { %v2936_v8 = vrot.slane %v2853_v6, 1  ;;  %v6570_v4 = vld [vmem:[#allocation5 + $0x594] ss:$8 sps:$4 sm:$0xff]   ;;  %v6661_v20 = vld [vmem:[#allocation7] ss:$8 sps:$4 sm:$0xff]  }
 0x320   :  { %v6663_v13 = vld [vmem:[#allocation7 + $0x4] ss:$8 sps:$4 sm:$0xff]   ;;  %v6568_v43 = vld [vmem:[#allocation5 + $0x590] ss:$8 sps:$4 sm:$0xff]   ;;  %v6666_v1 = vld [vmem:[#allocation7 + $0x14] ss:$8 sps:$4 sm:$0xff]  }
 0x321   :  { %v8476_v18 = vsel %vm2458_vm9, %v2936_v8, %v2935_v30  ;;  %4581 = vmatpush1.bf16.msra.mxu1 %v6529_v41  ;;  %v6573_v15 = vld [vmem:[#allocation5 + $0x5a4] ss:$8 sps:$4 sm:$0xff]   ;;  %5273 = vmatprep.subr.bf16.mxu0 %v6663_v13  ;;  %v6664_v63 = vld [vmem:[#allocation7 + $0x10] ss:$8 sps:$4 sm:$0xff]   ;;  %v6571_v59 = vld [vmem:[#allocation5 + $0x5a0] ss:$8 sps:$4 sm:$0xff]  }
 0x322   :  { %v2940_v17 = vpack.c.b16 %v8476_v18, %v8473_v28  ;;  %4582 = vmatprep.subr.bf16.mxu1 %v6534_v2  ;;  %5274 = vmatpush1.bf16.msra.mxu0 %v6661_v20  ;;  %v6669_v9 = vld [vmem:[#allocation7 + $0x24] ss:$8 sps:$4 sm:$0xff]   ;;  %v6576_v3 = vld [vmem:[#allocation5 + $0x5b4] ss:$8 sps:$4 sm:$0xff]   ;;  %v6667_v50 = vld [vmem:[#allocation7 + $0x20] ss:$8 sps:$4 sm:$0xff]  }
 0x323   :  { %5275 = vmatprep.subr.bf16.mxu0 %v6666_v1  ;;  %v6672_v48 = vld [vmem:[#allocation7 + $0x34] ss:$8 sps:$4 sm:$0xff]   ;;  %v6574_v35 = vld [vmem:[#allocation5 + $0x5b0] ss:$8 sps:$4 sm:$0xff]   ;;  %v6579_v0 = vld [vmem:[#allocation5 + $0x5c4] ss:$8 sps:$4 sm:$0xff]  }
 0x324   :  { %v6670_v5 = vld [vmem:[#allocation7 + $0x30] ss:$8 sps:$4 sm:$0xff]   ;;  %v6675_v60 = vld [vmem:[#allocation7 + $0x44] ss:$8 sps:$4 sm:$0xff]   ;;  %v6577_v47 = vld [vmem:[#allocation5 + $0x5c0] ss:$8 sps:$4 sm:$0xff]  }
 0x325   :  { %4583 = vmatpush1.bf16.msra.mxu1 %v6532_v24  ;;  %v6582_v55 = vld [vmem:[#allocation5 + $0x5d4] ss:$8 sps:$4 sm:$0xff]   ;;  %v6673_v54 = vld [vmem:[#allocation7 + $0x40] ss:$8 sps:$4 sm:$0xff]   ;;  %v6580_v58 = vld [vmem:[#allocation5 + $0x5d0] ss:$8 sps:$4 sm:$0xff]  }
 0x326   :  { %4584 = vmatprep.subr.bf16.mxu1 %v6537_v45  ;;  %5276 = vmatpush1.bf16.msra.mxu0 %v6664_v63  ;;  %v6678_v46 = vld [vmem:[#allocation7 + $0x54] ss:$8 sps:$4 sm:$0xff]   ;;  %v6585_v22 = vld [vmem:[#allocation5 + $0x5e4] ss:$8 sps:$4 sm:$0xff]   ;;  %v6676_v6 = vld [vmem:[#allocation7 + $0x50] ss:$8 sps:$4 sm:$0xff]  }
 0x327   :  { %5277 = vmatprep.subr.bf16.mxu0 %v6669_v9  ;;  %v6681_v30 = vld [vmem:[#allocation7 + $0x64] ss:$8 sps:$4 sm:$0xff]   ;;  %v6583_v41 = vld [vmem:[#allocation5 + $0x5e0] ss:$8 sps:$4 sm:$0xff]   ;;  %v6588_v2 = vld [vmem:[#allocation5 + $0x5f4] ss:$8 sps:$4 sm:$0xff]  }
 0x328   :  { %v6679_v8 = vld [vmem:[#allocation7 + $0x60] ss:$8 sps:$4 sm:$0xff]   ;;  %v6684_v24 = vld [vmem:[#allocation7 + $0x74] ss:$8 sps:$4 sm:$0xff]   ;;  %v6586_v45 = vld [vmem:[#allocation5 + $0x5f0] ss:$8 sps:$4 sm:$0xff]  }
 0x329   :  { %4585 = vmatpush1.bf16.msra.mxu1 %v6535_v11  ;;  %v6591_v11 = vld [vmem:[#allocation5 + $0x604] ss:$8 sps:$4 sm:$0xff]   ;;  %v6607_v29 = vld [vmem:[#allocation5 + $0x660] ss:$8 sps:$4 sm:$0xff]   ;;  %v6636_v13 = vld [vmem:[#allocation5 + $0x6f4] ss:$8 sps:$4 sm:$0xff]  }
 0x32a   :  { %4586 = vmatprep.subr.bf16.mxu1 %v6540_v23  ;;  %5278 = vmatpush1.bf16.msra.mxu0 %v6667_v50  ;;  %v6682_v23 = vld [vmem:[#allocation7 + $0x70] ss:$8 sps:$4 sm:$0xff]   ;;  %v6631_v20 = vld [vmem:[#allocation5 + $0x6e0] ss:$8 sps:$4 sm:$0xff]   ;;  %v6639_v1 = vld [vmem:[#allocation5 + $0x704] ss:$8 sps:$4 sm:$0xff]  }
 0x32b   :  { %5279 = vmatprep.subr.bf16.mxu0 %v6672_v48  ;;  %v6642_v63 = vld [vmem:[#allocation5 + $0x714] ss:$8 sps:$4 sm:$0xff]   ;;  %v6640_v9 = vld [vmem:[#allocation5 + $0x710] ss:$8 sps:$4 sm:$0xff]   ;;  %v6643_v50 = vld [vmem:[#allocation5 + $0x720] ss:$8 sps:$4 sm:$0xff]  }
 0x32c   :  { %v6648_v48 = vld [vmem:[#allocation5 + $0x734] ss:$8 sps:$4 sm:$0xff]   ;;  %v6700_v18 = vld [vmem:[#allocation7 + $0xd0] ss:$8 sps:$4 sm:$0xff]  }
 0x32d   :  { %4587 = vmatpush1.bf16.msra.mxu1 %v6538_v33  ;;  %v6589_v33 = vld [vmem:[#allocation5 + $0x600] ss:$8 sps:$4 sm:$0xff]   ;;  %v6654_v31 = vld [vmem:[#allocation5 + $0x754] ss:$8 sps:$4 sm:$0xff]  }
 0x32e   :  { %4599 = vmatprep.subr.bf16.mxu1 %v6543_v44  ;;  %5280 = vmatpush1.bf16.msra.mxu0 %v6670_v5  ;;  %v6594_v44 = vld [vmem:[#allocation5 + $0x614] ss:$8 sps:$4 sm:$0xff]   ;;  %v6649_v5 = vld [vmem:[#allocation5 + $0x740] ss:$8 sps:$4 sm:$0xff]  }
 0x32f   :  { %5281 = vmatprep.subr.bf16.mxu0 %v6675_v60  ;;  %v6702_v28 = vld [vmem:[#allocation7 + $0xd4] ss:$8 sps:$4 sm:$0xff]  }
 0x330   :  { %4589 = vmatmul.mubr.bf16.vlgmr.msra.gmra.mrb[12].mxu1 %v8879_v27  ;;  %v6595_v27 = vld [vmem:[#allocation5 + $0x620] ss:$8 sps:$4 sm:$0xff]  }
 0x331   :  { %4600 = vmatpush1.bf16.msra.mxu1 %v6541_v52  ;;  %4631 = vmatprep.mubr.bf16.mxu1 %v8880_v56  ;;  %v6592_v52 = vld [vmem:[#allocation5 + $0x610] ss:$8 sps:$4 sm:$0xff]   ;;  %v6600_v56 = vld [vmem:[#allocation5 + $0x634] ss:$8 sps:$4 sm:$0xff]  }
 0x332   :  { %4601 = vmatprep.subr.bf16.mxu1 %v6546_v7  ;;  %5282 = vmatpush1.bf16.msra.mxu0 %v6673_v54  ;;  %v6597_v7 = vld [vmem:[#allocation5 + $0x624] ss:$8 sps:$4 sm:$0xff]  }
 0x333   :  { %5283 = vmatprep.subr.bf16.mxu0 %v6678_v46  ;;  %v6657_v54 = vld [vmem:[#allocation5 + $0x764] ss:$8 sps:$4 sm:$0xff]   ;;  %v6655_v46 = vld [vmem:[#allocation5 + $0x760] ss:$8 sps:$4 sm:$0xff]  }
 0x335   :  { %4602 = vmatpush1.bf16.msra.mxu1 %v6544_v12  ;;  %v6598_v12 = vld [vmem:[#allocation5 + $0x630] ss:$8 sps:$4 sm:$0xff]  }
 0x336   :  { %4603 = vmatprep.subr.bf16.mxu1 %v6549_v39  ;;  %5284 = vmatpush1.bf16.msra.mxu0 %v6676_v6  ;;  %v6603_v39 = vld [vmem:[#allocation5 + $0x644] ss:$8 sps:$4 sm:$0xff]   ;;  %v6685_v6 = vld [vmem:[#allocation7 + $0x80] ss:$8 sps:$4 sm:$0xff]  }
 0x337   :  { %5285 = vmatprep.subr.bf16.mxu0 %v6681_v30  ;;  %v6687_v30 = vld [vmem:[#allocation7 + $0x84] ss:$8 sps:$4 sm:$0xff]  }
 0x339   :  { %4604 = vmatpush1.bf16.msra.mxu1 %v6547_v37  ;;  %v6601_v37 = vld [vmem:[#allocation5 + $0x640] ss:$8 sps:$4 sm:$0xff]  }
 0x33a   :  { %4605 = vmatprep.subr.bf16.mxu1 %v6552_v62  ;;  %5286 = vmatpush1.bf16.msra.mxu0 %v6679_v8  ;;  %v6615_v62 = vld [vmem:[#allocation5 + $0x684] ss:$8 sps:$4 sm:$0xff]  }
 0x33b   :  { %5287 = vmatprep.subr.bf16.mxu0 %v6684_v24  ;;  %v6693_v8 = vld [vmem:[#allocation7 + $0xa4] ss:$8 sps:$4 sm:$0xff]   ;;  %v6691_v24 = vld [vmem:[#allocation7 + $0xa0] ss:$8 sps:$4 sm:$0xff]  }
 0x33d   :  { %4606 = vmatpush1.bf16.msra.mxu1 %v6550_v26  ;;  %v6613_v26 = vld [vmem:[#allocation5 + $0x680] ss:$8 sps:$4 sm:$0xff]  }
 0x33e   :  { %4607 = vmatprep.subr.bf16.mxu1 %v6555_v42  ;;  %5288 = vmatpush1.bf16.msra.mxu0 %v6682_v23  ;;  %v6618_v42 = vld [vmem:[#allocation5 + $0x694] ss:$8 sps:$4 sm:$0xff]   ;;  %v6699_v23 = vld [vmem:[#allocation7 + $0xc4] ss:$8 sps:$4 sm:$0xff]  }
 0x33f   :  { %5289 = vmatprep.subr.bf16.mxu0 %v6687_v30 }
 0x341   :  { %4608 = vmatpush1.bf16.msra.mxu1 %v6553_v25  ;;  %v6616_v25 = vld [vmem:[#allocation5 + $0x690] ss:$8 sps:$4 sm:$0xff]  }
 0x342   :  { %4609 = vmatprep.subr.bf16.mxu1 %v6558_v21  ;;  %v6621_v21 = vld [vmem:[#allocation5 + $0x6a4] ss:$8 sps:$4 sm:$0xff]   ;;  %5290 = vmatpush1.bf16.msra.mxu0 %v6685_v6 }
 0x345   :  { %4610 = vmatpush1.bf16.msra.mxu1 %v6556_v40  ;;  %v6619_v40 = vld [vmem:[#allocation5 + $0x6a0] ss:$8 sps:$4 sm:$0xff]  }
 0x346   :  { %4611 = vmatprep.subr.bf16.mxu1 %v6561_v38  ;;  %v6624_v38 = vld [vmem:[#allocation5 + $0x6b4] ss:$8 sps:$4 sm:$0xff]  }
 0x349   :  { %4612 = vmatpush1.bf16.msra.mxu1 %v6559_v14  ;;  %v6622_v14 = vld [vmem:[#allocation5 + $0x6b0] ss:$8 sps:$4 sm:$0xff]  }
 0x34a   :  { %4613 = vmatprep.subr.bf16.mxu1 %v6564_v49  ;;  %v6627_v49 = vld [vmem:[#allocation5 + $0x6c4] ss:$8 sps:$4 sm:$0xff]  }
 0x34d   :  { %4614 = vmatpush1.bf16.msra.mxu1 %v6562_v16  ;;  %v6625_v16 = vld [vmem:[#allocation5 + $0x6c0] ss:$8 sps:$4 sm:$0xff]  }
 0x34e   :  { %4615 = vmatprep.subr.bf16.mxu1 %v6567_v32  ;;  %v6630_v32 = vld [vmem:[#allocation5 + $0x6d4] ss:$8 sps:$4 sm:$0xff]  }
 0x351   :  { %4616 = vmatpush1.bf16.msra.mxu1 %v6565_v61  ;;  %v6628_v61 = vld [vmem:[#allocation5 + $0x6d0] ss:$8 sps:$4 sm:$0xff]  }
 0x352   :  { %4617 = vmatprep.subr.bf16.mxu1 %v6570_v4  ;;  %v6633_v4 = vld [vmem:[#allocation5 + $0x6e4] ss:$8 sps:$4 sm:$0xff]  }
 0x355   :  { %4618 = vmatpush1.bf16.msra.mxu1 %v6568_v43  ;;  %v6634_v43 = vld [vmem:[#allocation5 + $0x6f0] ss:$8 sps:$4 sm:$0xff]  }
 0x356   :  { %4619 = vmatprep.subr.bf16.mxu1 %v6573_v15  ;;  %v6637_v15 = vld [vmem:[#allocation5 + $0x700] ss:$8 sps:$4 sm:$0xff]  }
 0x359   :  { %4620 = vmatpush1.bf16.msra.mxu1 %v6571_v59  ;;  %v6887_v59 = vmov 0  }
 0x35a   :  { %4621 = vmatprep.subr.bf16.mxu1 %v6576_v3  ;;  %v6645_v3 = vld [vmem:[#allocation5 + $0x724] ss:$8 sps:$4 sm:$0xff]  }
 0x35d   :  { %4622 = vmatpush1.bf16.msra.mxu1 %v6574_v35  ;;  %v6646_v35 = vld [vmem:[#allocation5 + $0x730] ss:$8 sps:$4 sm:$0xff]  }
 0x35e   :  { %4623 = vmatprep.subr.bf16.mxu1 %v6579_v0  ;;  %v6651_v0 = vld [vmem:[#allocation5 + $0x744] ss:$8 sps:$4 sm:$0xff]  }
 0x361   :  { %4624 = vmatpush1.bf16.msra.mxu1 %v6577_v47 }
 0x362   :  { %4625 = vmatprep.subr.bf16.mxu1 %v6582_v55  ;;  %v6652_v55 = vld [vmem:[#allocation5 + $0x750] ss:$8 sps:$4 sm:$0xff]  }
 0x365   :  { %4626 = vmatpush1.bf16.msra.mxu1 %v6580_v58  ;;  %v6660_v58 = vld [vmem:[#allocation5 + $0x774] ss:$8 sps:$4 sm:$0xff]  }
 0x366   :  { %4627 = vmatprep.subr.bf16.mxu1 %v6585_v22  ;;  %v6658_v22 = vld [vmem:[#allocation5 + $0x770] ss:$8 sps:$4 sm:$0xff]  }
 0x369   :  { %4628 = vmatpush1.bf16.msra.mxu1 %v6583_v41  ;;  %v6688_v41 = vld [vmem:[#allocation7 + $0x90] ss:$8 sps:$4 sm:$0xff]  }
 0x36a   :  { %4629 = vmatprep.subr.bf16.mxu1 %v6588_v2  ;;  %v6690_v2 = vld [vmem:[#allocation7 + $0x94] ss:$8 sps:$4 sm:$0xff]  }
 0x36b   :  { %5291 = vmatprep.subr.bf16.mxu0 %v6690_v2 }
 0x36c   :  { %5292 = vmatpush1.bf16.msra.mxu0 %v6688_v41 }
 0x36d   :  { %4630 = vmatpush1.bf16.msra.mxu1 %v6586_v45  ;;  %5293 = vmatprep.subr.bf16.mxu0 %v6693_v8  ;;  %v6696_v45 = vld [vmem:[#allocation7 + $0xb4] ss:$8 sps:$4 sm:$0xff]  }
 0x36e   :  { %4642 = vmatprep.subr.bf16.mxu1 %v6591_v11  ;;  %v6694_v11 = vld [vmem:[#allocation7 + $0xb0] ss:$8 sps:$4 sm:$0xff]  }
 0x370   :  { %4632 = vmatmul.mubr.bf16.vlgmr.msra.gmra.mrb[12].mxu1 %v2837_v10  ;;  %v6609_v10 = vld [vmem:[#allocation5 + $0x664] ss:$8 sps:$4 sm:$0xff]   ;;  %5294 = vmatpush1.bf16.msra.mxu0 %v6691_v24 }
 0x371   :  { %4643 = vmatpush1.bf16.msra.mxu1 %v6589_v33  ;;  %4674 = vmatprep.mubr.bf16.mxu1 %v2939_v53  ;;  %v6610_v53 = vld [vmem:[#allocation5 + $0x670] ss:$8 sps:$4 sm:$0xff]   ;;  %v6697_v33 = vld [vmem:[#allocation7 + $0xc0] ss:$8 sps:$4 sm:$0xff]  }
 0x372   :  { %4644 = vmatprep.subr.bf16.mxu1 %v6594_v44  ;;  %5295 = vmatprep.subr.bf16.mxu0 %v6696_v45  ;;  %v6703_v44 = vld [vmem:[#allocation7 + $0xe0] ss:$8 sps:$4 sm:$0xff]  }
 0x374   :  { %5296 = vmatpush1.bf16.msra.mxu0 %v6694_v11 }
 0x375   :  { %4645 = vmatpush1.bf16.msra.mxu1 %v6592_v52  ;;  %5297 = vmatprep.subr.bf16.mxu0 %v6699_v23  ;;  %v6708_v52 = vld [vmem:[#allocation7 + $0xf4] ss:$8 sps:$4 sm:$0xff]  }
 0x376   :  { %4646 = vmatprep.subr.bf16.mxu1 %v6597_v7  ;;  %v6706_v7 = vld [vmem:[#allocation7 + $0xf0] ss:$8 sps:$4 sm:$0xff]  }
 0x378   :  { %5298 = vmatpush1.bf16.msra.mxu0 %v6697_v33 }
 0x379   :  { %4647 = vmatpush1.bf16.msra.mxu1 %v6595_v27  ;;  %5299 = vmatprep.subr.bf16.mxu0 %v6702_v28  ;;  %v6711_v27 = vld [vmem:[#allocation7 + $0x104] ss:$8 sps:$4 sm:$0xff]  }
 0x37a   :  { %4648 = vmatprep.subr.bf16.mxu1 %v6600_v56 }
 0x37c   :  { %5300 = vmatpush1.bf16.msra.mxu0 %v6700_v18 }
 0x37d   :  { %4649 = vmatpush1.bf16.msra.mxu1 %v6598_v12 }
 0x37e   :  { %4650 = vmatprep.subr.bf16.mxu1 %v6603_v39 }
 0x381   :  { %4651 = vmatpush1.bf16.msra.mxu1 %v6601_v37 }
 0x382   :  { %4652 = vmatprep.subr.bf16.mxu1 %v6606_v51 }
 0x385   :  { %4653 = vmatpush1.bf16.msra.mxu1 %v6604_v19 }
 0x386   :  { %4654 = vmatprep.subr.bf16.mxu1 %v6609_v10 }
 0x389   :  { %4655 = vmatpush1.bf16.msra.mxu1 %v6607_v29 }
 0x38a   :  { %4656 = vmatprep.subr.bf16.mxu1 %v6612_v34 }
 0x38d   :  { %4657 = vmatpush1.bf16.msra.mxu1 %v6610_v53 }
 0x38e   :  { %4658 = vmatprep.subr.bf16.mxu1 %v6615_v62  ;;  %v8881_v62 = vld [vmem:[#allocation13_spill] sm:$0xff] }
 0x391   :  { %4659 = vmatpush1.bf16.msra.mxu1 %v6613_v26 }
 0x392   :  { %4660 = vmatprep.subr.bf16.mxu1 %v6618_v42 }
 0x395   :  { %4661 = vmatpush1.bf16.msra.mxu1 %v6616_v25 }
 0x396   :  { %4662 = vmatprep.subr.bf16.mxu1 %v6621_v21 }
 0x399   :  { %4663 = vmatpush1.bf16.msra.mxu1 %v6619_v40 }
 0x39a   :  { %4664 = vmatprep.subr.bf16.mxu1 %v6624_v38 }
 0x39d   :  { %4665 = vmatpush1.bf16.msra.mxu1 %v6622_v14 }
 0x39e   :  { %4666 = vmatprep.subr.bf16.mxu1 %v6627_v49 }
 0x3a1   :  { %4667 = vmatpush1.bf16.msra.mxu1 %v6625_v16 }
 0x3a2   :  { %4668 = vmatprep.subr.bf16.mxu1 %v6630_v32 }
 0x3a5   :  { %4669 = vmatpush1.bf16.msra.mxu1 %v6628_v61 }
 0x3a6   :  { %4670 = vmatprep.subr.bf16.mxu1 %v6633_v4 }
 0x3a9   :  { %4671 = vmatpush1.bf16.msra.mxu1 %v6631_v20 }
 0x3aa   :  { %4672 = vmatprep.subr.bf16.mxu1 %v6636_v13 }
 0x3ad   :  { %4673 = vmatpush1.bf16.msra.mxu1 %v6634_v43 }
 0x3ae   :  { %4685 = vmatprep.subr.bf16.mxu1 %v6639_v1 }
 0x3b0   :  { %4675 = vmatmul.mubr.bf16.vlgmr.msra.gmra.mrb[12].mxu1 %v2938_v36 }
 0x3b1   :  { %4686 = vmatpush1.bf16.msra.mxu1 %v6637_v15  ;;  %4717 = vmatprep.mubr.bf16.mxu1 %v6887_v59 }
 0x3b2   :  { %4687 = vmatprep.subr.bf16.mxu1 %v6642_v63 }
 0x3b5   :  { %4688 = vmatpush1.bf16.msra.mxu1 %v6640_v9 }
 0x3b6   :  { %4689 = vmatprep.subr.bf16.mxu1 %v6645_v3 }
 0x3b9   :  { %4690 = vmatpush1.bf16.msra.mxu1 %v6643_v50 }
 0x3ba   :  { %4691 = vmatprep.subr.bf16.mxu1 %v6648_v48 }
 0x3bb   :  { %v4461_v60 = vpop.f32.mrb[24].mxu0 }
 0x3bc   :  { %v4463_v57 = vpop.f32.mrb[25].mxu0 }
 0x3bd   :  { %4692 = vmatpush1.bf16.msra.mxu1 %v6646_v35  ;;  %v4465_v36 = vpop.f32.mrb[26].mxu0 }
 0x3be   :  { %4693 = vmatprep.subr.bf16.mxu1 %v6651_v0  ;;  %v4467_v47 = vpop.f32.mrb[27].mxu0 }
 0x3c1   :  { %4694 = vmatpush1.bf16.msra.mxu1 %v6649_v5 }
 0x3c2   :  { %4695 = vmatprep.subr.bf16.mxu1 %v6654_v31 }
 0x3c5   :  { %4696 = vmatpush1.bf16.msra.mxu1 %v6652_v55 }
 0x3c6   :  { %4697 = vmatprep.subr.bf16.mxu1 %v6657_v54 }
 0x3c9   :  { %4698 = vmatpush1.bf16.msra.mxu1 %v6655_v46 }
 0x3ca   :  { %4699 = vmatprep.subr.bf16.mxu1 %v6660_v58 }
 0x3cd   :  { %4700 = vmatpush1.bf16.msra.mxu1 %v6658_v22 }
 0x3d0   :  { %4718 = vmatmul.mubr.bf16.vlgmr.msra.gmra.mrb[12].mxu1 %v2940_v17  ;;  %v6705_v17 = vld [vmem:[#allocation7 + $0xe4] ss:$8 sps:$4 sm:$0xff]  }
 0x3d1   :  { %5301 = vmatprep.subr.bf16.mxu0 %v6705_v17 }
 0x3d2   :  { %5302 = vmatpush1.bf16.msra.mxu0 %v6703_v44 }
 0x3d3   :  { %5303 = vmatprep.subr.bf16.mxu0 %v6708_v52 }
 0x3d6   :  { %5304 = vmatpush1.bf16.msra.mxu0 %v6706_v7 }
 0x3d7   :  { %5314 = vmatprep.subr.bf16.mxu0 %v6711_v27 }
 0x4a3   :  { %v4719_v56 = vpop.f32.mrb[12].mxu1 }
 0x4a4   :  { %v6170_v12 = vadd.f32 %v4719_v56, %v4461_v60  ;;  %v4721_v39 = vpop.f32.mrb[13].mxu1 }
 0x4a5   :  { %v6171_v37 = vadd.f32 %v4721_v39, %v4463_v57  ;;  %v4723_v51 = vpop.f32.mrb[14].mxu1 }
 0x4a6   :  { %v6172_v19 = vadd.f32 %v4723_v51, %v4465_v36  ;;  %v4725_v10 = vpop.f32.mrb[15].mxu1 }
 0x4a7   :  { %v4728_v29 = vmax.f32 %v6170_v12, %v6171_v37  ;;  %v6173_v34 = vadd.f32 %v4725_v10, %v4467_v47 }
 0x4a9   :  { %v4732_v53 = vcombine.high %v4728_v29, %v4728_v29  ;;  %v4739_v26 = vrot.slane %v4728_v29, %v8881_v62  ;;  %v4729_v42 = vmax.f32 %v6172_v19, %v6173_v34  ;;  %v6019_v19 = vld [vmem:[%s8622_s4] ss:$0 sm:$0xff] }
 0x4ab   :  { %v4746_v25 = vrot.slane %v4732_v53, %v8881_v62  ;;  %v4747_v21 = vcombine.high %v4739_v26, %v4739_v26  ;;  %v4774_v40 = vsel %vm250_vm6, %v4739_v26, -inf  ;;  %v4749_v38 = vcombine.high %v4729_v42, %v4729_v42 }
 0x4ac   :  { %v4775_v14 = vrot.slane %v4774_v40, 4  ;;  %v4756_v49 = vrot.slane %v4729_v42, %v8881_v62 }
 0x4ad   :  { %v4748_v16 = vcombine.high %v4746_v25, %v4746_v25  ;;  %v4781_v32 = vsel %vm250_vm6, %v4747_v21, -inf  ;;  %v4788_v61 = vsel %vm250_vm6, %v4746_v25, -inf  ;;  %v4763_v4 = vrot.slane %v4749_v38, %v8881_v62 }
 0x4ae   :  { %v4776_v20 = vmax.f32 %v4774_v40, %v4775_v14  ;;  %v4782_v13 = vrot.slane %v4781_v32, 4  ;;  %v4789_v43 = vrot.slane %v4788_v61, 4  ;;  %v4764_v1 = vcombine.high %v4756_v49, %v4756_v49 }
 0x4af   :  { %v4795_v15 = vsel %vm250_vm6, %v4748_v16, -inf  ;;  %v4765_v63 = vcombine.high %v4763_v4, %v4763_v4  ;;  %v4802_v9 = vsel %vm250_vm6, %v4756_v49, -inf  ;;  %v4816_v59 = vsel %vm250_vm6, %v4763_v4, -inf }
 0x4b0   :  { %v4777_v3 = vrot.slane %v4776_v20, 2  ;;  %v4783_v50 = vmax.f32 %v4781_v32, %v4782_v13  ;;  %v4790_v48 = vmax.f32 %v4788_v61, %v4789_v43  ;;  %v4796_v35 = vrot.slane %v4795_v15, 4 }
 0x4b1   :  { %v4803_v0 = vrot.slane %v4802_v9, 4  ;;  %v4809_v5 = vsel %vm250_vm6, %v4764_v1, -inf  ;;  %v4817_v60 = vrot.slane %v4816_v59, 4  ;;  %v4823_v57 = vsel %vm250_vm6, %v4765_v63, -inf }
 0x4b2   :  { %v4778_v31 = vmax.f32 %v4776_v20, %v4777_v3  ;;  %v4784_v36 = vrot.slane %v4783_v50, 2  ;;  %v4791_v47 = vrot.slane %v4790_v48, 2  ;;  %v4797_v55 = vmax.f32 %v4795_v15, %v4796_v35 }
 0x4b3   :  { %v4804_v54 = vmax.f32 %v4802_v9, %v4803_v0  ;;  %v4810_v46 = vrot.slane %v4809_v5, 4  ;;  %v4818_v58 = vmax.f32 %v4816_v59, %v4817_v60  ;;  %v4824_v22 = vrot.slane %v4823_v57, 4 }
 0x4b4   :  { %v4779_v6 = vrot.slane %v4778_v31, 1  ;;  %v4785_v30 = vmax.f32 %v4783_v50, %v4784_v36  ;;  %v4792_v41 = vmax.f32 %v4790_v48, %v4791_v47  ;;  %v4798_v2 = vrot.slane %v4797_v55, 2 }
 0x4b5   :  { %v4805_v8 = vrot.slane %v4804_v54, 2  ;;  %v4811_v24 = vmax.f32 %v4809_v5, %v4810_v46  ;;  %v4819_v45 = vrot.slane %v4818_v58, 2  ;;  %v4825_v11 = vmax.f32 %v4823_v57, %v4824_v22  ;;  %v6717_v46 = vld [vmem:[#allocation7 + $0x124] ss:$8 sps:$4 sm:$0xff]   ;;  %v6720_v22 = vld [vmem:[#allocation7 + $0x134] ss:$8 sps:$4 sm:$0xff]  }
 0x4b6   :  { %v4793_v23 = vrot.slane %v4792_v41, 1  ;;  %v4786_v33 = vrot.slane %v4785_v30, 1  ;;  %v4799_v28 = vmax.f32 %v4797_v55, %v4798_v2  ;;  %v4780_v7 = vmax.f32 %v4778_v31, %v4779_v6  ;;  %v6709_v31 = vld [vmem:[#allocation7 + $0x100] ss:$8 sps:$4 sm:$0xff]   ;;  %v6714_v55 = vld [vmem:[#allocation7 + $0x114] ss:$8 sps:$4 sm:$0xff]  }
 0x4b7   :  { %v4806_v18 = vmax.f32 %v4804_v54, %v4805_v8  ;;  %v4812_v17 = vrot.slane %v4811_v24, 2  ;;  %v4820_v44 = vmax.f32 %v4818_v58, %v4819_v45  ;;  %v4826_v52 = vrot.slane %v4825_v11, 2  ;;  %v6712_v54 = vld [vmem:[#allocation7 + $0x110] ss:$8 sps:$4 sm:$0xff]   ;;  %v6715_v58 = vld [vmem:[#allocation7 + $0x120] ss:$8 sps:$4 sm:$0xff]  }
 0x4b8   :  { %v4794_v27 = vmax.f32 %v4792_v41, %v4793_v23  ;;  %v4800_v56 = vrot.slane %v4799_v28, 1  ;;  %v4787_v10 = vmax.f32 %v4785_v30, %v4786_v33  ;;  %v4837_v25 = vadd.f32 %v6019_v19, %v4780_v7  ;;  %v6718_v6 = vld [vmem:[#allocation7 + $0x130] ss:$8 sps:$4 sm:$0xff]   ;;  %v6723_v30 = vld [vmem:[#allocation7 + $0x144] ss:$8 sps:$4 sm:$0xff]  }
 0x4b9   :  { %v4807_v12 = vrot.slane %v4806_v18, 1  ;;  %v4813_v39 = vmax.f32 %v4811_v24, %v4812_v17  ;;  %v4821_v37 = vrot.slane %v4820_v44, 1  ;;  %v4827_v51 = vmax.f32 %v4825_v11, %v4826_v52  ;;  %v6721_v41 = vld [vmem:[#allocation7 + $0x140] ss:$8 sps:$4 sm:$0xff]   ;;  %v6726_v2 = vld [vmem:[#allocation7 + $0x154] ss:$8 sps:$4 sm:$0xff]  }
 0x4ba   :  { %v4801_v29 = vmax.f32 %v4799_v28, %v4800_v56  ;;  %v4839_v34 = vadd.f32 %v6019_v19, %v4794_v27  ;;  %v4838_v49 = vadd.f32 %v6019_v19, %v4787_v10  ;;  %v4845_v13 = vmax.f32 %v4837_v25, 0.0  ;;  %v6724_v8 = vld [vmem:[#allocation7 + $0x150] ss:$8 sps:$4 sm:$0xff]   ;;  %v6729_v24 = vld [vmem:[#allocation7 + $0x164] ss:$8 sps:$4 sm:$0xff]  }
 0x4bb   :  { %v4808_v53 = vmax.f32 %v4806_v18, %v4807_v12  ;;  %v4814_v62 = vrot.slane %v4813_v39, 1  ;;  %v4822_v26 = vmax.f32 %v4820_v44, %v4821_v37  ;;  %v4828_v42 = vrot.slane %v4827_v51, 1  ;;  %v6727_v45 = vld [vmem:[#allocation7 + $0x160] ss:$8 sps:$4 sm:$0xff]   ;;  %v6732_v11 = vld [vmem:[#allocation7 + $0x174] ss:$8 sps:$4 sm:$0xff]  }
 0x4bc   :  { %v4840_v16 = vadd.f32 %v6019_v19, %v4801_v29  ;;  %v4847_v43 = vmax.f32 %v4839_v34, 0.0  ;;  %v4846_v59 = vmax.f32 %v4838_v49, 0.0  ;;  %v6730_v23 = vld [vmem:[#allocation7 + $0x170] ss:$8 sps:$4 sm:$0xff]   ;;  %v6735_v33 = vld [vmem:[#allocation7 + $0x184] ss:$8 sps:$4 sm:$0xff]  }
 0x4bd   :  { %v4815_v21 = vmax.f32 %v4813_v39, %v4814_v62  ;;  %v4841_v40 = vadd.f32 %v6019_v19, %v4808_v53  ;;  %v4829_v38 = vmax.f32 %v4827_v51, %v4828_v42  ;;  %v4843_v14 = vadd.f32 %v6019_v19, %v4822_v26  ;;  %v6733_v28 = vld [vmem:[#allocation7 + $0x180] ss:$8 sps:$4 sm:$0xff]   ;;  %v6738_v18 = vld [vmem:[#allocation7 + $0x194] ss:$8 sps:$4 sm:$0xff]   ;;  %v6736_v17 = vld [vmem:[#allocation7 + $0x190] ss:$8 sps:$4 sm:$0xff]  }
 0x4be   :  { %v4848_v3 = vmax.f32 %v4840_v16, 0.0  ;;  %v6741_v44 = vld [vmem:[#allocation7 + $0x1a4] ss:$8 sps:$4 sm:$0xff]   ;;  %v6739_v52 = vld [vmem:[#allocation7 + $0x1a0] ss:$8 sps:$4 sm:$0xff]   ;;  %v6757_v34 = vld [vmem:[%s8625_s7 + $0x40] sm:$0xff]  }
 0x4bf   :  { %v4842_v32 = vadd.f32 %v6019_v19, %v4815_v21  ;;  %v4849_v61 = vmax.f32 %v4841_v40, 0.0  ;;  %v4844_v4 = vadd.f32 %v6019_v19, %v4829_v38  ;;  %v4851_v20 = vmax.f32 %v4843_v14, 0.0  ;;  %v6744_v7 = vld [vmem:[#allocation7 + $0x1b4] ss:$8 sps:$4 sm:$0xff]   ;;  %v6742_v27 = vld [vmem:[#allocation7 + $0x1b0] ss:$8 sps:$4 sm:$0xff]  }
 0x4c0   :  { %v6747_v56 = vld [vmem:[#allocation7 + $0x1c4] ss:$8 sps:$4 sm:$0xff]   ;;  %v6745_v12 = vld [vmem:[#allocation7 + $0x1c0] ss:$8 sps:$4 sm:$0xff]   ;;  %v6750_v39 = vld [vmem:[#allocation7 + $0x1d4] ss:$8 sps:$4 sm:$0xff]  }
 0x4c1   :  { %v4850_v1 = vmax.f32 %v4842_v32, 0.0  ;;  %v4855_v15 = vrot.slane %v4849_v61, 7  ;;  %v4852_v63 = vmax.f32 %v4844_v4, 0.0  ;;  %v4865_v9 = vrot.slane %v4851_v20, 7  ;;  %v6748_v37 = vld [vmem:[#allocation7 + $0x1d0] ss:$8 sps:$4 sm:$0xff]  }
 0x4c2   :  { %v6753_v51 = vld [vmem:[#allocation7 + $0x1e4] ss:$8 sps:$4 sm:$0xff]   ;;  %v6751_v19 = vld [vmem:[#allocation7 + $0x1e0] ss:$8 sps:$4 sm:$0xff]   ;;  %v6756_v10 = vld [vmem:[#allocation7 + $0x1f4] ss:$8 sps:$4 sm:$0xff]  }
 0x4c3   :  { %v4860_v50 = vrot.slane %v4850_v1, 7  ;;  %v4856_v48 = vsel %vm2440_vm2, %v4855_v15, %v4845_v13  ;;  %v4870_v35 = vrot.slane %v4852_v63, 7  ;;  %v8515_v0 = vsel %vm2440_vm2, %v4865_v9, %v4847_v43  ;;  %v6754_v29 = vld [vmem:[#allocation7 + $0x1f0] ss:$8 sps:$4 sm:$0xff]   ;;  %v6761_v25 = vld [vmem:[%s8625_s7 + $0x50] sm:$0xff]   ;;  %v6763_v40 = vld [vmem:[%s8625_s7 + $0x58] sm:$0xff]  }
 0x4c4   :  { %v4873_v47 = vpack.c.bf16 %v4856_v48, %v4856_v48  ;;  %v6758_v53 = vld [vmem:[%s8625_s7] sm:$0xff]   ;;  %v4875_v62 = vpack.c.bf16 %v8515_v0, %v8515_v0  ;;  %v6759_v26 = vld [vmem:[%s8625_s7 + $0x48] sm:$0xff]   ;;  %v6762_v21 = vld [vmem:[%s8625_s7 + $0x10] sm:$0xff]   ;;  %v6888_v43 = vmov 0.0   ;;  %vm6889_vm6 = vmmov 0  }
 0x4c5   :  { %v4861_v5 = vsel %vm2440_vm2, %v4860_v50, %v4846_v59  ;;  %v4871_v60 = vsel %vm2440_vm2, %v4870_v35, %v4848_v3  ;;  %v6760_v42 = vld [vmem:[%s8625_s7 + $0x8] sm:$0xff]   ;;  %v6764_v38 = vld [vmem:[%s8625_s7 + $0x18] sm:$0xff]   ;;  %v6765_v14 = vld [vmem:[%s8625_s7 + $0x60] sm:$0xff]  }
 0x4c6   :  { %v4874_v57 = vpack.c.bf16 %v4861_v5, %v4861_v5  ;;  %v4876_v36 = vpack.c.bf16 %v4871_v60, %v4871_v60  ;;  %v6766_v49 = vld [vmem:[%s8625_s7 + $0x20] sm:$0xff]   ;;  %v6767_v16 = vld [vmem:[%s8625_s7 + $0x68] sm:$0xff]   ;;  %v6769_v61 = vld [vmem:[%s8625_s7 + $0x70] sm:$0xff]  }
 0x4c7   :  { %v6768_v32 = vld [vmem:[%s8625_s7 + $0x28] sm:$0xff]   ;;  %v6770_v4 = vld [vmem:[%s8625_s7 + $0x30] sm:$0xff]   ;;  %v6771_v20 = vld [vmem:[%s8625_s7 + $0x78] sm:$0xff]  }
 0x4c8   :  { %5305 = vmatprep.mubr.bf16.mxu0 %v4874_v57  ;;  %v6772_v13 = vld [vmem:[%s8625_s7 + $0x38] sm:$0xff]   ;;  %v4941_v1 = vld [vmem:[%s8624_s6] sm:$0x3] }
 0x4c9   :  { %5306 = vmatmul.mubr.bf16.vlgmr.msra.gmra.mrb[28].mxu0 %v4873_v47  ;;  %v8882_v15 = vld [vmem:[#allocation12_spill] sm:$0xff]  ;;  %v6773_v47 = vld [vmem:[%s8627_s9] sm:$0xff]  }
 0x4ca   :  { %5315 = vmatpush1.bf16.msra.mxu0 %v6709_v31  ;;  %5346 = vmatprep.mubr.bf16.mxu0 %v4876_v36  ;;  %v8883_v63 = vsub.s32 0, %v8882_v15  ;;  %v8884_v59 = vsub.s32 1, %v8882_v15 }
 0x4cb   :  { %5316 = vmatprep.subr.bf16.mxu0 %v6714_v55 }
 0x4cc   :  { %v4946_v9 = vrot.slane %v4941_v1, %v8883_v63  ;;  %v4950_v3 = vrot.slane %v4941_v1, %v8884_v59 }
 0x4ce   :  { %5317 = vmatpush1.bf16.msra.mxu0 %v6712_v54  ;;  %v6774_v54 = vld [vmem:[%s8627_s9 + $0x8] sm:$0xff]  }
 0x4cf   :  { %5318 = vmatprep.subr.bf16.mxu0 %v6717_v46  ;;  %v6775_v46 = vld [vmem:[%s8627_s9 + $0x10] sm:$0xff]  }
 0x4d2   :  { %5319 = vmatpush1.bf16.msra.mxu0 %v6715_v58  ;;  %v6776_v58 = vld [vmem:[%s8627_s9 + $0x18] sm:$0xff]  }
 0x4d3   :  { %5320 = vmatprep.subr.bf16.mxu0 %v6720_v22  ;;  %v6777_v22 = vld [vmem:[%s8627_s9 + $0x20] sm:$0xff]  }
 0x4d6   :  { %5321 = vmatpush1.bf16.msra.mxu0 %v6718_v6  ;;  %v6778_v6 = vld [vmem:[%s8627_s9 + $0x28] sm:$0xff]  }
 0x4d7   :  { %5322 = vmatprep.subr.bf16.mxu0 %v6723_v30  ;;  %v6779_v30 = vld [vmem:[%s8627_s9 + $0x30] sm:$0xff]  }
 0x4da   :  { %5323 = vmatpush1.bf16.msra.mxu0 %v6721_v41  ;;  %v6780_v41 = vld [vmem:[%s8627_s9 + $0x38] sm:$0xff]   ;;  %s6890_s9 = smov [#allocation8]  }
 0x4db   :  { %5324 = vmatprep.subr.bf16.mxu0 %v6726_v2  ;;  %s5654_s21 = sshll.u32 %s6890_s9, 4  ;;  %s5655_s21 = int_to_ptr.vmem [resolvable:$true] %s5654_s21 }
 0x4dc   :  { %p6852_p11 = scmp.lt.s32.totalorder %s5655_s21, %s5655_s21 }
 0x4de   :  { %5325 = vmatpush1.bf16.msra.mxu0 %v6724_v8  ;;  %v6084_v8 = vld [vmem:[%s8626_s8] ss:$0 sm:$0xff]  ;;  %s6847_s8 = scalar_lea.vmem %s5655_s21, 32 }
 0x4df   :  { %5326 = vmatprep.subr.bf16.mxu0 %v6729_v24  ;;  %p6848_p10 = scmp.ne.s32.totalorder %s5655_s21, %s6847_s8  ;;  %p6853_p12 = scmp.lt.s32.totalorder %s6847_s8, %s6847_s8 }
 0x4e1   :  { %p6854_p13 = por %p6853_p12, %p6852_p11 }
 0x4e2   :  { %5327 = vmatpush1.bf16.msra.mxu0 %v6727_v45 }
 0x4e3   :  { %5328 = vmatprep.subr.bf16.mxu0 %v6732_v11  ;;  %p6855_p0 = pnand %p6854_p13, %p6848_p10 }
 0x4e6   :  { %5329 = vmatpush1.bf16.msra.mxu0 %v6730_v23 }
 0x4e7   :  { %5330 = vmatprep.subr.bf16.mxu0 %v6735_v33 }
 0x4ea   :  { %5331 = vmatpush1.bf16.msra.mxu0 %v6733_v28 }
 0x4eb   :  { %5332 = vmatprep.subr.bf16.mxu0 %v6738_v18 }
 0x4ee   :  { %5333 = vmatpush1.bf16.msra.mxu0 %v6736_v17  ;;  %v6101_v17 = vld [vmem:[%s8628_s10] ss:$0 sm:$0xff] }
 0x4ef   :  { %5334 = vmatprep.subr.bf16.mxu0 %v6741_v44 }
 0x4f2   :  { %5335 = vmatpush1.bf16.msra.mxu0 %v6739_v52 }
 0x4f3   :  { %5336 = vmatprep.subr.bf16.mxu0 %v6744_v7 }
 0x4f6   :  { %5337 = vmatpush1.bf16.msra.mxu0 %v6742_v27 }
 0x4f7   :  { %5338 = vmatprep.subr.bf16.mxu0 %v6747_v56 }
 0x4fa   :  { %5339 = vmatpush1.bf16.msra.mxu0 %v6745_v12 }
 0x4fb   :  { %5340 = vmatprep.subr.bf16.mxu0 %v6750_v39 }
 0x4fe   :  { %5341 = vmatpush1.bf16.msra.mxu0 %v6748_v37 }
 0x4ff   :  { %5342 = vmatprep.subr.bf16.mxu0 %v6753_v51 }
 0x502   :  { %5343 = vmatpush1.bf16.msra.mxu0 %v6751_v19 }
 0x503   :  { %5344 = vmatprep.subr.bf16.mxu0 %v6756_v10 }
 0x506   :  { %5345 = vmatpush1.bf16.msra.mxu0 %v6754_v29 }
 0x507   :  { %6119 = vmatprep.subr.bf16.mxu0 %v6757_v34 }
 0x509   :  { %5347 = vmatmul.mubr.bf16.vlgmr.msra.gmra.mrb[28].mxu0 %v4875_v62 }
 0x50a   :  { %6120 = vmatpush3.bf16.msra.mxu0 %v6758_v53 }
 0x50b   :  { %6121 = vmatprep.subr.bf16.mxu0 %v6759_v26 }
 0x50e   :  { %6122 = vmatpush3.bf16.msra.mxu0 %v6760_v42 }
 0x50f   :  { %6123 = vmatprep.subr.bf16.mxu0 %v6761_v25 }
 0x512   :  { %6124 = vmatpush3.bf16.msra.mxu0 %v6762_v21 }
 0x513   :  { %6125 = vmatprep.subr.bf16.mxu0 %v6763_v40 }
 0x516   :  { %6126 = vmatpush3.bf16.msra.mxu0 %v6764_v38 }
 0x517   :  { %6127 = vmatprep.subr.bf16.mxu0 %v6765_v14 }
 0x51a   :  { %6128 = vmatpush3.bf16.msra.mxu0 %v6766_v49 }
 0x51b   :  { %6129 = vmatprep.subr.bf16.mxu0 %v6767_v16 }
 0x51e   :  { %6130 = vmatpush3.bf16.msra.mxu0 %v6768_v32 }
 0x51f   :  { %6131 = vmatprep.subr.bf16.mxu0 %v6769_v61 }
 0x522   :  { %6132 = vmatpush3.bf16.msra.mxu0 %v6770_v4 }
 0x523   :  { %6133 = vmatprep.subr.bf16.mxu0 %v6771_v20 }
 0x526   :  { %6134 = vmatpush3.bf16.msra.mxu0 %v6772_v13 }
 0x527   :  { %6150 = vmatprep.subr.bf16.mxu0 %v6888_v43 }
 0x5dc   :  { %v5348_v50 = vpop.f32.mrb[28].mxu0 }
 0x5dd   :  { %v6174_v48 = vadd.f32 %v5348_v50, %v4946_v9  ;;  %v5350_v35 = vpop.f32.mrb[29].mxu0 }
 0x5de   :  { %v6175_v0 = vadd.f32 %v5350_v35, %v4950_v3  ;;  %v5352_v5 = vpop.f32.mrb[30].mxu0 }
 0x5df   :  { %v5355_v60 = vmax.f32 %v6174_v48, 0.0  ;;  %v5353_v57 = vpop.f32.mrb[31].mxu0 }
 0x5e0   :  { %v5356_v31 = vmax.f32 %v6175_v0, 0.0 }
 0x5e1   :  { %v5357_v55 = vpack.c.bf16 %v5355_v60, %v5355_v60 }
 0x5e2   :  { %v5358_v36 = vpack.c.bf16 %v5356_v31, %v5356_v31 }
 0x5e4   :  { %5526 = vmatprep.mubr.bf16.mxu0 %v5358_v36 }
 0x5e5   :  { %5527 = vmatmul.mubr.bf16.vlgmr.msra.gmra.mrb[32].mxu0 %v5357_v55 }
 0x5e6   :  { %6151 = vmatpush3.bf16.msra.mxu0 %v6773_v47  ;;  %6166 = vmatprep.mubr.msk.bf16.mxu0 %vm6889_vm6, %v6888_v43 }
 0x5e7   :  { %6152 = vmatprep.subr.bf16.mxu0 %v6888_v43 }
 0x5ea   :  { %6153 = vmatpush3.bf16.msra.mxu0 %v6774_v54 }
 0x5eb   :  { %6154 = vmatprep.subr.bf16.mxu0 %v6888_v43 }
 0x5ee   :  { %6155 = vmatpush3.bf16.msra.mxu0 %v6775_v46 }
 0x5ef   :  { %6156 = vmatprep.subr.bf16.mxu0 %v6888_v43 }
 0x5f2   :  { %6157 = vmatpush3.bf16.msra.mxu0 %v6776_v58 }
 0x5f3   :  { %6158 = vmatprep.subr.bf16.mxu0 %v6888_v43 }
 0x5f6   :  { %6159 = vmatpush3.bf16.msra.mxu0 %v6777_v22 }
 0x5f7   :  { %6160 = vmatprep.subr.bf16.mxu0 %v6888_v43 }
 0x5fa   :  { %6161 = vmatpush3.bf16.msra.mxu0 %v6778_v6 }
 0x5fb   :  { %6162 = vmatprep.subr.bf16.mxu0 %v6888_v43 }
 0x5fe   :  { %6163 = vmatpush3.bf16.msra.mxu0 %v6779_v30 }
 0x5ff   :  { %6164 = vmatprep.subr.bf16.mxu0 %v6888_v43 }
 0x602   :  { %6165 = vmatpush3.bf16.msra.mxu0 %v6780_v41 }
 0x6b8   :  { %v6135_v2 = vpop.f32.mrb[32].mxu0 }
 0x6b9   :  { %v6136_v24 = vpop.f32.mrb[33].mxu0 }
 0x6ba   :  { %v6137_v45 = vadd.f32 %v6136_v24, %v6135_v2  ;;  %v6138_v11 = vpop.f32.mrb[34].mxu0 }
 0x6bb   :  { %v6139_v23 = vpop.f32.mrb[35].mxu0 }
 0x6bc   :  { %v5529_v33 = vadd.f32 %v6137_v45, %v6084_v8 }
 0x6be   :  { %v5534_v28 = vmax.f32 %v5529_v33, 0.0 }
 0x6c0   :  { %v5535_v18 = vpack.c.bf16 %v5534_v28, %v5534_v28 }
 0x6c2   :  { %6167 = vmatmul.mubr.bf16.vlgmr.msra.gmra.mrb[36].mxu0 %v5535_v18 }
 0x795   :  { %v5641_v44 = vpop.f32.mrb[36].mxu0 }
 0x796   :  { %v5642_v52 = vadd.f32 %v6101_v17, %v5641_v44  ;;  %v6168_v7 = vpop.f32.mrb[37].mxu0 }
 0x797   :  { %v5644_v27 = vpop.f32.mrb[38].mxu0 }
 0x798   :  { %5647 = vst [vmem:[#allocation8] sm:$0x3] %v5642_v52  ;;  %v6169_v56 = vpop.f32.mrb[39].mxu0 }
 0x799   :  { %6858 = shalt.err (!%p6855_p0)
}
 0x79a   :  { %s6859_s10 = scalar_lea.hbm %s8629_s11, 32 }
 0x79b   :  { %p6860_p1 = scmp.ne.s32.totalorder %s8629_s11, %s6859_s10  ;;  %p6863_p2 = scmp.lt.u32.totalorder %s6859_s10, %s8629_s11 }
 0x79d   :  { %p6865_p3 = pnand %p6863_p2, %p6860_p1 }
 0x79f   :  { %6868 = shalt.err (!%p6865_p3)
}
 0x7a0   :  { %5657 = dma.vmem_to_hbm [thread:$0]  %s5655_s21, 32, %s8629_s11, [#allocation4]  }
 0x7a1   :  { %6873 = dma.done.wait [#allocation4], 32  }
 0x7a2   :  { %6874 = vsyncadd [#allocation4], 4294967264 }
 0x7a3   :  { %5661 = vsyncpa [#allocation3], 1 }
 0x7a4   :  { %5662 = vsyncpa [#allocation6], 1 }
 0x7a5   :  { %5663 = vsyncpa [#allocation4], 1 }

</bundles_post_ra>
